<compile_context>
chip_gen: v5e
topology: v5e:2x2
jax: 0.10.0
libtpu: 0.0.40
codegen_flags: <defaults>
</compile_context>

<pallas_src>
import functools

import jax
import jax.numpy as jnp
from jax.experimental import pallas as pl
from jax.experimental.pallas import tpu as pltpu

F32 = jnp.float32
BF16 = jnp.bfloat16
_VMEM_LIMIT = 64 * 1024 * 1024  # fits v7x's 64 MiB physical VMEM; tiles are far smaller


def _fold_bn(gamma, beta, mean, var, eps=1e-5):
    scale = gamma / jnp.sqrt(var + eps)
    bias = beta - mean * scale
    return scale.astype(F32), bias.astype(F32)


def _largest_divisor_leq(n, target):
    t = min(n, max(1, target))
    while n % t:
        t -= 1
    return t


def _row_tile(m, target=512):
    # Largest divisor of m that is <= target and satisfies the sublane rule
    # (multiple of 8 or the full dimension).
    if m <= target:
        return m
    for t in range(min(m, target), 0, -1):
        if m % t == 0 and t % 8 == 0:
            return t
    return m


# --------------------------------------------------------------------------
# Kernel 1: tiled matmul + folded BN (+ optional input/output ReLU, residual)
#   rows = flattened (N*H*W) pixels, lanes = output channels.
# --------------------------------------------------------------------------
def _matmul_affine_kernel(x_ref, w_ref, s_ref, b_ref, o_ref, *, relu_out):
    y = jnp.dot(x_ref[...].astype(BF16), w_ref[...],
                preferred_element_type=jnp.float32)
    y = y * s_ref[...] + b_ref[...]
    if relu_out:
        y = jnp.maximum(y, 0.0)
    o_ref[...] = y


def matmul_affine(x, w_t_bf16, scale, bias, *, relu_out):
    m, cin = x.shape
    cout = w_t_bf16.shape[1]
    tm = _row_tile(m)
    kernel = functools.partial(_matmul_affine_kernel, relu_out=relu_out)
    return pl.pallas_call(
        kernel,
        out_shape=jax.ShapeDtypeStruct((m, cout), F32),
        grid=(m // tm,),
        in_specs=[
            pl.BlockSpec((tm, cin), lambda i: (i, 0)),
            pl.BlockSpec((cin, cout), lambda i: (0, 0)),
            pl.BlockSpec((1, cout), lambda i: (0, 0)),
            pl.BlockSpec((1, cout), lambda i: (0, 0)),
        ],
        out_specs=pl.BlockSpec((tm, cout), lambda i: (i, 0)),
        compiler_params=pltpu.CompilerParams(
            dimension_semantics=("parallel",),
            vmem_limit_bytes=_VMEM_LIMIT),
    )(x, w_t_bf16, scale.reshape(1, -1), bias.reshape(1, -1))


def _relu_matmul_add_relu_kernel(x_ref, w_ref, s_ref, b_ref, res_ref, o_ref):
    x = jnp.maximum(x_ref[...], 0.0)
    y = jnp.dot(x.astype(BF16), w_ref[...], preferred_element_type=jnp.float32)
    y = y * s_ref[...] + b_ref[...] + res_ref[...]
    o_ref[...] = jnp.maximum(y, 0.0)


def relu_matmul_affine_add_relu(x, w_t_bf16, scale, bias, res):
    m, cin = x.shape
    cout = w_t_bf16.shape[1]
    assert res.shape == (m, cout)
    tm = _row_tile(m)
    return pl.pallas_call(
        _relu_matmul_add_relu_kernel,
        out_shape=jax.ShapeDtypeStruct((m, cout), F32),
        grid=(m // tm,),
        in_specs=[
            pl.BlockSpec((tm, cin), lambda i: (i, 0)),
            pl.BlockSpec((cin, cout), lambda i: (0, 0)),
            pl.BlockSpec((1, cout), lambda i: (0, 0)),
            pl.BlockSpec((1, cout), lambda i: (0, 0)),
            pl.BlockSpec((tm, cout), lambda i: (i, 0)),
        ],
        out_specs=pl.BlockSpec((tm, cout), lambda i: (i, 0)),
        compiler_params=pltpu.CompilerParams(
            dimension_semantics=("parallel",),
            vmem_limit_bytes=_VMEM_LIMIT),
    )(x, w_t_bf16, scale.reshape(1, -1), bias.reshape(1, -1), res)


# --------------------------------------------------------------------------
# Kernel 2: axial attention core, TB rows per grid step, channels-last.
#   qkv_ref : (TB, K, 2*OP)  f32, already bn_qkv-normalized
#   qk_emb  : (K, gp, K)     bf16, [i, c, j] (first gp/2 = q-emb, rest = k-emb)
#   v_emb   : (K, K, gp)     bf16, [i, j, c]
#   sim_s/b : (3*groups,)    f32 in SMEM  (bn_similarity folded, per-group scalars)
#   obn     : (4, OP)        f32: rows [sv_scale, sv_bias, sve_scale, sve_bias]
#   output  : (TB, K, OP)    f32
# --------------------------------------------------------------------------
def _attention_core_kernel(qkv_ref, qk_emb_ref, v_emb_ref, sim_s_ref, sim_b_ref,
                           obn_ref, o_ref, *, groups, gp):
    qkv = qkv_ref[...]                       # (TB, K, 2*OP) f32
    qk_emb = qk_emb_ref[...]                 # (K, gp, K) bf16
    v_emb = v_emb_ref[...]                   # (K, K, gp) bf16
    gph = gp // 2

    for g in range(groups):
        base = 2 * gp * g
        q = qkv[:, :, base: base + gph].astype(BF16)            # (TB, K, gp/2)
        k = qkv[:, :, base + gph: base + gp].astype(BF16)       # (TB, K, gp/2)
        v = qkv[:, :, base + gp: base + 2 * gp].astype(BF16)    # (TB, K, gp)

        qe = qk_emb[:, :gph, :]                                  # (K, gp/2, K)
        ke = qk_emb[:, gph:, :]                                  # (K, gp/2, K)

        # MXU contractions (batched dot_generals):
        #   qr[t,i,j] = sum_c q[t,i,c] * q_emb[c,i,j]
        #   kr[t,i,j] = sum_c k[t,j,c] * k_emb[c,j,i]   (computed then transposed)
        #   qk[t,i,j] = sum_c q[t,i,c] * k[t,j,c]
        qr = jnp.einsum('tic,icj->tij', q, qe,
                        preferred_element_type=jnp.float32)      # (TB, K, K)
        kr = jnp.einsum('tic,icj->tij', k, ke,
                        preferred_element_type=jnp.float32)
        kr = jnp.swapaxes(kr, 1, 2)
        qk = jnp.einsum('tic,tjc->tij', q, k,
                        preferred_element_type=jnp.float32)

        # bn_similarity (per-group scalars, channels ordered [qk | qr | kr]), sum.
        logits = (qk * sim_s_ref[g] + sim_b_ref[g]
                  + qr * sim_s_ref[groups + g] + sim_b_ref[groups + g]
                  + kr * sim_s_ref[2 * groups + g] + sim_b_ref[2 * groups + g])

        # softmax over the key axis (EUP reciprocal).
        m = jnp.max(logits, axis=-1, keepdims=True)
        e = jnp.exp(logits - m)
        sim = e * pl.reciprocal(jnp.sum(e, axis=-1, keepdims=True), approx=True)
        sim16 = sim.astype(BF16)

        # sv[t,i,c]  = sum_j sim[t,i,j] * v[t,j,c]
        # sve[t,i,c] = sum_j sim[t,i,j] * v_emb[c,i,j]
        sv = jnp.einsum('tij,tjc->tic', sim16, v,
                        preferred_element_type=jnp.float32)      # (TB, K, gp)
        sve = jnp.einsum('tij,ijc->tic', sim16, v_emb,
                         preferred_element_type=jnp.float32)     # (TB, K, gp)

        # bn_output on the interleaved (sv, sve) channels, then sum over the pair.
        sv_s = obn_ref[0:1, g * gp:(g + 1) * gp].reshape(1, 1, gp)
        sv_b = obn_ref[1:2, g * gp:(g + 1) * gp].reshape(1, 1, gp)
        sve_s = obn_ref[2:3, g * gp:(g + 1) * gp].reshape(1, 1, gp)
        sve_b = obn_ref[3:4, g * gp:(g + 1) * gp].reshape(1, 1, gp)
        o_ref[:, :, g * gp:(g + 1) * gp] = sv * sv_s + sv_b + sve * sve_s + sve_b


def axial_attention_core(qkv, qk_emb, v_emb, sim_scale, sim_bias, out_bn,
                         *, groups, gp):
    b, k, op2 = qkv.shape
    op = op2 // 2
    tb = _largest_divisor_leq(b, max(8, 256 // max(k, 1)))
    kernel = functools.partial(_attention_core_kernel, groups=groups, gp=gp)
    return pl.pallas_call(
        kernel,
        out_shape=jax.ShapeDtypeStruct((b, k, op), F32),
        grid=(b // tb,),
        in_specs=[
            pl.BlockSpec((tb, k, op2), lambda i: (i, 0, 0)),   # qkv rows
            pl.BlockSpec((k, gp, k), lambda i: (0, 0, 0)),     # q/k embeddings
            pl.BlockSpec((k, k, gp), lambda i: (0, 0, 0)),     # v embeddings
            pl.BlockSpec(memory_space=pltpu.MemorySpace.SMEM),  # sim scale
            pl.BlockSpec(memory_space=pltpu.MemorySpace.SMEM),  # sim bias
            pl.BlockSpec((4, op), lambda i: (0, 0)),           # out-BN table
        ],
        out_specs=pl.BlockSpec((tb, k, op), lambda i: (i, 0, 0)),
        compiler_params=pltpu.CompilerParams(
            dimension_semantics=("parallel",),
            vmem_limit_bytes=_VMEM_LIMIT),
    )(qkv, qk_emb, v_emb, sim_scale, sim_bias, out_bn)


# --------------------------------------------------------------------------
# AxialBlock forward
# --------------------------------------------------------------------------
def axial_block_forward(x_nchw, params, *, groups=1):
    n, cin, h, w = x_nchw.shape
    width = params["conv_down_w"].shape[0]
    cout = params["conv_up_w"].shape[0]
    # residual add requires inplanes == planes*expansion (downsample=None)
    assert cin == cout, "AxialBlock (no downsample) requires inplanes == planes*expansion"
    assert width % groups == 0
    gp = width // groups
    assert gp % 2 == 0
    op = width

    # Host-side weight prep (one-time under jit): pre-transpose + bf16-cast.
    w_down_t = jnp.transpose(params["conv_down_w"]).astype(BF16)   # (cin, width)
    w_up_t = jnp.transpose(params["conv_up_w"]).astype(BF16)       # (width, cout)

    def prep_attn(p):
        w_qkv_t = jnp.transpose(p["w_qkv"]).astype(BF16)           # (width, 2*OP)
        emb = p["emb"]                                             # (2*gp, K, K) [c,i,j]
        qk_emb = jnp.transpose(emb[:gp], (1, 0, 2)).astype(BF16)   # (K, gp, K)  [i,c,j]
        v_emb = jnp.transpose(emb[gp:], (1, 2, 0)).astype(BF16)    # (K, K, gp)  [i,j,c]
        os = p["out_scale"].reshape(op, 2)
        ob = p["out_bias"].reshape(op, 2)
        out_bn = jnp.stack([os[:, 0], ob[:, 0], os[:, 1], ob[:, 1]], axis=0)  # (4, OP)
        return w_qkv_t, qk_emb, v_emb, out_bn

    # 1) conv_down + bn1 + relu on NHWC rows
    x_nhwc = jnp.transpose(x_nchw, (0, 2, 3, 1))                   # (N,H,W,cin)
    h1 = matmul_affine(x_nhwc.reshape(n * h * w, cin), w_down_t,
                       params["bn1_scale"], params["bn1_bias"], relu_out=True)

    # 2) height attention: rows ordered (n, w), seq = h
    ph = params["attn_h"]
    wq_h, qk_emb_h, v_emb_h, out_bn_h = prep_attn(ph)
    xh = h1.reshape(n, h, w, width).transpose(0, 2, 1, 3).reshape(n * w * h, width)
    qkv_h = matmul_affine(xh, wq_h, ph["qkv_scale"], ph["qkv_bias"], relu_out=False)
    att_h = axial_attention_core(qkv_h.reshape(n * w, h, 2 * op),
                                 qk_emb_h, v_emb_h,
                                 ph["sim_scale"], ph["sim_bias"], out_bn_h,
                                 groups=groups, gp=gp)             # (N*W, H, OP)

    # 3) width attention: rows ordered (n, h), seq = w
    pw = params["attn_w"]
    wq_w, qk_emb_w, v_emb_w, out_bn_w = prep_attn(pw)
    xw = att_h.reshape(n, w, h, width).transpose(0, 2, 1, 3).reshape(n * h * w, width)
    qkv_w = matmul_affine(xw, wq_w, pw["qkv_scale"], pw["qkv_bias"], relu_out=False)
    att_w = axial_attention_core(qkv_w.reshape(n * h, w, 2 * op),
                                 qk_emb_w, v_emb_w,
                                 pw["sim_scale"], pw["sim_bias"], out_bn_w,
                                 groups=groups, gp=gp)             # (N*H, W, OP)

    # 4) relu -> conv_up + bn2 + residual + relu (rows are (n,h,w), NHWC already)
    y = relu_matmul_affine_add_relu(att_w.reshape(n * h * w, width), w_up_t,
                                    params["bn2_scale"], params["bn2_bias"],
                                    x_nhwc.reshape(n * h * w, cin))
    return y.reshape(n, h, w, cout).transpose(0, 3, 1, 2)


# --------------------------------------------------------------------------
# Deterministic synthetic parameters (shapes follow AxialBlock.__init__)
# --------------------------------------------------------------------------
def init_params(key, inplanes, planes, groups, K):
    expansion = 2
    width = planes  # base_width=64 -> width = planes * (64/64)
    gp = width // groups
    keys = list(jax.random.split(key, 64))
    it = iter(keys)

    def nrm(shape, std=1.0):
        return std * jax.random.normal(next(it), shape, dtype=F32)

    def bn(c):
        gamma = 1.0 + 0.1 * jax.random.normal(next(it), (c,), F32)
        beta = 0.1 * jax.random.normal(next(it), (c,), F32)
        mean = 0.1 * jax.random.normal(next(it), (c,), F32)
        var = 1.0 + 0.1 * jnp.abs(jax.random.normal(next(it), (c,), F32))
        return _fold_bn(gamma, beta, mean, var)

    def attn_params():
        w_qkv = nrm((2 * width, width), (1.0 / width) ** 0.5)
        qkv_s, qkv_b = bn(2 * width)
        sim_s, sim_b = bn(3 * groups)
        out_s, out_b = bn(2 * width)
        relative = nrm((2 * gp, 2 * K - 1), (1.0 / gp) ** 0.5)
        # all_embeddings[c, i, j] = relative[c, i - j + K - 1]
        rel_idx = jnp.arange(K)[:, None] - jnp.arange(K)[None, :] + K - 1
        emb = relative[:, rel_idx]                                  # (2*gp, K, K)
        return dict(w_qkv=w_qkv, qkv_scale=qkv_s, qkv_bias=qkv_b, emb=emb,
                    sim_scale=sim_s, sim_bias=sim_b,
                    out_scale=out_s, out_bias=out_b)

    bn1_s, bn1_b = bn(width)
    attn_h = attn_params()
    attn_w = attn_params()
    bn2_s, bn2_b = bn(planes * expansion)
    return dict(
        conv_down_w=nrm((width, inplanes), (1.0 / inplanes) ** 0.5),
        bn1_scale=bn1_s, bn1_bias=bn1_b,
        attn_h=attn_h, attn_w=attn_w,
        conv_up_w=nrm((planes * expansion, width), (1.0 / width) ** 0.5),
        bn2_scale=bn2_s, bn2_bias=bn2_b,
    )


if __name__ == "__main__":
    # small config: inplanes == planes*expansion (downsample=None),
    # kernel_size == H == W, stride=1, groups=1.
    N, inplanes, planes, H, W = 2, 8, 4, 8, 8
    groups = 1
    key = jax.random.PRNGKey(0)
    kx, kp = jax.random.split(key)
    x = jax.random.normal(kx, (N, inplanes, H, W), dtype=F32)
    params = init_params(kp, inplanes, planes, groups, H)

    fwd = jax.jit(functools.partial(axial_block_forward, groups=groups))
    out = fwd(x, params)
    jax.block_until_ready(out)
    assert out.shape == (N, planes * 2, H, W), out.shape
    assert bool(jnp.all(jnp.isfinite(out)))
    print("KERNEL_OK")
</pallas_src>

<mosaic_0001>
module attributes {stable_mosaic.version = 11 : i64} {
  func.func @_matmul_affine_kernel(%arg0: i32, %arg1: memref<128x8xf32, #tpu.memory_space<vmem>>, %arg2: memref<8x4xbf16, #tpu.memory_space<vmem>>, %arg3: memref<1x4xf32, #tpu.memory_space<vmem>>, %arg4: memref<1x4xf32, #tpu.memory_space<vmem>>, %arg5: memref<128x4xf32, #tpu.memory_space<vmem>>) attributes {dimension_semantics = [#tpu.dimension_semantics<parallel>], iteration_bounds = array<i64: 1>, scalar_prefetch = 0 : i64, scratch_operands = 0 : i64, tpu.core_type = #tpu.core_type<tc>, window_params = [{transform_indices = @transform_0, window_bounds = array<i64: 128, 8>}, {pipeline_mode = #tpu.pipeline_mode<synchronous>, transform_indices = @transform_1, window_bounds = array<i64: 8, 4>}, {pipeline_mode = #tpu.pipeline_mode<synchronous>, transform_indices = @transform_2, window_bounds = array<i64: 1, 4>}, {pipeline_mode = #tpu.pipeline_mode<synchronous>, transform_indices = @transform_3, window_bounds = array<i64: 1, 4>}, {transform_indices = @transform_4, window_bounds = array<i64: 128, 4>}]} {
    %c0 = arith.constant 0 : index
    %c0_0 = arith.constant 0 : index
    %0 = vector.load %arg1[%c0, %c0_0] : memref<128x8xf32, #tpu.memory_space<vmem>>, vector<128x8xf32>
    %1 = arith.truncf %0 : vector<128x8xf32> to vector<128x8xbf16>
    %c0_1 = arith.constant 0 : index
    %c0_2 = arith.constant 0 : index
    %2 = vector.load %arg2[%c0_1, %c0_2] : memref<8x4xbf16, #tpu.memory_space<vmem>>, vector<8x4xbf16>
    %cst = arith.constant dense<0.000000e+00> : vector<128x4xf32>
    %3 = tpu.matmul %1, %2, %cst {dimension_numbers = #tpu.dot_dimension_numbers<[1], [0], [0], [1], [0, 0, 1, 1], [], []>} : vector<128x8xbf16>, vector<8x4xbf16>, vector<128x4xf32> -> vector<128x4xf32>
    %c0_3 = arith.constant 0 : index
    %c0_4 = arith.constant 0 : index
    %4 = vector.load %arg3[%c0_3, %c0_4] : memref<1x4xf32, #tpu.memory_space<vmem>>, vector<1x4xf32>
    %5 = vector.broadcast %4 : vector<1x4xf32> to vector<128x4xf32>
    %6 = arith.mulf %3, %5 : vector<128x4xf32>
    %c0_5 = arith.constant 0 : index
    %c0_6 = arith.constant 0 : index
    %7 = vector.load %arg4[%c0_5, %c0_6] : memref<1x4xf32, #tpu.memory_space<vmem>>, vector<1x4xf32>
    %8 = vector.broadcast %7 : vector<1x4xf32> to vector<128x4xf32>
    %9 = arith.addf %6, %8 : vector<128x4xf32>
    %cst_7 = arith.constant 0.000000e+00 : f32
    %10 = vector.broadcast %cst_7 : f32 to vector<128x4xf32>
    %11 = arith.maximumf %9, %10 : vector<128x4xf32>
    %c0_8 = arith.constant 0 : index
    %c0_9 = arith.constant 0 : index
    %12 = vector.load %arg5[%c0_8, %c0_9] : memref<128x4xf32, #tpu.memory_space<vmem>>, vector<128x4xf32>
    tpu.vector_store %arg5[%c0_8, %c0_9], %11 {strides = array<i32>} : memref<128x4xf32, #tpu.memory_space<vmem>>, vector<128x4xf32>,
    return
  }
  func.func @transform_0(%arg0: i32) -> (i32, i32) {
    %c0_i32 = arith.constant 0 : i32
    %c0_i32_0 = arith.constant 0 : i32
    return %arg0, %c0_i32 : i32, i32
  }
  func.func @transform_1(%arg0: i32) -> (i32, i32) {
    %c0_i32 = arith.constant 0 : i32
    %c0_i32_0 = arith.constant 0 : i32
    %c0_i32_1 = arith.constant 0 : i32
    return %c0_i32, %c0_i32_0 : i32, i32
  }
  func.func @transform_2(%arg0: i32) -> (i32, i32) {
    %c0_i32 = arith.constant 0 : i32
    %c0_i32_0 = arith.constant 0 : i32
    %c0_i32_1 = arith.constant 0 : i32
    return %c0_i32, %c0_i32_0 : i32, i32
  }
  func.func @transform_3(%arg0: i32) -> (i32, i32) {
    %c0_i32 = arith.constant 0 : i32
    %c0_i32_0 = arith.constant 0 : i32
    %c0_i32_1 = arith.constant 0 : i32
    return %c0_i32, %c0_i32_0 : i32, i32
  }
  func.func @transform_4(%arg0: i32) -> (i32, i32) {
    %c0_i32 = arith.constant 0 : i32
    %c0_i32_0 = arith.constant 0 : i32
    return %arg0, %c0_i32 : i32, i32
  }
}

module attributes {stable_mosaic.version = 11 : i64} {
  func.func @_matmul_affine_kernel(%arg0: i32, %arg1: memref<128x4xf32, #tpu.memory_space<vmem>>, %arg2: memref<4x8xbf16, #tpu.memory_space<vmem>>, %arg3: memref<1x8xf32, #tpu.memory_space<vmem>>, %arg4: memref<1x8xf32, #tpu.memory_space<vmem>>, %arg5: memref<128x8xf32, #tpu.memory_space<vmem>>) attributes {dimension_semantics = [#tpu.dimension_semantics<parallel>], iteration_bounds = array<i64: 1>, scalar_prefetch = 0 : i64, scratch_operands = 0 : i64, tpu.core_type = #tpu.core_type<tc>, window_params = [{transform_indices = @transform_0, window_bounds = array<i64: 128, 4>}, {pipeline_mode = #tpu.pipeline_mode<synchronous>, transform_indices = @transform_1, window_bounds = array<i64: 4, 8>}, {pipeline_mode = #tpu.pipeline_mode<synchronous>, transform_indices = @transform_2, window_bounds = array<i64: 1, 8>}, {pipeline_mode = #tpu.pipeline_mode<synchronous>, transform_indices = @transform_3, window_bounds = array<i64: 1, 8>}, {transform_indices = @transform_4, window_bounds = array<i64: 128, 8>}]} {
    %c0 = arith.constant 0 : index
    %c0_0 = arith.constant 0 : index
    %0 = vector.load %arg1[%c0, %c0_0] : memref<128x4xf32, #tpu.memory_space<vmem>>, vector<128x4xf32>
    %1 = arith.truncf %0 : vector<128x4xf32> to vector<128x4xbf16>
    %c0_1 = arith.constant 0 : index
    %c0_2 = arith.constant 0 : index
    %2 = vector.load %arg2[%c0_1, %c0_2] : memref<4x8xbf16, #tpu.memory_space<vmem>>, vector<4x8xbf16>
    %cst = arith.constant dense<0.000000e+00> : vector<128x8xf32>
    %3 = tpu.matmul %1, %2, %cst {dimension_numbers = #tpu.dot_dimension_numbers<[1], [0], [0], [1], [0, 0, 1, 1], [], []>} : vector<128x4xbf16>, vector<4x8xbf16>, vector<128x8xf32> -> vector<128x8xf32>
    %c0_3 = arith.constant 0 : index
    %c0_4 = arith.constant 0 : index
    %4 = vector.load %arg3[%c0_3, %c0_4] : memref<1x8xf32, #tpu.memory_space<vmem>>, vector<1x8xf32>
    %5 = vector.broadcast %4 : vector<1x8xf32> to vector<128x8xf32>
    %6 = arith.mulf %3, %5 : vector<128x8xf32>
    %c0_5 = arith.constant 0 : index
    %c0_6 = arith.constant 0 : index
    %7 = vector.load %arg4[%c0_5, %c0_6] : memref<1x8xf32, #tpu.memory_space<vmem>>, vector<1x8xf32>
    %8 = vector.broadcast %7 : vector<1x8xf32> to vector<128x8xf32>
    %9 = arith.addf %6, %8 : vector<128x8xf32>
    %c0_7 = arith.constant 0 : index
    %c0_8 = arith.constant 0 : index
    %10 = vector.load %arg5[%c0_7, %c0_8] : memref<128x8xf32, #tpu.memory_space<vmem>>, vector<128x8xf32>
    tpu.vector_store %arg5[%c0_7, %c0_8], %9 {strides = array<i32>} : memref<128x8xf32, #tpu.memory_space<vmem>>, vector<128x8xf32>,
    return
  }
  func.func @transform_0(%arg0: i32) -> (i32, i32) {
    %c0_i32 = arith.constant 0 : i32
    %c0_i32_0 = arith.constant 0 : i32
    return %arg0, %c0_i32 : i32, i32
  }
  func.func @transform_1(%arg0: i32) -> (i32, i32) {
    %c0_i32 = arith.constant 0 : i32
    %c0_i32_0 = arith.constant 0 : i32
    %c0_i32_1 = arith.constant 0 : i32
    return %c0_i32, %c0_i32_0 : i32, i32
  }
  func.func @transform_2(%arg0: i32) -> (i32, i32) {
    %c0_i32 = arith.constant 0 : i32
    %c0_i32_0 = arith.constant 0 : i32
    %c0_i32_1 = arith.constant 0 : i32
    return %c0_i32, %c0_i32_0 : i32, i32
  }
  func.func @transform_3(%arg0: i32) -> (i32, i32) {
    %c0_i32 = arith.constant 0 : i32
    %c0_i32_0 = arith.constant 0 : i32
    %c0_i32_1 = arith.constant 0 : i32
    return %c0_i32, %c0_i32_0 : i32, i32
  }
  func.func @transform_4(%arg0: i32) -> (i32, i32) {
    %c0_i32 = arith.constant 0 : i32
    %c0_i32_0 = arith.constant 0 : i32
    return %arg0, %c0_i32 : i32, i32
  }
}

module attributes {stable_mosaic.version = 11 : i64} {
  func.func @_attention_core_kernel(%arg0: i32, %arg1: memref<16x8x8xf32, #tpu.memory_space<vmem>>, %arg2: memref<8x4x8xbf16, #tpu.memory_space<vmem>>, %arg3: memref<8x8x4xbf16, #tpu.memory_space<vmem>>, %arg4: memref<3xf32, #tpu.memory_space<smem>>, %arg5: memref<3xf32, #tpu.memory_space<smem>>, %arg6: memref<4x4xf32, #tpu.memory_space<vmem>>, %arg7: memref<16x8x4xf32, #tpu.memory_space<vmem>>) attributes {dimension_semantics = [#tpu.dimension_semantics<parallel>], iteration_bounds = array<i64: 1>, scalar_prefetch = 0 : i64, scratch_operands = 0 : i64, tpu.core_type = #tpu.core_type<tc>, window_params = [{transform_indices = @transform_0, window_bounds = array<i64: 16, 8, 8>}, {pipeline_mode = #tpu.pipeline_mode<synchronous>, transform_indices = @transform_1, window_bounds = array<i64: 8, 4, 8>}, {pipeline_mode = #tpu.pipeline_mode<synchronous>, transform_indices = @transform_2, window_bounds = array<i64: 8, 8, 4>}, {transform_indices = @transform_3, window_bounds = array<i64: 3>}, {transform_indices = @transform_4, window_bounds = array<i64: 3>}, {pipeline_mode = #tpu.pipeline_mode<synchronous>, transform_indices = @transform_5, window_bounds = array<i64: 4, 4>}, {transform_indices = @transform_6, window_bounds = array<i64: 16, 8, 4>}]} {
    %c0 = arith.constant 0 : index
    %c0_0 = arith.constant 0 : index
    %c0_1 = arith.constant 0 : index
    %0 = vector.load %arg1[%c0, %c0_0, %c0_1] : memref<16x8x8xf32, #tpu.memory_space<vmem>>, vector<16x8x8xf32>
    %c0_2 = arith.constant 0 : index
    %c0_3 = arith.constant 0 : index
    %c0_4 = arith.constant 0 : index
    %1 = vector.load %arg2[%c0_2, %c0_3, %c0_4] : memref<8x4x8xbf16, #tpu.memory_space<vmem>>, vector<8x4x8xbf16>
    %c0_5 = arith.constant 0 : index
    %c0_6 = arith.constant 0 : index
    %c0_7 = arith.constant 0 : index
    %2 = vector.load %arg3[%c0_5, %c0_6, %c0_7] : memref<8x8x4xbf16, #tpu.memory_space<vmem>>, vector<8x8x4xbf16>
    %3 = vector.extract_strided_slice %0 {offsets = [0, 0, 0], sizes = [16, 8, 2], strides = [1, 1, 1]} : vector<16x8x8xf32> to vector<16x8x2xf32>
    %4 = arith.truncf %3 : vector<16x8x2xf32> to vector<16x8x2xbf16>
    %5 = vector.extract_strided_slice %0 {offsets = [0, 0, 2], sizes = [16, 8, 2], strides = [1, 1, 1]} : vector<16x8x8xf32> to vector<16x8x2xf32>
    %6 = arith.truncf %5 : vector<16x8x2xf32> to vector<16x8x2xbf16>
    %7 = vector.extract_strided_slice %0 {offsets = [0, 0, 4], sizes = [16, 8, 4], strides = [1, 1, 1]} : vector<16x8x8xf32> to vector<16x8x4xf32>
    %8 = arith.truncf %7 : vector<16x8x4xf32> to vector<16x8x4xbf16>
    %9 = vector.extract_strided_slice %1 {offsets = [0, 0, 0], sizes = [8, 2, 8], strides = [1, 1, 1]} : vector<8x4x8xbf16> to vector<8x2x8xbf16>
    %10 = vector.extract_strided_slice %1 {offsets = [0, 2, 0], sizes = [8, 2, 8], strides = [1, 1, 1]} : vector<8x4x8xbf16> to vector<8x2x8xbf16>
    "tpu.trace_start"() <{level = 10 : i32, message = "tic,icj->tij"}> : () -> ()
    %cst = arith.constant dense<0.000000e+00> : vector<8x8x16xf32>
    %11 = tpu.matmul %9, %4, %cst {dimension_numbers = #tpu.dot_dimension_numbers<[1], [2], [2], [0], [0, 0, 0, 2, 1, 0], [0], [1]>} : vector<8x2x8xbf16>, vector<16x8x2xbf16>, vector<8x8x16xf32> -> vector<8x8x16xf32>
    %12 = tpu.transpose %11, [2, 0, 1] : vector<8x8x16xf32> -> vector<16x8x8xf32>
    %cst_8 = arith.constant dense<0.000000e+00> : vector<8x8x16xf32>
    %13 = tpu.matmul %10, %6, %cst_8 {dimension_numbers = #tpu.dot_dimension_numbers<[1], [2], [2], [0], [0, 0, 0, 2, 1, 0], [0], [1]>} : vector<8x2x8xbf16>, vector<16x8x2xbf16>, vector<8x8x16xf32> -> vector<8x8x16xf32>
    %14 = tpu.transpose %13, [2, 0, 1] : vector<8x8x16xf32> -> vector<16x8x8xf32>
    "tpu.trace_stop"() : () -> ()
    %15 = tpu.transpose %14, [0, 2, 1] : vector<16x8x8xf32> -> vector<16x8x8xf32>
    "tpu.trace_start"() <{level = 10 : i32, message = "tic,tjc->tij"}> : () -> ()
    %cst_9 = arith.constant dense<0.000000e+00> : vector<16x8x8xf32>
    %16 = tpu.matmul %4, %6, %cst_9 {dimension_numbers = #tpu.dot_dimension_numbers<[2], [2], [1], [1], [0, 0, 0, 1, 1, 1], [0], [0]>} : vector<16x8x2xbf16>, vector<16x8x2xbf16>, vector<16x8x8xf32> -> vector<16x8x8xf32>
    "tpu.trace_stop"() : () -> ()
    %c0_10 = arith.constant 0 : index
    %17 = memref.load %arg4[%c0_10] : memref<3xf32, #tpu.memory_space<smem>>
    %18 = vector.broadcast %17 : f32 to vector<16x8x8xf32>
    %19 = arith.mulf %16, %18 : vector<16x8x8xf32>
    %c0_11 = arith.constant 0 : index
    %20 = memref.load %arg5[%c0_11] : memref<3xf32, #tpu.memory_space<smem>>
    %21 = vector.broadcast %20 : f32 to vector<16x8x8xf32>
    %22 = arith.addf %19, %21 : vector<16x8x8xf32>
    %c1 = arith.constant 1 : index
    %23 = memref.load %arg4[%c1] : memref<3xf32, #tpu.memory_space<smem>>
    %24 = vector.broadcast %23 : f32 to vector<16x8x8xf32>
    %25 = arith.mulf %12, %24 : vector<16x8x8xf32>
    %26 = arith.addf %22, %25 : vector<16x8x8xf32>
    %c1_12 = arith.constant 1 : index
    %27 = memref.load %arg5[%c1_12] : memref<3xf32, #tpu.memory_space<smem>>
    %28 = vector.broadcast %27 : f32 to vector<16x8x8xf32>
    %29 = arith.addf %26, %28 : vector<16x8x8xf32>
    %c2 = arith.constant 2 : index
    %30 = memref.load %arg4[%c2] : memref<3xf32, #tpu.memory_space<smem>>
    %31 = vector.broadcast %30 : f32 to vector<16x8x8xf32>
    %32 = arith.mulf %15, %31 : vector<16x8x8xf32>
    %33 = arith.addf %29, %32 : vector<16x8x8xf32>
    %c2_13 = arith.constant 2 : index
    %34 = memref.load %arg5[%c2_13] : memref<3xf32, #tpu.memory_space<smem>>
    %35 = vector.broadcast %34 : f32 to vector<16x8x8xf32>
    %36 = arith.addf %33, %35 : vector<16x8x8xf32>
    %cst_14 = arith.constant dense<0xFF800000> : vector<16x8xf32>
    %37 = vector.multi_reduction <maximumf>, %36, %cst_14 [2] : vector<16x8x8xf32> to vector<16x8xf32>
    %38 = vector.shape_cast %37 : vector<16x8xf32> to vector<16x8x1xf32>
    %39 = vector.broadcast %38 : vector<16x8x1xf32> to vector<16x8x8xf32>
    %40 = arith.subf %36, %39 : vector<16x8x8xf32>
    %41 = math.exp %40 : vector<16x8x8xf32>
    %cst_15 = arith.constant dense<0.000000e+00> : vector<16x8xf32>
    %42 = vector.multi_reduction <add>, %41, %cst_15 [2] : vector<16x8x8xf32> to vector<16x8xf32>
    %43 = vector.shape_cast %42 : vector<16x8xf32> to vector<16x8x1xf32>
    %44 = tpu.reciprocal %43 {approx = true} : vector<16x8x1xf32> -> vector<16x8x1xf32>
    %45 = vector.broadcast %44 : vector<16x8x1xf32> to vector<16x8x8xf32>
    %46 = arith.mulf %41, %45 : vector<16x8x8xf32>
    %47 = arith.truncf %46 : vector<16x8x8xf32> to vector<16x8x8xbf16>
    "tpu.trace_start"() <{level = 10 : i32, message = "tij,tjc->tic"}> : () -> ()
    %cst_16 = arith.constant dense<0.000000e+00> : vector<16x8x4xf32>
    %48 = tpu.matmul %47, %8, %cst_16 {dimension_numbers = #tpu.dot_dimension_numbers<[2], [1], [1], [2], [0, 0, 0, 1, 1, 2], [0], [0]>} : vector<16x8x8xbf16>, vector<16x8x4xbf16>, vector<16x8x4xf32> -> vector<16x8x4xf32>
    "tpu.trace_stop"() : () -> ()
    "tpu.trace_start"() <{level = 10 : i32, message = "tij,ijc->tic"}> : () -> ()
    %cst_17 = arith.constant dense<0.000000e+00> : vector<8x4x16xf32>
    %49 = tpu.matmul %2, %47, %cst_17 {dimension_numbers = #tpu.dot_dimension_numbers<[1], [2], [2], [0], [0, 0, 0, 2, 1, 0], [0], [1]>} : vector<8x8x4xbf16>, vector<16x8x8xbf16>, vector<8x4x16xf32> -> vector<8x4x16xf32>
    %50 = tpu.transpose %49, [2, 0, 1] : vector<8x4x16xf32> -> vector<16x8x4xf32>
    "tpu.trace_stop"() : () -> ()
    %c0_18 = arith.constant 0 : index
    %c0_19 = arith.constant 0 : index
    %51 = vector.load %arg6[%c0_18, %c0_19] : memref<4x4xf32, #tpu.memory_space<vmem>>, vector<1x4xf32>
    %52 = vector.shape_cast %51 : vector<1x4xf32> to vector<1x1x4xf32>
    %c1_20 = arith.constant 1 : index
    %c0_21 = arith.constant 0 : index
    %53 = vector.load %arg6[%c1_20, %c0_21] : memref<4x4xf32, #tpu.memory_space<vmem>>, vector<1x4xf32>
    %54 = vector.shape_cast %53 : vector<1x4xf32> to vector<1x1x4xf32>
    %c2_22 = arith.constant 2 : index
    %c0_23 = arith.constant 0 : index
    %55 = vector.load %arg6[%c2_22, %c0_23] : memref<4x4xf32, #tpu.memory_space<vmem>>, vector<1x4xf32>
    %56 = vector.shape_cast %55 : vector<1x4xf32> to vector<1x1x4xf32>
    %c3 = arith.constant 3 : index
    %c0_24 = arith.constant 0 : index
    %57 = vector.load %arg6[%c3, %c0_24] : memref<4x4xf32, #tpu.memory_space<vmem>>, vector<1x4xf32>
    %58 = vector.shape_cast %57 : vector<1x4xf32> to vector<1x1x4xf32>
    %59 = vector.broadcast %52 : vector<1x1x4xf32> to vector<16x8x4xf32>
    %60 = arith.mulf %48, %59 : vector<16x8x4xf32>
    %61 = vector.broadcast %54 : vector<1x1x4xf32> to vector<16x8x4xf32>
    %62 = arith.addf %60, %61 : vector<16x8x4xf32>
    %63 = vector.broadcast %56 : vector<1x1x4xf32> to vector<16x8x4xf32>
    %64 = arith.mulf %50, %63 : vector<16x8x4xf32>
    %65 = arith.addf %62, %64 : vector<16x8x4xf32>
    %66 = vector.broadcast %58 : vector<1x1x4xf32> to vector<16x8x4xf32>
    %67 = arith.addf %65, %66 : vector<16x8x4xf32>
    %c0_25 = arith.constant 0 : index
    %c0_26 = arith.constant 0 : index
    %c0_27 = arith.constant 0 : index
    %68 = vector.load %arg7[%c0_25, %c0_26, %c0_27] : memref<16x8x4xf32, #tpu.memory_space<vmem>>, vector<16x8x4xf32>
    tpu.vector_store %arg7[%c0_25, %c0_26, %c0_27], %67 {strides = array<i32>} : memref<16x8x4xf32, #tpu.memory_space<vmem>>, vector<16x8x4xf32>,
    return
  }
  func.func @transform_0(%arg0: i32) -> (i32, i32, i32) {
    %c0_i32 = arith.constant 0 : i32
    %c0_i32_0 = arith.constant 0 : i32
    %c0_i32_1 = arith.constant 0 : i32
    return %arg0, %c0_i32, %c0_i32_0 : i32, i32, i32
  }
  func.func @transform_1(%arg0: i32) -> (i32, i32, i32) {
    %c0_i32 = arith.constant 0 : i32
    %c0_i32_0 = arith.constant 0 : i32
    %c0_i32_1 = arith.constant 0 : i32
    %c0_i32_2 = arith.constant 0 : i32
    return %c0_i32, %c0_i32_0, %c0_i32_1 : i32, i32, i32
  }
  func.func @transform_2(%arg0: i32) -> (i32, i32, i32) {
    %c0_i32 = arith.constant 0 : i32
    %c0_i32_0 = arith.constant 0 : i32
    %c0_i32_1 = arith.constant 0 : i32
    %c0_i32_2 = arith.constant 0 : i32
    return %c0_i32, %c0_i32_0, %c0_i32_1 : i32, i32, i32
  }
  func.func @transform_3(%arg0: i32) -> i32 {
    %c0_i32 = arith.constant 0 : i32
    %c0_i32_0 = arith.constant 0 : i32
    return %c0_i32 : i32
  }
  func.func @transform_4(%arg0: i32) -> i32 {
    %c0_i32 = arith.constant 0 : i32
    %c0_i32_0 = arith.constant 0 : i32
    return %c0_i32 : i32
  }
  func.func @transform_5(%arg0: i32) -> (i32, i32) {
    %c0_i32 = arith.constant 0 : i32
    %c0_i32_0 = arith.constant 0 : i32
    %c0_i32_1 = arith.constant 0 : i32
    return %c0_i32, %c0_i32_0 : i32, i32
  }
  func.func @transform_6(%arg0: i32) -> (i32, i32, i32) {
    %c0_i32 = arith.constant 0 : i32
    %c0_i32_0 = arith.constant 0 : i32
    %c0_i32_1 = arith.constant 0 : i32
    return %arg0, %c0_i32, %c0_i32_0 : i32, i32, i32
  }
}

module attributes {stable_mosaic.version = 11 : i64} {
  func.func @_relu_matmul_add_relu_kernel(%arg0: i32, %arg1: memref<128x4xf32, #tpu.memory_space<vmem>>, %arg2: memref<4x8xbf16, #tpu.memory_space<vmem>>, %arg3: memref<1x8xf32, #tpu.memory_space<vmem>>, %arg4: memref<1x8xf32, #tpu.memory_space<vmem>>, %arg5: memref<128x8xf32, #tpu.memory_space<vmem>>, %arg6: memref<128x8xf32, #tpu.memory_space<vmem>>) attributes {dimension_semantics = [#tpu.dimension_semantics<parallel>], iteration_bounds = array<i64: 1>, scalar_prefetch = 0 : i64, scratch_operands = 0 : i64, tpu.core_type = #tpu.core_type<tc>, window_params = [{transform_indices = @transform_0, window_bounds = array<i64: 128, 4>}, {pipeline_mode = #tpu.pipeline_mode<synchronous>, transform_indices = @transform_1, window_bounds = array<i64: 4, 8>}, {pipeline_mode = #tpu.pipeline_mode<synchronous>, transform_indices = @transform_2, window_bounds = array<i64: 1, 8>}, {pipeline_mode = #tpu.pipeline_mode<synchronous>, transform_indices = @transform_3, window_bounds = array<i64: 1, 8>}, {transform_indices = @transform_4, window_bounds = array<i64: 128, 8>}, {transform_indices = @transform_5, window_bounds = array<i64: 128, 8>}]} {
    %c0 = arith.constant 0 : index
    %c0_0 = arith.constant 0 : index
    %0 = vector.load %arg1[%c0, %c0_0] : memref<128x4xf32, #tpu.memory_space<vmem>>, vector<128x4xf32>
    %cst = arith.constant 0.000000e+00 : f32
    %1 = vector.broadcast %cst : f32 to vector<128x4xf32>
    %2 = arith.maximumf %0, %1 : vector<128x4xf32>
    %3 = arith.truncf %2 : vector<128x4xf32> to vector<128x4xbf16>
    %c0_1 = arith.constant 0 : index
    %c0_2 = arith.constant 0 : index
    %4 = vector.load %arg2[%c0_1, %c0_2] : memref<4x8xbf16, #tpu.memory_space<vmem>>, vector<4x8xbf16>
    %cst_3 = arith.constant dense<0.000000e+00> : vector<128x8xf32>
    %5 = tpu.matmul %3, %4, %cst_3 {dimension_numbers = #tpu.dot_dimension_numbers<[1], [0], [0], [1], [0, 0, 1, 1], [], []>} : vector<128x4xbf16>, vector<4x8xbf16>, vector<128x8xf32> -> vector<128x8xf32>
    %c0_4 = arith.constant 0 : index
    %c0_5 = arith.constant 0 : index
    %6 = vector.load %arg3[%c0_4, %c0_5] : memref<1x8xf32, #tpu.memory_space<vmem>>, vector<1x8xf32>
    %7 = vector.broadcast %6 : vector<1x8xf32> to vector<128x8xf32>
    %8 = arith.mulf %5, %7 : vector<128x8xf32>
    %c0_6 = arith.constant 0 : index
    %c0_7 = arith.constant 0 : index
    %9 = vector.load %arg4[%c0_6, %c0_7] : memref<1x8xf32, #tpu.memory_space<vmem>>, vector<1x8xf32>
    %10 = vector.broadcast %9 : vector<1x8xf32> to vector<128x8xf32>
    %11 = arith.addf %8, %10 : vector<128x8xf32>
    %c0_8 = arith.constant 0 : index
    %c0_9 = arith.constant 0 : index
    %12 = vector.load %arg5[%c0_8, %c0_9] : memref<128x8xf32, #tpu.memory_space<vmem>>, vector<128x8xf32>
    %13 = arith.addf %11, %12 : vector<128x8xf32>
    %cst_10 = arith.constant 0.000000e+00 : f32
    %14 = vector.broadcast %cst_10 : f32 to vector<128x8xf32>
    %15 = arith.maximumf %13, %14 : vector<128x8xf32>
    %c0_11 = arith.constant 0 : index
    %c0_12 = arith.constant 0 : index
    %16 = vector.load %arg6[%c0_11, %c0_12] : memref<128x8xf32, #tpu.memory_space<vmem>>, vector<128x8xf32>
    tpu.vector_store %arg6[%c0_11, %c0_12], %15 {strides = array<i32>} : memref<128x8xf32, #tpu.memory_space<vmem>>, vector<128x8xf32>,
    return
  }
  func.func @transform_0(%arg0: i32) -> (i32, i32) {
    %c0_i32 = arith.constant 0 : i32
    %c0_i32_0 = arith.constant 0 : i32
    return %arg0, %c0_i32 : i32, i32
  }
  func.func @transform_1(%arg0: i32) -> (i32, i32) {
    %c0_i32 = arith.constant 0 : i32
    %c0_i32_0 = arith.constant 0 : i32
    %c0_i32_1 = arith.constant 0 : i32
    return %c0_i32, %c0_i32_0 : i32, i32
  }
  func.func @transform_2(%arg0: i32) -> (i32, i32) {
    %c0_i32 = arith.constant 0 : i32
    %c0_i32_0 = arith.constant 0 : i32
    %c0_i32_1 = arith.constant 0 : i32
    return %c0_i32, %c0_i32_0 : i32, i32
  }
  func.func @transform_3(%arg0: i32) -> (i32, i32) {
    %c0_i32 = arith.constant 0 : i32
    %c0_i32_0 = arith.constant 0 : i32
    %c0_i32_1 = arith.constant 0 : i32
    return %c0_i32, %c0_i32_0 : i32, i32
  }
  func.func @transform_4(%arg0: i32) -> (i32, i32) {
    %c0_i32 = arith.constant 0 : i32
    %c0_i32_0 = arith.constant 0 : i32
    return %arg0, %c0_i32 : i32, i32
  }
  func.func @transform_5(%arg0: i32) -> (i32, i32) {
    %c0_i32 = arith.constant 0 : i32
    %c0_i32_0 = arith.constant 0 : i32
    return %arg0, %c0_i32 : i32, i32
  }
}

</mosaic_0001>

<bundles_post_ra>
// kernel: axial_block_forward.7
= control target key start
LH: loop header
LB: loop body
LE: loop exit
PB: predicated region body
PF: predicated region fallthrough
CT: control target
= control target key end

     0   :  { %vm68_vm0 = vcmask 1041408   ;;  %vm43_vm1 = vcmask 31744   ;;  %vm161_vm2 = vcmask 64512   ;;  %s385_s1 = inlined_call_operand.vmem [shape: bf16[4,8], index: 1, kind: input, shape index: {}]   ;;  %s386_s0 = inlined_call_operand.vmem [shape: f32[128,4], index: 0, kind: input, shape index: {}]   ;;  %s387_s2 = inlined_call_operand.vmem [shape: f32[1,8], index: 2, kind: input, shape index: {}]   ;;  %s388_s3 = inlined_call_operand.vmem [shape: f32[1,8], index: 3, kind: input, shape index: {}]   ;;  %s389_s4 = inlined_call_operand.vmem [shape: f32[128,8], index: 4, kind: output, shape index: {}]  }
   0x1   :  { %v42_v0 = vld [vmem:[%s385_s1] sm:$0x3]  ;;  %v19_v2 = vld [vmem:[%s386_s0 + $0x8] sm:$0xff]  ;;  %v20_v14 = vld [vmem:[%s386_s0 + $0x10] sm:$0xff] }
   0x2   :  { %v18_v1 = vld [vmem:[%s386_s0] sm:$0xff]  ;;  %v70_v3 = vsel %vm68_vm0, %v42_v0, 0  ;;  %v23_v6 = vld [vmem:[%s386_s0 + $0x28] sm:$0xff]  ;;  %v21_v15 = vld [vmem:[%s386_s0 + $0x18] sm:$0xff] }
   0x3   :  { %v34_v4 = vpack.c.bf16 %v19_v2, %v18_v1  ;;  %v22_v5 = vld [vmem:[%s386_s0 + $0x20] sm:$0xff]  ;;  %79 = vmatpush.bf16.msra.mxu0 %v70_v3  ;;  %190 = vmatpush.bf16.msra.mxu1 %v70_v3  ;;  %v27_v9 = vld [vmem:[%s386_s0 + $0x48] sm:$0xff]  ;;  %v24_v16 = vld [vmem:[%s386_s0 + $0x30] sm:$0xff]  ;;  %v35_v22 = vpack.c.bf16 %v21_v15, %v20_v14 }
   0x4   :  { %v26_v7 = vld [vmem:[%s386_s0 + $0x40] sm:$0xff]  ;;  %v36_v8 = vpack.c.bf16 %v23_v6, %v22_v5  ;;  %v31_v11 = vld [vmem:[%s386_s0 + $0x68] sm:$0xff]  ;;  %191 = vmatpush.bf16.msra.mxu2 %v70_v3  ;;  %192 = vmatpush.bf16.msra.mxu3 %v70_v3  ;;  %v25_v17 = vld [vmem:[%s386_s0 + $0x38] sm:$0xff] }
   0x5   :  { %v30_v10 = vld [vmem:[%s386_s0 + $0x60] sm:$0xff]  ;;  %v38_v12 = vpack.c.bf16 %v27_v9, %v26_v7  ;;  %v28_v18 = vld [vmem:[%s386_s0 + $0x50] sm:$0xff]  ;;  %v29_v19 = vld [vmem:[%s386_s0 + $0x58] sm:$0xff]  ;;  %v37_v23 = vpack.c.bf16 %v25_v17, %v24_v16 }
   0x6   :  { %v40_v13 = vpack.c.bf16 %v31_v11, %v30_v10  ;;  %182 = vmatmul.msk.bf16.vlgmr.msra.gmra.mxu0 %vm43_vm1, %v34_v4  ;;  %184 = vmatmul.msk.bf16.vlgmr.msra.gmra.mxu1 %vm43_vm1, %v36_v8  ;;  %v32_v20 = vld [vmem:[%s386_s0 + $0x70] sm:$0xff]  ;;  %v33_v21 = vld [vmem:[%s386_s0 + $0x78] sm:$0xff]  ;;  %v39_v24 = vpack.c.bf16 %v29_v19, %v28_v18  ;;  %v282_v26 = vld [vmem:[%s387_s2] ss:$0 sm:$0xff] }
   0x7   :  { %186 = vmatmul.msk.bf16.vlgmr.msra.gmra.mxu2 %vm43_vm1, %v38_v12  ;;  %v41_v25 = vpack.c.bf16 %v33_v21, %v32_v20  ;;  %v287_v27 = vld [vmem:[%s388_s3] ss:$0 sm:$0xff] }
   0x8   :  { %188 = vmatmul.msk.bf16.vlgmr.msra.gmra.mxu3 %vm43_vm1, %v40_v13 }
  0x16   :  { %183 = vmatmul.msk.bf16.gmra.mxu0 %vm43_vm1, %v35_v22  ;;  %185 = vmatmul.msk.bf16.gmra.mxu1 %vm43_vm1, %v37_v23 }
  0x17   :  { %187 = vmatmul.msk.bf16.gmra.mxu2 %vm43_vm1, %v39_v24 }
  0x18   :  { %189 = vmatmul.msk.bf16.gmra.mxu3 %vm43_vm1, %v41_v25 }
  0x83   :  { %v81_v28 = vpop.f32.mrf.mxu0  ;;  %v91_v29 = vpop.f32.mrf.mxu1 }
  0x84   :  { %v125_v30 = vmul.f32 %v282_v26, %v81_v28  ;;  %v129_v31 = vmul.f32 %v282_v26, %v91_v29 }
  0x86   :  { %v145_v32 = vadd.f32 %v287_v27, %v125_v30  ;;  %v149_v33 = vadd.f32 %v287_v27, %v129_v31 }
  0x88   :  { %162 = vst.msk [vmem:[%s389_s4] sm:$0xff] %vm161_vm2, %v145_v32 }
  0x89   :  { %166 = vst.msk [vmem:[%s389_s4 + $0x20] sm:$0xff] %vm161_vm2, %v149_v33 }
  0x8a   :  { %v101_v34 = vpop.f32.mrf.mxu2 }
  0x8b   :  { %v111_v35 = vpop.f32.mrf.mxu3  ;;  %v133_v36 = vmul.f32 %v282_v26, %v101_v34  ;;  %v83_v38 = vpop.f32.mrf.mxu0 }
  0x8c   :  { %v137_v37 = vmul.f32 %v282_v26, %v111_v35  ;;  %v93_v39 = vpop.f32.mrf.mxu1  ;;  %v126_v40 = vmul.f32 %v282_v26, %v83_v38 }
  0x8d   :  { %v130_v41 = vmul.f32 %v282_v26, %v93_v39  ;;  %v153_v42 = vadd.f32 %v287_v27, %v133_v36 }
  0x8e   :  { %v157_v43 = vadd.f32 %v287_v27, %v137_v37  ;;  %v146_v44 = vadd.f32 %v287_v27, %v126_v40 }
  0x8f   :  { %v150_v45 = vadd.f32 %v287_v27, %v130_v41  ;;  %170 = vst.msk [vmem:[%s389_s4 + $0x40] sm:$0xff] %vm161_vm2, %v153_v42 }
  0x90   :  { %174 = vst.msk [vmem:[%s389_s4 + $0x60] sm:$0xff] %vm161_vm2, %v157_v43 }
  0x91   :  { %163 = vst.msk [vmem:[%s389_s4 + $0x8] sm:$0xff] %vm161_vm2, %v146_v44 }
  0x92   :  { %167 = vst.msk [vmem:[%s389_s4 + $0x28] sm:$0xff] %vm161_vm2, %v150_v45  ;;  %v103_v46 = vpop.f32.mrf.mxu2 }
  0x93   :  { %v113_v47 = vpop.f32.mrf.mxu3  ;;  %v134_v48 = vmul.f32 %v282_v26, %v103_v46  ;;  %v86_v50 = vpop.f32.mrf.mxu0 }
  0x94   :  { %v138_v49 = vmul.f32 %v282_v26, %v113_v47  ;;  %v96_v51 = vpop.f32.mrf.mxu1  ;;  %v127_v52 = vmul.f32 %v282_v26, %v86_v50 }
  0x95   :  { %v131_v53 = vmul.f32 %v282_v26, %v96_v51  ;;  %v154_v54 = vadd.f32 %v287_v27, %v134_v48 }
  0x96   :  { %v158_v55 = vadd.f32 %v287_v27, %v138_v49  ;;  %v147_v56 = vadd.f32 %v287_v27, %v127_v52 }
  0x97   :  { %v151_v57 = vadd.f32 %v287_v27, %v131_v53  ;;  %171 = vst.msk [vmem:[%s389_s4 + $0x48] sm:$0xff] %vm161_vm2, %v154_v54 }
  0x98   :  { %175 = vst.msk [vmem:[%s389_s4 + $0x68] sm:$0xff] %vm161_vm2, %v158_v55 }
  0x99   :  { %164 = vst.msk [vmem:[%s389_s4 + $0x10] sm:$0xff] %vm161_vm2, %v147_v56 }
  0x9a   :  { %168 = vst.msk [vmem:[%s389_s4 + $0x30] sm:$0xff] %vm161_vm2, %v151_v57  ;;  %v106_v58 = vpop.f32.mrf.mxu2 }
  0x9b   :  { %v116_v59 = vpop.f32.mrf.mxu3  ;;  %v135_v60 = vmul.f32 %v282_v26, %v106_v58  ;;  %v88_v62 = vpop.f32.mrf.mxu0 }
  0x9c   :  { %v139_v61 = vmul.f32 %v282_v26, %v116_v59  ;;  %v98_v63 = vpop.f32.mrf.mxu1  ;;  %v128_v0 = vmul.f32 %v282_v26, %v88_v62 }
  0x9d   :  { %v132_v1 = vmul.f32 %v282_v26, %v98_v63  ;;  %v155_v2 = vadd.f32 %v287_v27, %v135_v60 }
  0x9e   :  { %v159_v3 = vadd.f32 %v287_v27, %v139_v61  ;;  %v148_v4 = vadd.f32 %v287_v27, %v128_v0 }
  0x9f   :  { %v152_v5 = vadd.f32 %v287_v27, %v132_v1  ;;  %172 = vst.msk [vmem:[%s389_s4 + $0x50] sm:$0xff] %vm161_vm2, %v155_v2 }
  0xa0   :  { %176 = vst.msk [vmem:[%s389_s4 + $0x70] sm:$0xff] %vm161_vm2, %v159_v3 }
  0xa1   :  { %165 = vst.msk [vmem:[%s389_s4 + $0x18] sm:$0xff] %vm161_vm2, %v148_v4 }
  0xa2   :  { %169 = vst.msk [vmem:[%s389_s4 + $0x38] sm:$0xff] %vm161_vm2, %v152_v5  ;;  %v108_v6 = vpop.f32.mrf.mxu2 }
  0xa3   :  { %v118_v7 = vpop.f32.mrf.mxu3  ;;  %v136_v8 = vmul.f32 %v282_v26, %v108_v6 }
  0xa4   :  { %v140_v9 = vmul.f32 %v282_v26, %v118_v7 }
  0xa5   :  { %v156_v10 = vadd.f32 %v287_v27, %v136_v8 }
  0xa6   :  { %v160_v11 = vadd.f32 %v287_v27, %v140_v9 }
  0xa7   :  { %173 = vst.msk [vmem:[%s389_s4 + $0x58] sm:$0xff] %vm161_vm2, %v156_v10 }
  0xa8   :  { %177 = vst.msk [vmem:[%s389_s4 + $0x78] sm:$0xff] %vm161_vm2, %v160_v11 }

// kernel: axial_block_forward.6
= control target key start
LH: loop header
LB: loop body
LE: loop exit
PB: predicated region body
PF: predicated region fallthrough
CT: control target
= control target key end

     0   :  { %vm68_vm0 = vcmask 1043456   ;;  %vm43_vm1 = vcmask 64512   ;;  %vm177_vm2 = vcmask 31744   ;;  %s401_s1 = inlined_call_operand.vmem [shape: bf16[8,4], index: 1, kind: input, shape index: {}]   ;;  %s402_s0 = inlined_call_operand.vmem [shape: f32[128,8], index: 0, kind: input, shape index: {}]   ;;  %s403_s2 = inlined_call_operand.vmem [shape: f32[1,4], index: 2, kind: input, shape index: {}]   ;;  %s404_s3 = inlined_call_operand.vmem [shape: f32[1,4], index: 3, kind: input, shape index: {}]   ;;  %s405_s4 = inlined_call_operand.vmem [shape: f32[128,4], index: 4, kind: output, shape index: {}]  }
   0x1   :  { %v42_v0 = vld [vmem:[%s401_s1] sm:$0xf]  ;;  %v19_v2 = vld [vmem:[%s402_s0 + $0x8] sm:$0xff]  ;;  %v20_v14 = vld [vmem:[%s402_s0 + $0x10] sm:$0xff] }
   0x2   :  { %v18_v1 = vld [vmem:[%s402_s0] sm:$0xff]  ;;  %v70_v3 = vsel %vm68_vm0, %v42_v0, 0  ;;  %v23_v6 = vld [vmem:[%s402_s0 + $0x28] sm:$0xff]  ;;  %v21_v15 = vld [vmem:[%s402_s0 + $0x18] sm:$0xff] }
   0x3   :  { %v34_v4 = vpack.c.bf16 %v19_v2, %v18_v1  ;;  %v22_v5 = vld [vmem:[%s402_s0 + $0x20] sm:$0xff]  ;;  %79 = vmatpush.bf16.msra.mxu0 %v70_v3  ;;  %206 = vmatpush.bf16.msra.mxu1 %v70_v3  ;;  %v27_v9 = vld [vmem:[%s402_s0 + $0x48] sm:$0xff]  ;;  %v24_v16 = vld [vmem:[%s402_s0 + $0x30] sm:$0xff]  ;;  %v35_v22 = vpack.c.bf16 %v21_v15, %v20_v14 }
   0x4   :  { %v26_v7 = vld [vmem:[%s402_s0 + $0x40] sm:$0xff]  ;;  %v36_v8 = vpack.c.bf16 %v23_v6, %v22_v5  ;;  %v31_v11 = vld [vmem:[%s402_s0 + $0x68] sm:$0xff]  ;;  %207 = vmatpush.bf16.msra.mxu2 %v70_v3  ;;  %208 = vmatpush.bf16.msra.mxu3 %v70_v3  ;;  %v25_v17 = vld [vmem:[%s402_s0 + $0x38] sm:$0xff] }
   0x5   :  { %v30_v10 = vld [vmem:[%s402_s0 + $0x60] sm:$0xff]  ;;  %v38_v12 = vpack.c.bf16 %v27_v9, %v26_v7  ;;  %v28_v18 = vld [vmem:[%s402_s0 + $0x50] sm:$0xff]  ;;  %v29_v19 = vld [vmem:[%s402_s0 + $0x58] sm:$0xff]  ;;  %v37_v23 = vpack.c.bf16 %v25_v17, %v24_v16 }
   0x6   :  { %v40_v13 = vpack.c.bf16 %v31_v11, %v30_v10  ;;  %198 = vmatmul.msk.bf16.vlgmr.msra.gmra.mxu0 %vm43_vm1, %v34_v4  ;;  %200 = vmatmul.msk.bf16.vlgmr.msra.gmra.mxu1 %vm43_vm1, %v36_v8  ;;  %v32_v20 = vld [vmem:[%s402_s0 + $0x70] sm:$0xff]  ;;  %v33_v21 = vld [vmem:[%s402_s0 + $0x78] sm:$0xff]  ;;  %v39_v24 = vpack.c.bf16 %v29_v19, %v28_v18  ;;  %v298_v26 = vld [vmem:[%s403_s2] ss:$0 sm:$0xff] }
   0x7   :  { %202 = vmatmul.msk.bf16.vlgmr.msra.gmra.mxu2 %vm43_vm1, %v38_v12  ;;  %v41_v25 = vpack.c.bf16 %v33_v21, %v32_v20  ;;  %v303_v27 = vld [vmem:[%s404_s3] ss:$0 sm:$0xff] }
   0x8   :  { %204 = vmatmul.msk.bf16.vlgmr.msra.gmra.mxu3 %vm43_vm1, %v40_v13 }
  0x16   :  { %199 = vmatmul.msk.bf16.gmra.mxu0 %vm43_vm1, %v35_v22  ;;  %201 = vmatmul.msk.bf16.gmra.mxu1 %vm43_vm1, %v37_v23 }
  0x17   :  { %203 = vmatmul.msk.bf16.gmra.mxu2 %vm43_vm1, %v39_v24 }
  0x18   :  { %205 = vmatmul.msk.bf16.gmra.mxu3 %vm43_vm1, %v41_v25 }
  0x83   :  { %v81_v28 = vpop.f32.mrf.mxu0  ;;  %v91_v29 = vpop.f32.mrf.mxu1 }
  0x84   :  { %v125_v30 = vmul.f32 %v298_v26, %v81_v28  ;;  %v129_v31 = vmul.f32 %v298_v26, %v91_v29 }
  0x86   :  { %v145_v32 = vadd.f32 %v303_v27, %v125_v30  ;;  %v149_v33 = vadd.f32 %v303_v27, %v129_v31 }
  0x88   :  { %v161_v34 = vmax.f32 %v145_v32, 0.0  ;;  %v165_v35 = vmax.f32 %v149_v33, 0.0 }
  0x8a   :  { %178 = vst.msk [vmem:[%s405_s4] sm:$0xff] %vm177_vm2, %v161_v34  ;;  %v101_v36 = vpop.f32.mrf.mxu2 }
  0x8b   :  { %v111_v37 = vpop.f32.mrf.mxu3  ;;  %182 = vst.msk [vmem:[%s405_s4 + $0x20] sm:$0xff] %vm177_vm2, %v165_v35  ;;  %v133_v38 = vmul.f32 %v298_v26, %v101_v36  ;;  %v83_v40 = vpop.f32.mrf.mxu0 }
  0x8c   :  { %v137_v39 = vmul.f32 %v298_v26, %v111_v37  ;;  %v93_v41 = vpop.f32.mrf.mxu1  ;;  %v126_v42 = vmul.f32 %v298_v26, %v83_v40 }
  0x8d   :  { %v130_v43 = vmul.f32 %v298_v26, %v93_v41  ;;  %v153_v44 = vadd.f32 %v303_v27, %v133_v38 }
  0x8e   :  { %v157_v45 = vadd.f32 %v303_v27, %v137_v39  ;;  %v146_v46 = vadd.f32 %v303_v27, %v126_v42 }
  0x8f   :  { %v150_v47 = vadd.f32 %v303_v27, %v130_v43  ;;  %v169_v48 = vmax.f32 %v153_v44, 0.0 }
  0x90   :  { %v173_v49 = vmax.f32 %v157_v45, 0.0  ;;  %v162_v50 = vmax.f32 %v146_v46, 0.0 }
  0x91   :  { %v166_v51 = vmax.f32 %v150_v47, 0.0  ;;  %186 = vst.msk [vmem:[%s405_s4 + $0x40] sm:$0xff] %vm177_vm2, %v169_v48 }
  0x92   :  { %190 = vst.msk [vmem:[%s405_s4 + $0x60] sm:$0xff] %vm177_vm2, %v173_v49  ;;  %v103_v52 = vpop.f32.mrf.mxu2 }
  0x93   :  { %v113_v53 = vpop.f32.mrf.mxu3  ;;  %179 = vst.msk [vmem:[%s405_s4 + $0x8] sm:$0xff] %vm177_vm2, %v162_v50  ;;  %v134_v54 = vmul.f32 %v298_v26, %v103_v52  ;;  %v86_v56 = vpop.f32.mrf.mxu0 }
  0x94   :  { %v138_v55 = vmul.f32 %v298_v26, %v113_v53  ;;  %v96_v57 = vpop.f32.mrf.mxu1  ;;  %183 = vst.msk [vmem:[%s405_s4 + $0x28] sm:$0xff] %vm177_vm2, %v166_v51  ;;  %v127_v58 = vmul.f32 %v298_v26, %v86_v56 }
  0x95   :  { %v131_v59 = vmul.f32 %v298_v26, %v96_v57  ;;  %v154_v60 = vadd.f32 %v303_v27, %v134_v54 }
  0x96   :  { %v158_v61 = vadd.f32 %v303_v27, %v138_v55  ;;  %v147_v62 = vadd.f32 %v303_v27, %v127_v58 }
  0x97   :  { %v151_v63 = vadd.f32 %v303_v27, %v131_v59  ;;  %v170_v0 = vmax.f32 %v154_v60, 0.0 }
  0x98   :  { %v174_v1 = vmax.f32 %v158_v61, 0.0  ;;  %v163_v2 = vmax.f32 %v147_v62, 0.0 }
  0x99   :  { %v167_v3 = vmax.f32 %v151_v63, 0.0  ;;  %187 = vst.msk [vmem:[%s405_s4 + $0x48] sm:$0xff] %vm177_vm2, %v170_v0 }
  0x9a   :  { %191 = vst.msk [vmem:[%s405_s4 + $0x68] sm:$0xff] %vm177_vm2, %v174_v1  ;;  %v106_v4 = vpop.f32.mrf.mxu2 }
  0x9b   :  { %v116_v5 = vpop.f32.mrf.mxu3  ;;  %180 = vst.msk [vmem:[%s405_s4 + $0x10] sm:$0xff] %vm177_vm2, %v163_v2  ;;  %v135_v6 = vmul.f32 %v298_v26, %v106_v4  ;;  %v88_v8 = vpop.f32.mrf.mxu0 }
  0x9c   :  { %v139_v7 = vmul.f32 %v298_v26, %v116_v5  ;;  %v98_v9 = vpop.f32.mrf.mxu1  ;;  %184 = vst.msk [vmem:[%s405_s4 + $0x30] sm:$0xff] %vm177_vm2, %v167_v3  ;;  %v128_v10 = vmul.f32 %v298_v26, %v88_v8 }
  0x9d   :  { %v132_v11 = vmul.f32 %v298_v26, %v98_v9  ;;  %v155_v12 = vadd.f32 %v303_v27, %v135_v6 }
  0x9e   :  { %v159_v13 = vadd.f32 %v303_v27, %v139_v7  ;;  %v148_v14 = vadd.f32 %v303_v27, %v128_v10 }
  0x9f   :  { %v152_v15 = vadd.f32 %v303_v27, %v132_v11  ;;  %v171_v16 = vmax.f32 %v155_v12, 0.0 }
  0xa0   :  { %v175_v17 = vmax.f32 %v159_v13, 0.0  ;;  %v164_v18 = vmax.f32 %v148_v14, 0.0 }
  0xa1   :  { %v168_v19 = vmax.f32 %v152_v15, 0.0  ;;  %188 = vst.msk [vmem:[%s405_s4 + $0x50] sm:$0xff] %vm177_vm2, %v171_v16 }
  0xa2   :  { %192 = vst.msk [vmem:[%s405_s4 + $0x70] sm:$0xff] %vm177_vm2, %v175_v17  ;;  %v108_v20 = vpop.f32.mrf.mxu2 }
  0xa3   :  { %v118_v21 = vpop.f32.mrf.mxu3  ;;  %181 = vst.msk [vmem:[%s405_s4 + $0x18] sm:$0xff] %vm177_vm2, %v164_v18  ;;  %v136_v22 = vmul.f32 %v298_v26, %v108_v20 }
  0xa4   :  { %v140_v23 = vmul.f32 %v298_v26, %v118_v21  ;;  %185 = vst.msk [vmem:[%s405_s4 + $0x38] sm:$0xff] %vm177_vm2, %v168_v19 }
  0xa5   :  { %v156_v24 = vadd.f32 %v303_v27, %v136_v22 }
  0xa6   :  { %v160_v25 = vadd.f32 %v303_v27, %v140_v23 }
  0xa7   :  { %v172_v28 = vmax.f32 %v156_v24, 0.0 }
  0xa8   :  { %v176_v29 = vmax.f32 %v160_v25, 0.0 }
  0xa9   :  { %189 = vst.msk [vmem:[%s405_s4 + $0x58] sm:$0xff] %vm177_vm2, %v172_v28 }
  0xaa   :  { %193 = vst.msk [vmem:[%s405_s4 + $0x78] sm:$0xff] %vm177_vm2, %v176_v29 }

// kernel: axial_block_forward.11
= control target key start
LH: loop header
LB: loop body
LE: loop exit
PB: predicated region body
PF: predicated region fallthrough
CT: control target
= control target key end

     0   :  { %vm87_vm0 = vcmask 1041408   ;;  %vm62_vm1 = vcmask 31744   ;;  %vm228_vm2 = vcmask 64512   ;;  %s505_s1 = inlined_call_operand.vmem [shape: bf16[4,8], index: 1, kind: input, shape index: {}]   ;;  %s506_s0 = inlined_call_operand.vmem [shape: f32[128,4], index: 0, kind: input, shape index: {}]   ;;  %s507_s2 = inlined_call_operand.vmem [shape: f32[1,8], index: 2, kind: input, shape index: {}]   ;;  %s508_s3 = inlined_call_operand.vmem [shape: f32[1,8], index: 3, kind: input, shape index: {}]   ;;  %s509_s4 = inlined_call_operand.vmem [shape: f32[128,8], index: 4, kind: input, shape index: {}]   ;;  %s510_s5 = inlined_call_operand.vmem [shape: f32[128,8], index: 5, kind: output, shape index: {}]  }
   0x1   :  { %v61_v0 = vld [vmem:[%s505_s1] sm:$0x3]  ;;  %v22_v2 = vld [vmem:[%s506_s0 + $0x8] sm:$0xff]  ;;  %v23_v22 = vld [vmem:[%s506_s0 + $0x10] sm:$0xff] }
   0x2   :  { %v21_v1 = vld [vmem:[%s506_s0] sm:$0xff]  ;;  %v89_v3 = vsel %vm87_vm0, %v61_v0, 0  ;;  %v38_v5 = vmax.f32 %v22_v2, 0.0  ;;  %v26_v7 = vld [vmem:[%s506_s0 + $0x28] sm:$0xff]  ;;  %v24_v23 = vld [vmem:[%s506_s0 + $0x18] sm:$0xff]  ;;  %v39_v30 = vmax.f32 %v23_v22, 0.0 }
   0x3   :  { %v37_v4 = vmax.f32 %v21_v1, 0.0  ;;  %v25_v6 = vld [vmem:[%s506_s0 + $0x20] sm:$0xff]  ;;  %98 = vmatpush.bf16.msra.mxu0 %v89_v3  ;;  %257 = vmatpush.bf16.msra.mxu1 %v89_v3  ;;  %v42_v10 = vmax.f32 %v26_v7, 0.0  ;;  %v30_v11 = vld [vmem:[%s506_s0 + $0x48] sm:$0xff]  ;;  %v27_v24 = vld [vmem:[%s506_s0 + $0x30] sm:$0xff]  ;;  %v40_v31 = vmax.f32 %v24_v23, 0.0 }
   0x4   :  { %v29_v8 = vld [vmem:[%s506_s0 + $0x40] sm:$0xff]  ;;  %v41_v9 = vmax.f32 %v25_v6, 0.0  ;;  %v34_v14 = vld [vmem:[%s506_s0 + $0x68] sm:$0xff]  ;;  %258 = vmatpush.bf16.msra.mxu2 %v89_v3  ;;  %259 = vmatpush.bf16.msra.mxu3 %v89_v3  ;;  %v46_v16 = vmax.f32 %v30_v11, 0.0  ;;  %v28_v25 = vld [vmem:[%s506_s0 + $0x38] sm:$0xff]  ;;  %v43_v32 = vmax.f32 %v27_v24, 0.0 }
   0x5   :  { %v45_v12 = vmax.f32 %v29_v8, 0.0  ;;  %v33_v13 = vld [vmem:[%s506_s0 + $0x60] sm:$0xff]  ;;  %v53_v15 = vpack.c.bf16 %v38_v5, %v37_v4  ;;  %v50_v18 = vmax.f32 %v34_v14, 0.0  ;;  %v31_v26 = vld [vmem:[%s506_s0 + $0x50] sm:$0xff]  ;;  %v32_v27 = vld [vmem:[%s506_s0 + $0x58] sm:$0xff]  ;;  %v44_v33 = vmax.f32 %v28_v25, 0.0 }
   0x6   :  { %v49_v17 = vmax.f32 %v33_v13, 0.0  ;;  %v55_v19 = vpack.c.bf16 %v42_v10, %v41_v9  ;;  %v35_v28 = vld [vmem:[%s506_s0 + $0x70] sm:$0xff]  ;;  %v36_v29 = vld [vmem:[%s506_s0 + $0x78] sm:$0xff]  ;;  %v47_v34 = vmax.f32 %v31_v26, 0.0  ;;  %v48_v35 = vmax.f32 %v32_v27, 0.0  ;;  %v180_v47 = vld [vmem:[%s509_s4] sm:$0xff] }
   0x7   :  { %249 = vmatmul.msk.bf16.vlgmr.msra.gmra.mxu0 %vm62_vm1, %v53_v15  ;;  %v57_v20 = vpack.c.bf16 %v46_v16, %v45_v12  ;;  %v51_v36 = vmax.f32 %v35_v28, 0.0  ;;  %v52_v37 = vmax.f32 %v36_v29, 0.0  ;;  %v54_v38 = vpack.c.bf16 %v40_v31, %v39_v30  ;;  %v354_v42 = vld [vmem:[%s507_s2] ss:$0 sm:$0xff]  ;;  %v181_v4 = vld [vmem:[%s509_s4 + $0x8] sm:$0xff]  ;;  %v182_v28 = vld [vmem:[%s509_s4 + $0x10] sm:$0xff] }
   0x8   :  { %v59_v21 = vpack.c.bf16 %v50_v18, %v49_v17  ;;  %251 = vmatmul.msk.bf16.vlgmr.msra.gmra.mxu1 %vm62_vm1, %v55_v19  ;;  %v56_v39 = vpack.c.bf16 %v44_v33, %v43_v32  ;;  %v58_v40 = vpack.c.bf16 %v48_v35, %v47_v34  ;;  %v359_v43 = vld [vmem:[%s508_s3] ss:$0 sm:$0xff]  ;;  %v185_v5 = vld [vmem:[%s509_s4 + $0x28] sm:$0xff]  ;;  %v186_v29 = vld [vmem:[%s509_s4 + $0x30] sm:$0xff] }
   0x9   :  { %253 = vmatmul.msk.bf16.vlgmr.msra.gmra.mxu2 %vm62_vm1, %v57_v20  ;;  %v60_v41 = vpack.c.bf16 %v52_v37, %v51_v36  ;;  %v184_v50 = vld [vmem:[%s509_s4 + $0x20] sm:$0xff]  ;;  %v189_v22 = vld [vmem:[%s509_s4 + $0x48] sm:$0xff] }
   0xa   :  { %255 = vmatmul.msk.bf16.vlgmr.msra.gmra.mxu3 %vm62_vm1, %v59_v21  ;;  %v188_v62 = vld [vmem:[%s509_s4 + $0x40] sm:$0xff]  ;;  %v193_v23 = vld [vmem:[%s509_s4 + $0x68] sm:$0xff] }
   0xb   :  { %v192_v63 = vld [vmem:[%s509_s4 + $0x60] sm:$0xff] }
  0x17   :  { %250 = vmatmul.msk.bf16.gmra.mxu0 %vm62_vm1, %v54_v38 }
  0x18   :  { %252 = vmatmul.msk.bf16.gmra.mxu1 %vm62_vm1, %v56_v39 }
  0x19   :  { %254 = vmatmul.msk.bf16.gmra.mxu2 %vm62_vm1, %v58_v40 }
  0x1a   :  { %256 = vmatmul.msk.bf16.gmra.mxu3 %vm62_vm1, %v60_v41 }
  0x84   :  { %v100_v44 = vpop.f32.mrf.mxu0 }
  0x85   :  { %v144_v45 = vmul.f32 %v354_v42, %v100_v44  ;;  %v110_v46 = vpop.f32.mrf.mxu1 }
  0x86   :  { %v148_v48 = vmul.f32 %v354_v42, %v110_v46 }
  0x87   :  { %v164_v49 = vadd.f32 %v359_v43, %v144_v45 }
  0x88   :  { %v168_v51 = vadd.f32 %v359_v43, %v148_v48  ;;  %v190_v48 = vld [vmem:[%s509_s4 + $0x50] sm:$0xff] }
  0x89   :  { %v196_v52 = vadd.f32 %v180_v47, %v164_v49  ;;  %v194_v49 = vld [vmem:[%s509_s4 + $0x70] sm:$0xff] }
  0x8a   :  { %v200_v53 = vadd.f32 %v184_v50, %v168_v51 }
  0x8b   :  { %v212_v54 = vmax.f32 %v196_v52, 0.0 }
  0x8c   :  { %v216_v55 = vmax.f32 %v200_v53, 0.0  ;;  %v120_v56 = vpop.f32.mrf.mxu2  ;;  %v102_v60 = vpop.f32.mrf.mxu0 }
  0x8d   :  { %v130_v57 = vpop.f32.mrf.mxu3  ;;  %229 = vst.msk [vmem:[%s510_s5] sm:$0xff] %vm228_vm2, %v212_v54  ;;  %v152_v58 = vmul.f32 %v354_v42, %v120_v56  ;;  %v112_v61 = vpop.f32.mrf.mxu1  ;;  %v145_v0 = vmul.f32 %v354_v42, %v102_v60  ;;  %v183_v54 = vld [vmem:[%s509_s4 + $0x18] sm:$0xff] }
  0x8e   :  { %v156_v59 = vmul.f32 %v354_v42, %v130_v57  ;;  %233 = vst.msk [vmem:[%s510_s5 + $0x20] sm:$0xff] %vm228_vm2, %v216_v55  ;;  %v149_v1 = vmul.f32 %v354_v42, %v112_v61  ;;  %v187_v55 = vld [vmem:[%s509_s4 + $0x38] sm:$0xff] }
  0x8f   :  { %v172_v2 = vadd.f32 %v359_v43, %v152_v58  ;;  %v165_v6 = vadd.f32 %v359_v43, %v145_v0 }
  0x90   :  { %v176_v3 = vadd.f32 %v359_v43, %v156_v59  ;;  %v169_v7 = vadd.f32 %v359_v43, %v149_v1 }
  0x91   :  { %v204_v8 = vadd.f32 %v188_v62, %v172_v2  ;;  %v197_v10 = vadd.f32 %v181_v4, %v165_v6  ;;  %v191_v6 = vld [vmem:[%s509_s4 + $0x58] sm:$0xff] }
  0x92   :  { %v208_v9 = vadd.f32 %v192_v63, %v176_v3  ;;  %v201_v11 = vadd.f32 %v185_v5, %v169_v7  ;;  %v195_v7 = vld [vmem:[%s509_s4 + $0x78] sm:$0xff] }
  0x93   :  { %v220_v12 = vmax.f32 %v204_v8, 0.0  ;;  %v213_v14 = vmax.f32 %v197_v10, 0.0 }
  0x94   :  { %v224_v13 = vmax.f32 %v208_v9, 0.0  ;;  %v217_v15 = vmax.f32 %v201_v11, 0.0  ;;  %v122_v16 = vpop.f32.mrf.mxu2  ;;  %v105_v20 = vpop.f32.mrf.mxu0 }
  0x95   :  { %v132_v17 = vpop.f32.mrf.mxu3  ;;  %237 = vst.msk [vmem:[%s510_s5 + $0x40] sm:$0xff] %vm228_vm2, %v220_v12  ;;  %v153_v18 = vmul.f32 %v354_v42, %v122_v16  ;;  %v115_v21 = vpop.f32.mrf.mxu1  ;;  %v146_v24 = vmul.f32 %v354_v42, %v105_v20 }
  0x96   :  { %v157_v19 = vmul.f32 %v354_v42, %v132_v17  ;;  %241 = vst.msk [vmem:[%s510_s5 + $0x60] sm:$0xff] %vm228_vm2, %v224_v13  ;;  %v150_v25 = vmul.f32 %v354_v42, %v115_v21 }
  0x97   :  { %230 = vst.msk [vmem:[%s510_s5 + $0x8] sm:$0xff] %vm228_vm2, %v213_v14  ;;  %v173_v26 = vadd.f32 %v359_v43, %v153_v18  ;;  %v166_v30 = vadd.f32 %v359_v43, %v146_v24 }
  0x98   :  { %v177_v27 = vadd.f32 %v359_v43, %v157_v19  ;;  %234 = vst.msk [vmem:[%s510_s5 + $0x28] sm:$0xff] %vm228_vm2, %v217_v15  ;;  %v170_v31 = vadd.f32 %v359_v43, %v150_v25 }
  0x99   :  { %v205_v32 = vadd.f32 %v189_v22, %v173_v26  ;;  %v198_v34 = vadd.f32 %v182_v28, %v166_v30 }
  0x9a   :  { %v209_v33 = vadd.f32 %v193_v23, %v177_v27  ;;  %v202_v35 = vadd.f32 %v186_v29, %v170_v31 }
  0x9b   :  { %v221_v36 = vmax.f32 %v205_v32, 0.0  ;;  %v214_v38 = vmax.f32 %v198_v34, 0.0 }
  0x9c   :  { %v225_v37 = vmax.f32 %v209_v33, 0.0  ;;  %v218_v39 = vmax.f32 %v202_v35, 0.0  ;;  %v125_v40 = vpop.f32.mrf.mxu2  ;;  %v107_v46 = vpop.f32.mrf.mxu0 }
  0x9d   :  { %v135_v41 = vpop.f32.mrf.mxu3  ;;  %238 = vst.msk [vmem:[%s510_s5 + $0x48] sm:$0xff] %vm228_vm2, %v221_v36  ;;  %v154_v44 = vmul.f32 %v354_v42, %v125_v40  ;;  %v117_v47 = vpop.f32.mrf.mxu1  ;;  %v147_v50 = vmul.f32 %v354_v42, %v107_v46 }
  0x9e   :  { %v158_v45 = vmul.f32 %v354_v42, %v135_v41  ;;  %242 = vst.msk [vmem:[%s510_s5 + $0x68] sm:$0xff] %vm228_vm2, %v225_v37  ;;  %v151_v51 = vmul.f32 %v354_v42, %v117_v47 }
  0x9f   :  { %231 = vst.msk [vmem:[%s510_s5 + $0x10] sm:$0xff] %vm228_vm2, %v214_v38  ;;  %v174_v52 = vadd.f32 %v359_v43, %v154_v44  ;;  %v167_v56 = vadd.f32 %v359_v43, %v147_v50 }
  0xa0   :  { %v178_v53 = vadd.f32 %v359_v43, %v158_v45  ;;  %235 = vst.msk [vmem:[%s510_s5 + $0x30] sm:$0xff] %vm228_vm2, %v218_v39  ;;  %v171_v57 = vadd.f32 %v359_v43, %v151_v51 }
  0xa1   :  { %v206_v58 = vadd.f32 %v190_v48, %v174_v52  ;;  %v199_v60 = vadd.f32 %v183_v54, %v167_v56 }
  0xa2   :  { %v210_v59 = vadd.f32 %v194_v49, %v178_v53  ;;  %v203_v61 = vadd.f32 %v187_v55, %v171_v57 }
  0xa3   :  { %v222_v62 = vmax.f32 %v206_v58, 0.0  ;;  %v215_v0 = vmax.f32 %v199_v60, 0.0 }
  0xa4   :  { %v226_v63 = vmax.f32 %v210_v59, 0.0  ;;  %v219_v1 = vmax.f32 %v203_v61, 0.0  ;;  %v127_v2 = vpop.f32.mrf.mxu2 }
  0xa5   :  { %v137_v3 = vpop.f32.mrf.mxu3  ;;  %239 = vst.msk [vmem:[%s510_s5 + $0x50] sm:$0xff] %vm228_vm2, %v222_v62  ;;  %v155_v4 = vmul.f32 %v354_v42, %v127_v2 }
  0xa6   :  { %v159_v5 = vmul.f32 %v354_v42, %v137_v3  ;;  %243 = vst.msk [vmem:[%s510_s5 + $0x70] sm:$0xff] %vm228_vm2, %v226_v63 }
  0xa7   :  { %232 = vst.msk [vmem:[%s510_s5 + $0x18] sm:$0xff] %vm228_vm2, %v215_v0  ;;  %v175_v42 = vadd.f32 %v359_v43, %v155_v4 }
  0xa8   :  { %v179_v8 = vadd.f32 %v359_v43, %v159_v5  ;;  %236 = vst.msk [vmem:[%s510_s5 + $0x38] sm:$0xff] %vm228_vm2, %v219_v1 }
  0xa9   :  { %v207_v9 = vadd.f32 %v191_v6, %v175_v42 }
  0xaa   :  { %v211_v10 = vadd.f32 %v195_v7, %v179_v8 }
  0xab   :  { %v223_v11 = vmax.f32 %v207_v9, 0.0 }
  0xac   :  { %v227_v12 = vmax.f32 %v211_v10, 0.0 }
  0xad   :  { %240 = vst.msk [vmem:[%s510_s5 + $0x58] sm:$0xff] %vm228_vm2, %v223_v11 }
  0xae   :  { %244 = vst.msk [vmem:[%s510_s5 + $0x78] sm:$0xff] %vm228_vm2, %v227_v12 }

// kernel: axial_block_forward.8
= control target key start
LH: loop header
LB: loop body
LE: loop exit
PB: predicated region body
PF: predicated region fallthrough
CT: control target
= control target key end

     0   :  { %11 = vsyncpa [#allocation3], 0  ;;  %s7551_s0 = inlined_call_operand.vmem [shape: f32[16,8,8], index: 0, kind: input, shape index: {}]   ;;  %s7552_s1 = inlined_call_operand.vmem [shape: bf16[8,4,8], index: 1, kind: input, shape index: {}]   ;;  %s7553_s2 = inlined_call_operand.vmem [shape: bf16[8,8,4], index: 2, kind: input, shape index: {}]   ;;  %s7554_s3 = inlined_call_operand.vmem [shape: f32[3], index: 3, kind: input, shape index: {}]   ;;  %s7555_s4 = inlined_call_operand.vmem [shape: f32[3], index: 4, kind: input, shape index: {}]   ;;  %s7556_s5 = inlined_call_operand.vmem [shape: f32[4,4], index: 5, kind: input, shape index: {}]   ;;  %s7557_s6 = inlined_call_operand.vmem [shape: f32[16,8,4], index: 6, kind: output, shape index: {}]  }
   0x1   :  { %s24_s23 = sshll.u32 %s7554_s3, 4  ;;  %s25_s23 = int_to_ptr.vmem [resolvable:$true] %s24_s23 }
   0x2   :  { %12 = vsyncpa [#allocation5], 0  ;;  %s33_s26 = sshll.u32 %s7555_s4, 4  ;;  %s5884_s27 = smov [#allocation2]   ;;  %s34_s26 = int_to_ptr.vmem [resolvable:$true] %s33_s26 }
   0x3   :  { %27 = dma.vmem_to_smem %s25_s23, 16, %s5884_s27, [#allocation3]  }
   0x4   :  { %s5885_s28 = smov [#allocation4]  }
   0x5   :  { %36 = dma.vmem_to_smem %s34_s26, 16, %s5885_s28, [#allocation5]  }
   0x6   :  { %5880 = dma.done.wait [#allocation3], 16  }
   0x7   :  { %5881 = vsyncadd [#allocation3], 4294967280 }
   0x8   :  { %5882 = dma.done.wait [#allocation5], 16  }
   0x9   :  { %5883 = vsyncadd [#allocation5], 4294967280 }
   0xa   :  { %47 = sfence }
   0xb   :  { %v53_v0 = vld [vmem:[%s7551_s0 + $0x20] sm:$0xff]  ;;  %v54_v1 = vld [vmem:[%s7551_s0 + $0x28] sm:$0xff]  ;;  %v56_v6 = vld [vmem:[%s7551_s0 + $0x38] sm:$0xff]  ;;  %s5886_s13 = smov 126   ;;  %vm354_vm0 = vcmask 1047556   ;;  %vm550_vm1 = vcmask 1040384  }
   0xc   :  { %v49_v2 = vld [vmem:[%s7551_s0] sm:$0xff]  ;;  %v5940_v3 = vpack.c.bf16 %v53_v0, %v53_v0  ;;  %v5942_v4 = vpack.c.bf16 %v54_v1, %v54_v1  ;;  %v51_v7 = vld [vmem:[%s7551_s0 + $0x10] sm:$0xff]  ;;  %v5957_v10 = vpack.c.bf16 %v56_v6, %v56_v6  ;;  %v64_v25 = vld [vmem:[%s7551_s0 + $0x78] sm:$0xff]  ;;  %vm546_vm2 = vcmask 15360   ;;  %s5626_s25 = sld [smem:[#allocation2 + $0x1]]  ;;  %s5889_s30 = smov 124  }
   0xd   :  { %v5944_v5 = vpack.c.bf16 %v49_v2, %v49_v2  ;;  %v5952_v8 = vpack.c.bf16 %v51_v7, %v51_v7  ;;  %v59_v15 = vld [vmem:[%s7551_s0 + $0x50] sm:$0xff]  ;;  %v57_v17 = vld [vmem:[%s7551_s0 + $0x40] sm:$0xff]  ;;  %v60_v27 = vld [vmem:[%s7551_s0 + $0x58] sm:$0xff]  ;;  %v6005_v29 = vpack.c.bf16 %v64_v25, %v64_v25  ;;  %s3463_s26 = sld [smem:[#allocation4]]  ;;  %vm3585_vm3 = vcmask 64512  }
   0xe   :  { %5662 = vxpose.binary.xlu1.c.b16.start.end [1/2] (short) (narrow) %v5942_v4, %v5940_v3, 16  ;;  %7592 = vst [vmem:[#allocation8_spill] sm:$0xff] %v5957_v10  ;;  %v1316_v14 = vunpack.c.l.b16 %v5957_v10  ;;  %v1314_v16 = vunpack.c.l.b16 %v5942_v4  ;;  %v5978_v19 = vpack.c.bf16 %v59_v15, %v59_v15  ;;  %v55_v20 = vld [vmem:[%s7551_s0 + $0x30] sm:$0xff]  ;;  %v5985_v22 = vpack.c.bf16 %v57_v17, %v57_v17  ;;  %v61_v34 = vld [vmem:[%s7551_s0 + $0x60] sm:$0xff]  ;;  %v50_v42 = vld [vmem:[%s7551_s0 + $0x8] sm:$0xff]  ;;  %s5627_s27 = sld [smem:[#allocation4 + $0x1]] }
   0xf   :  { %v1309_v9 = vunpack.c.l.b16 %v5944_v5  ;;  %v1311_v11 = vunpack.c.l.b16 %v5952_v8  ;;  %v5989_v23 = vpack.c.bf16 %v55_v20, %v55_v20  ;;  %7600 = vst [vmem:[#allocation16_spill] sm:$0xff] %v6005_v29  ;;  %v6009_v31 = vpack.c.bf16 %v60_v27, %v60_v27  ;;  %v63_v36 = vld [vmem:[%s7551_s0 + $0x70] sm:$0xff]  ;;  %v58_v44 = vld [vmem:[%s7551_s0 + $0x48] sm:$0xff]  ;;  %v52_v45 = vld [vmem:[%s7551_s0 + $0x18] sm:$0xff]  ;;  %s5628_s28 = sld [smem:[#allocation2 + $0x2]] }
  0x10   :  { %v5976_v18 = vpack.c.b16 %v1316_v14, %v1316_v14  ;;  %7596 = vst [vmem:[#allocation12_spill] sm:$0xff] %v5978_v19  ;;  %v5983_v21 = vpack.c.b16 %v1314_v16, %v1314_v16  ;;  %v1319_v24 = vunpack.c.l.b16 %v5978_v19  ;;  %v1317_v26 = vunpack.c.l.b16 %v5985_v22  ;;  %v62_v48 = vld [vmem:[%s7551_s0 + $0x68] sm:$0xff]  ;;  %v65_v61 = vld [vmem:[%s7552_s1] sm:$0x3]  ;;  %v66_v62 = vld [vmem:[%s7552_s1 + $0x2] sm:$0x3] }
  0x11   :  { %v5960_v12 = vpack.c.b16 %v1309_v9, %v1309_v9  ;;  %v5962_v13 = vpack.c.b16 %v1311_v11, %v1311_v11  ;;  %7598 = vst [vmem:[#allocation14_spill] sm:$0xff] %v5985_v22  ;;  %v1324_v32 = vunpack.c.l.b16 %v6005_v29  ;;  %v1320_v33 = vunpack.c.l.b16 %v6009_v31  ;;  %v6118_v6 = vld [vmem:[%s7552_s1 + $0xc] sm:$0x3]  ;;  %v6123_v7 = vld [vmem:[%s7552_s1 + $0xe] sm:$0x3]  ;;  %s5629_s29 = sld [smem:[#allocation4 + $0x2]] }
  0x12   :  { %7595 = vst [vmem:[#allocation11_spill] sm:$0xff] %v5976_v18  ;;  %v6003_v28 = vpack.c.b16 %v1319_v24, %v1319_v24  ;;  %v6007_v30 = vpack.c.b16 %v1317_v26, %v1317_v26  ;;  %v6027_v38 = vpack.c.bf16 %v61_v34, %v61_v34  ;;  %v6031_v39 = vpack.c.bf16 %v63_v36, %v63_v36 }
  0x13   :  { %7593 = vst [vmem:[#allocation9_spill] sm:$0xff] %v5960_v12  ;;  %1341 = vrot.lane.b32.xlu0 %v5960_v12, %s5886_s13  ;;  %1345 = vrot.lane.b32.xlu2 %v5962_v13, %s5886_s13  ;;  %v6020_v35 = vpack.c.b16 %v1324_v32, %v1324_v32  ;;  %v6025_v37 = vpack.c.b16 %v1320_v33, %v1320_v33  ;;  %v1313_v54 = vunpack.c.l.b16 %v5940_v3  ;;  %v1315_v56 = vunpack.c.l.b16 %v5989_v23 }
  0x14   :  { %7594 = vst [vmem:[#allocation10_spill] sm:$0xff] %v5962_v13  ;;  %v1321_v40 = vunpack.c.l.b16 %v6027_v38  ;;  %v6045_v43 = vpack.c.bf16 %v50_v42, %v50_v42  ;;  %v6055_v46 = vpack.c.bf16 %v58_v44, %v58_v44  ;;  %v6057_v47 = vpack.c.bf16 %v52_v45, %v52_v45  ;;  %v68_v42 = vld [vmem:[%s7552_s1 + $0x6] sm:$0x3] }
  0x15   :  { %7597 = vst [vmem:[#allocation13_spill] sm:$0xff] %v5983_v21  ;;  %v6066_v49 = vpack.c.bf16 %v62_v48, %v62_v48  ;;  %v6083_v55 = vpack.c.b16 %v1313_v54, %v1313_v54  ;;  %v6088_v57 = vpack.c.b16 %v1315_v56, %v1315_v56  ;;  %v1323_v60 = vunpack.c.l.b16 %v6031_v39 }
  0x16   :  { %7599 = vst [vmem:[#allocation15_spill] sm:$0xff] %v6003_v28  ;;  %v6038_v41 = vpack.c.b16 %v1321_v40, %v1321_v40  ;;  %v1310_v50 = vunpack.c.l.b16 %v6045_v43  ;;  %v1312_v52 = vunpack.c.l.b16 %v6057_v47  ;;  %v1318_v58 = vunpack.c.l.b16 %v6055_v46  ;;  %v67_v40 = vld [vmem:[%s7552_s1 + $0x4] sm:$0x3] }
  0x17   :  { %7601 = vst [vmem:[#allocation17_spill] sm:$0xff] %v6007_v30  ;;  %v6104_v63 = vpack.c.b16 %v1323_v60, %v1323_v60  ;;  %v1322_v0 = vunpack.c.l.b16 %v6066_v49  ;;  %vm3783_vm4 = vcmask 1043456   ;;  %vm5571_vm5 = vcmask 31744  }
  0x18   :  { %7602 = vst [vmem:[#allocation18_spill] sm:$0xff] %v6009_v31  ;;  %v6073_v51 = vpack.c.b16 %v1310_v50, %v1310_v50  ;;  %v6078_v53 = vpack.c.b16 %v1312_v52, %v1312_v52  ;;  %v6093_v59 = vpack.c.b16 %v1318_v58, %v1318_v58 }
  0x19   :  { %7603 = vst [vmem:[#allocation19_spill] sm:$0xff] %v6020_v35  ;;  %v6111_v2 = vpack.c.b16 %v1322_v0, %v1322_v0 }
  0x1a   :  { %7604 = vst [vmem:[#allocation20_spill] sm:$0xff] %v6025_v37 }
  0x1b   :  { %1355 = vrot.lane.b32.xlu0 %v5976_v18, %s5886_s13  ;;  %1351 = vrot.lane.b32.xlu2 %v5983_v21, %s5886_s13  ;;  %7605 = vst [vmem:[#allocation21_spill] sm:$0xff] %v6027_v38 }
  0x1c   :  { %7606 = vst [vmem:[#allocation22_spill] sm:$0xff] %v6031_v39 }
  0x1d   :  { %7607 = vst [vmem:[#allocation23_spill] sm:$0xff] %v6038_v41 }
  0x1e   :  { %5665 = vxpose.binary.xlu1.c.b16.start.end [1/2] (short) (narrow) %v5957_v10, %v5989_v23, 16  ;;  %7608 = vst [vmem:[#allocation24_spill] sm:$0xff] %v6055_v46 }
  0x1f   :  { %7609 = vst [vmem:[#allocation25_spill] sm:$0xff] %v6066_v49 }
  0x20   :  { %7610 = vst [vmem:[#allocation26_spill] sm:$0xff] %v6073_v51 }
  0x21   :  { %7611 = vst [vmem:[#allocation27_spill] sm:$0xff] %v6078_v53 }
  0x22   :  { %7612 = vst [vmem:[#allocation28_spill] sm:$0xff] %v6083_v55 }
  0x23   :  { %1361 = vrot.lane.b32.xlu0 %v6003_v28, %s5886_s13  ;;  %1357 = vrot.lane.b32.xlu2 %v6007_v30, %s5886_s13  ;;  %7613 = vst [vmem:[#allocation29_spill] sm:$0xff] %v6088_v57 }
  0x24   :  { %7614 = vst [vmem:[#allocation30_spill] sm:$0xff] %v6093_v59 }
  0x25   :  { %7615 = vst [vmem:[#allocation31_spill] sm:$0xff] %v6104_v63 }
  0x26   :  { %1822 = vst [vmem:[#allocation1] ss:$4 sm:$0xff] %v65_v61 }
  0x27   :  { %7616 = vst [vmem:[#allocation32_spill] sm:$0xff] %v6111_v2 }
  0x2b   :  { %1371 = vrot.lane.b32.xlu0 %v6020_v35, %s5886_s13  ;;  %1363 = vrot.lane.b32.xlu2 %v6025_v37, %s5886_s13 }
  0x2d   :  { %v6109_v1 = vld.sshfl [vmem:[#allocation1] sm:$0xff pattern:$0x73625140] }
  0x2e   :  { %5668 = vxpose.binary.xlu1.c.b16.start.end [1/2] (short) (narrow) %v6005_v29, %v6031_v39, 16  ;;  %1863 = vst [vmem:[#allocation1] ss:$4 sm:$0xff] %v66_v62 }
  0x33   :  { %1365 = vrot.lane.b32.xlu2 %v6038_v41, %s5886_s13 }
  0x35   :  { %v6155_v44 = vld.sshfl [vmem:[#allocation1] sm:$0xff pattern:$0x73625140] }
  0x36   :  { %1904 = vst [vmem:[#allocation1] ss:$4 sm:$0xff] %v67_v40 }
  0x3d   :  { %v6161_v52 = vld.sshfl [vmem:[#allocation1] sm:$0xff pattern:$0x73625140] }
  0x3e   :  { %1945 = vst [vmem:[#allocation1] ss:$4 sm:$0xff] %v68_v42 }
  0x4d   :  { %5671 = vxpose.binary.xlu0.c.b16.start.end [1/2] (short) (narrow) %v6045_v43, %v5944_v5, 16 }
  0x59   :  { %5686 = vxpose.binary.xlu2.c.b16.start.end [1/2] (short) (narrow) %v6055_v46, %v5985_v22, 16 }
  0x5d   :  { %5674 = vxpose.binary.xlu0.c.b16.start.end [1/2] (short) (narrow) %v6057_v47, %v5952_v8, 16 }
  0x69   :  { %5689 = vxpose.binary.xlu2.c.b16.start.end [1/2] (short) (narrow) %v6009_v31, %v5978_v19, 16 }
  0x6d   :  { %5677 = vxpose.binary.xlu0.c.b16.start.end [1/2] (short) (narrow) %v6066_v49, %v6027_v38, 16  ;;  %v6131_v14 = vpop.permute.xlu2 %1345 }
  0x75   :  { %v6135_v17 = vpop.permute.xlu2 %1351 }
  0x7d   :  { %5680 = vxpose.binary.xlu0.c.b16.start.end [1/2] (short) (narrow) %v66_v62, %v65_v61, 16  ;;  %v6139_v25 = vpop.permute.xlu2 %1357 }
  0x85   :  { %v6133_v15 = vpop.permute.xlu0 %1341  ;;  %v6143_v32 = vpop.permute.xlu2 %1363 }
  0x88   :  { %1343 = vrot.lane.b32.xlu1 %v6073_v51, %s5886_s13 }
  0x8d   :  { %5683 = vxpose.binary.xlu0.c.b16.start.end [1/2] (short) (narrow) %v6123_v7, %v6118_v6, 16  ;;  %v6137_v20 = vpop.permute.xlu0 %1355  ;;  %v6147_v36 = vpop.permute.xlu2 %1365 }
  0x90   :  { %1347 = vrot.lane.b32.xlu1 %v6078_v53, %s5886_s13 }
  0x95   :  { %v6141_v26 = vpop.permute.xlu0 %1361 }
  0x98   :  { %1349 = vrot.lane.b32.xlu1 %v6083_v55, %s5886_s13 }
  0x9d   :  { %v6145_v33 = vpop.permute.xlu0 %1371 }
  0x9e   :  { %7617 = vst [vmem:[#allocation33_spill] sm:$0xff] %v6145_v33 }
  0xa0   :  { %1353 = vrot.lane.b32.xlu1 %v6088_v57, %s5886_s13 }
  0xa8   :  { %1359 = vrot.lane.b32.xlu1 %v6093_v59, %s5886_s13  ;;  %v5888_v59 = vmov 1934713408  }
  0xa9   :  { %v381_v57 = vunpack.c.l.s4 %v5888_v59 }
  0xb0   :  { %1369 = vrot.lane.b32.xlu1 %v6104_v63, %s5886_s13 }
  0xb8   :  { %1367 = vrot.lane.b32.xlu1 %v6111_v2, %s5886_s13  ;;  %v5887_v2 = vmov 1983009808  }
  0xba   :  { %v6127_v9 = vpop.trf.xlu1 }
  0xbb   :  { %v353_v55 = vrot.slane %v6127_v9, 4 }
  0xc2   :  { %v6129_v11 = vpop.trf.xlu1 }
  0xca   :  { %v5666_v16 = vpop.trf.xlu1 }
  0xcb   :  { %v360_v21 = vrot.slane %v5666_v16, 4 }
  0xd2   :  { %v5667_v24 = vpop.trf.xlu1 }
  0xd3   :  { %v398_v13 = vrot.slane %v5667_v24, 4 }
  0xda   :  { %v5669_v27 = vpop.trf.xlu1 }
  0xdb   :  { %v372_v0 = vrot.slane %v5669_v27, 4 }
  0xe2   :  { %v5670_v34 = vpop.trf.xlu1 }
  0xe3   :  { %v410_v35 = vrot.slane %v5670_v34, 4 }
  0xed   :  { %5698 = vxpose.binary.xlu1.c.b16.start.end [1/2] (short) (narrow) %v68_v42, %v67_v40, 16  ;;  %v357_v40 = vunpack.c.l.s4 %v5887_v2 }
  0xef   :  { %v6172_v42 = vunpack.c.0.s8 %v357_v40 }
  0xf9   :  { %v5672_v45 = vpop.trf.xlu0 }
  0xfa   :  { %v6157_v48 = vpop.permute.xlu1 %1343  ;;  %v5687_v50 = vpop.trf.xlu2  ;;  %v355_v59 = vsel %vm354_vm0, %v353_v55, %v5672_v45 }
  0xfb   :  { %5701 = vxpose.binary.xlu0.c.b16.start.end [1/2] (short) (narrow) %v6157_v48, %v6133_v15, 16 }
 0x101   :  { %v5673_v54 = vpop.trf.xlu0 }
 0x102   :  { %v6163_v56 = vpop.permute.xlu1 %1347  ;;  %v5688_v58 = vpop.trf.xlu2 }
 0x109   :  { %v5675_v60 = vpop.trf.xlu0 }
 0x10a   :  { %v6165_v61 = vpop.permute.xlu1 %1349  ;;  %v5690_v62 = vpop.trf.xlu2  ;;  %v361_v2 = vsel %vm354_vm0, %v360_v21, %v5675_v60  ;;  %v392_v21 = vrot.slane %v6129_v11, 4  ;;  %v6189_v60 = vunpack.c.0.s8 %v381_v57 }
 0x10b   :  { %v373_v30 = vsel %vm354_vm0, %v372_v0, %v5690_v62  ;;  %v365_v24 = vperm.slane %v361_v2, %v6172_v42  ;;  %v359_v0 = vperm.slane %v355_v59, %v6172_v42 }
 0x10c   :  { %v377_v41 = vperm.slane %v373_v30, %v6172_v42 }
 0x10e   :  { %v384_v51 = vrot.slane %v377_v41, 4 }
 0x111   :  { %v5676_v63 = vpop.trf.xlu0 }
 0x112   :  { %v6167_v37 = vpop.permute.xlu1 %1353  ;;  %v5691_v27 = vpop.trf.xlu2  ;;  %v399_v62 = vsel %vm354_vm0, %v398_v13, %v5676_v63  ;;  %v378_v13 = vrot.slane %v365_v24, 4 }
 0x113   :  { %5710 = vxpose.binary.xlu0.c.b16.start.end [1/2] (short) (narrow) %v6137_v20, %v6167_v37, 16  ;;  %v411_v30 = vsel %vm354_vm0, %v410_v35, %v5691_v27  ;;  %v393_v35 = vsel %vm354_vm0, %v392_v21, %v5673_v54 }
 0x114   :  { %v415_v41 = vperm.slane %v411_v30, %v6172_v42  ;;  %v379_v55 = vsel %vm354_vm0, %v378_v13, %v359_v0  ;;  %v6212_v13 = vld [vmem:[%s7552_s1 + $0x8] sm:$0x3] }
 0x116   :  { %v422_v40 = vrot.slane %v415_v41, 4 }
 0x119   :  { %v5678_v28 = vpop.trf.xlu0 }
 0x11a   :  { %v366_v18 = vrot.slane %v5678_v28, 4  ;;  %v6177_v12 = vpop.permute.xlu1 %1359  ;;  %v403_v28 = vperm.slane %v399_v62, %v6172_v42 }
 0x11c   :  { %v367_v16 = vsel %vm354_vm0, %v366_v18, %v5687_v50  ;;  %v416_v11 = vrot.slane %v403_v28, 4 }
 0x11d   :  { %v371_v34 = vperm.slane %v367_v16, %v6172_v42  ;;  %v383_v16 = vperm.slane %v379_v55, %v6189_v60 }
 0x11f   :  { %v385_v9 = vsel %vm354_vm0, %v384_v51, %v371_v34  ;;  %v397_v51 = vperm.slane %v393_v35, %v6172_v42 }
 0x120   :  { %v389_v50 = vperm.slane %v385_v9, %v6189_v60 }
 0x121   :  { %v5679_v18 = vpop.trf.xlu0  ;;  %v417_v54 = vsel %vm354_vm0, %v416_v11, %v397_v51 }
 0x122   :  { %v404_v63 = vrot.slane %v5679_v18, 4  ;;  %v6194_v27 = vpop.permute.xlu1 %1369  ;;  %v390_v45 = vrot.slane %v389_v50, 4  ;;  %v6217_v18 = vld [vmem:[%s7552_s1 + $0xa] sm:$0x3]  ;;  %s3445_s1 = sld [smem:[#allocation2]] }
 0x123   :  { %5707 = vxpose.binary.xlu1.c.b16.start.end [1/2] (short) (narrow) %v6145_v33, %v6194_v27, 16 }
 0x124   :  { %v405_v2 = vsel %vm354_vm0, %v404_v63, %v5688_v58  ;;  %v421_v58 = vperm.slane %v417_v54, %v6189_v60  ;;  %v391_v24 = vsel %vm354_vm0, %v390_v45, %v383_v16 }
 0x125   :  { %v409_v57 = vperm.slane %v405_v2, %v6172_v42  ;;  %v434_v28 = vshrl.u32 %v391_v24, 16 }
 0x127   :  { %v423_v62 = vsel %vm354_vm0, %v422_v40, %v409_v57 }
 0x128   :  { %v427_v30 = vperm.slane %v423_v62, %v6189_v60 }
 0x129   :  { %v5681_v57 = vpop.trf.xlu0 }
 0x12a   :  { %v428_v34 = vrot.slane %v427_v30, 4  ;;  %v6226_v50 = vpop.permute.xlu1 %1367 }
 0x12c   :  { %v429_v21 = vsel %vm354_vm0, %v428_v34, %v421_v58 }
 0x12d   :  { %v435_v41 = vshrl.u32 %v429_v21, 16  ;;  %v432_v9 = vpack.i.b16 %v429_v21, %v391_v24 }
 0x12f   :  { %v436_v59 = vpack.i.b16 %v435_v41, %v434_v28 }
 0x131   :  { %5692 = vxpose.binary.xlu2.c.b16.start.end [1/2] (short) (narrow) %v436_v59, %v432_v9, 16 }
 0x141   :  { %5695 = vxpose.binary.xlu2.c.b16.start.end [1/2] (short) (narrow) %v6217_v18, %v6212_v13, 16 }
 0x151   :  { %5704 = vxpose.binary.xlu2.c.b16.start.end [1/2] (short) (narrow) %v6163_v56, %v6131_v14, 16 }
 0x161   :  { %5713 = vxpose.binary.xlu2.c.b16.start.end [1/2] (short) (narrow) %v6143_v32, %v6141_v26, 16 }
 0x199   :  { %v5699_v16 = vpop.trf.xlu1 }
 0x1d2   :  { %v5693_v35 = vpop.trf.xlu2 }
 0x1d3   :  { %v473_v63 = vperm.slane %v5693_v35, %v6172_v42 }
 0x1d5   :  { %v474_v0 = vrot.slane %v473_v63, 4  ;;  %v479_v11 = vperm.slane %v473_v63, %v6189_v60 }
 0x1d7   :  { %v475_v40 = vsel %vm354_vm0, 0, %v474_v0  ;;  %v484_v51 = vrot.slane %v479_v11, 4  ;;  %v509_v24 = vshrl.u32 %v479_v11, 16 }
 0x1d8   :  { %v483_v2 = vperm.slane %v475_v40, %v6189_v60 }
 0x1d9   :  { %v485_v30 = vsel %vm354_vm0, 0, %v484_v51 }
 0x1da   :  { %v5694_v55 = vpop.trf.xlu2  ;;  %v486_v58 = vrot.slane %v483_v2, 4  ;;  %v515_v59 = vshrl.u32 %v485_v30, 16  ;;  %v521_v35 = vshrl.u32 %v483_v2, 16 }
 0x1db   :  { %v491_v45 = vperm.slane %v5694_v55, %v6172_v42 }
 0x1dc   :  { %v487_v55 = vsel %vm354_vm0, 0, %v486_v58 }
 0x1dd   :  { %v492_v54 = vrot.slane %v491_v45, 4  ;;  %v497_v62 = vperm.slane %v491_v45, %v6189_v60 }
 0x1df   :  { %v493_v34 = vsel %vm354_vm0, 0, %v492_v54  ;;  %v508_v21 = vpack.i.b16 %v497_v62, %v479_v11  ;;  %v510_v28 = vshrl.u32 %v497_v62, 16  ;;  %v502_v41 = vrot.slane %v497_v62, 4 }
 0x1e0   :  { %v501_v9 = vperm.slane %v493_v34, %v6189_v60 }
 0x1e1   :  { %v552_v63 = vsel %vm550_vm1, %v508_v21, 0  ;;  %v511_v0 = vpack.i.b16 %v510_v28, %v509_v24  ;;  %v503_v40 = vsel %vm354_vm0, 0, %v502_v41  ;;  %v5682_v21 = vpop.trf.xlu0 }
 0x1e2   :  { %561 = vmatpush.bf16.msra.mxu0 %v552_v63  ;;  %v514_v51 = vpack.i.b16 %v503_v40, %v485_v30  ;;  %v520_v45 = vpack.i.b16 %v501_v9, %v483_v2  ;;  %v516_v53 = vshrl.u32 %v503_v40, 16  ;;  %v522_v29 = vshrl.u32 %v501_v9, 16 }
 0x1e3   :  { %v587_v11 = vsel %vm550_vm1, %v511_v0, 0  ;;  %v504_v54 = vrot.slane %v501_v9, 4  ;;  %v527_v2 = vshrl.u32 %v487_v55, 16  ;;  %v5700_v0 = vpop.trf.xlu1 }
 0x1e4   :  { %596 = vmatpush.bf16.msra.mxu1 %v587_v11  ;;  %v622_v62 = vsel %vm550_vm1, %v514_v51, 0  ;;  %v692_v34 = vsel %vm550_vm1, %v520_v45, 0  ;;  %v517_v24 = vpack.i.b16 %v516_v53, %v515_v59  ;;  %v523_v28 = vpack.i.b16 %v522_v29, %v521_v35  ;;  %v5696_v59 = vpop.trf.xlu2 }
 0x1e5   :  { %5594 = vmatmul.msk.bf16.vlgmr.msra.gmra.mxu0 %vm546_vm2, %v5681_v57  ;;  %631 = vmatpush.bf16.msra.mxu2 %v622_v62  ;;  %v505_v30 = vsel %vm354_vm0, 0, %v504_v54 }
 0x1e6   :  { %701 = vmatpush.bf16.msrb.mxu0 %v692_v34  ;;  %v657_v58 = vsel %vm550_vm1, %v517_v24, 0  ;;  %v727_v41 = vsel %vm550_vm1, %v523_v28, 0  ;;  %v526_v9 = vpack.i.b16 %v505_v30, %v487_v55  ;;  %v528_v63 = vshrl.u32 %v505_v30, 16 }
 0x1e7   :  { %5595 = vmatmul.msk.bf16.vlgmr.msra.gmra.mxu1 %vm546_vm2, %v5682_v21  ;;  %666 = vmatpush.bf16.msra.mxu3 %v657_v58 }
 0x1e8   :  { %736 = vmatpush.bf16.msrb.mxu1 %v727_v41  ;;  %5596 = vmatmul.msk.bf16.vlgmr.msra.gmra.mxu2 %vm546_vm2, %v5699_v16  ;;  %v762_v29 = vsel %vm550_vm1, %v526_v9, 0  ;;  %v529_v53 = vpack.i.b16 %v528_v63, %v527_v2 }
 0x1e9   :  { %771 = vmatpush.bf16.msrb.mxu2 %v762_v29  ;;  %v5684_v35 = vpop.trf.xlu0 }
 0x1ea   :  { %5597 = vmatmul.msk.bf16.vlgmr.msra.gmra.mxu3 %vm546_vm2, %v5700_v0  ;;  %v797_v57 = vsel %vm550_vm1, %v529_v53, 0 }
 0x1eb   :  { %806 = vmatpush.bf16.msrb.mxu3 %v797_v57 }
 0x1ec   :  { %v5697_v40 = vpop.trf.xlu2 }
 0x1f1   :  { %v5685_v55 = vpop.trf.xlu0 }
 0x1f4   :  { %v6261_v0 = vpop.trf.xlu2 }
 0x1f5   :  { %5598 = vmatmul.msk.bf16.vlgmr.msrb.gmra.mxu0 %vm546_vm2, %v5696_v59  ;;  %v6269_v59 = vpop.trf.xlu1 }
 0x1f7   :  { %5599 = vmatmul.msk.bf16.vlgmr.msrb.gmra.mxu1 %vm546_vm2, %v5697_v40 }
 0x1f8   :  { %5600 = vmatmul.msk.bf16.vlgmr.msrb.gmra.mxu2 %vm546_vm2, %v5684_v35 }
 0x1f9   :  { %v6265_v53 = vpop.trf.xlu0 }
 0x1fa   :  { %5601 = vmatmul.msk.bf16.vlgmr.msrb.gmra.mxu3 %vm546_vm2, %v5685_v55 }
 0x1fc   :  { %v6263_v29 = vpop.trf.xlu2 }
 0x1fd   :  { %v6275_v55 = vpop.trf.xlu1 }
 0x201   :  { %v6271_v35 = vpop.trf.xlu0 }
 0x204   :  { %v6267_v57 = vpop.trf.xlu2 }
 0x20c   :  { %v6273_v40 = vpop.trf.xlu2 }
 0x262   :  { %v563_v16 = vpop.f32.mrf.mxu0 }
 0x263   :  { %812 = vxpose.xlu1.b32.start.end [1/1] (short) (narrow) %v563_v16, 16  ;;  %v6277_v16 = vpop.trf.xlu0 }
 0x264   :  { %v598_v51 = vpop.f32.mrf.mxu1 }
 0x265   :  { %844 = vxpose.xlu2.b32.start.end [1/1] (short) (narrow) %v598_v51, 16 }
 0x26a   :  { %v565_v45 = vpop.f32.mrf.mxu0 }
 0x26b   :  { %v633_v11 = vpop.f32.mrf.mxu2 }
 0x26c   :  { %876 = vxpose.xlu0.b32.start.end [1/1] (short) (narrow) %v633_v11, 16  ;;  %v600_v54 = vpop.f32.mrf.mxu1 }
 0x26d   :  { %v668_v62 = vpop.f32.mrf.mxu3  ;;  %v6283_v54 = vpop.trf.xlu0 }
 0x272   :  { %v703_v34 = vpop.f32.mrf.mxu0 }
 0x273   :  { %v635_v21 = vpop.f32.mrf.mxu2  ;;  %908 = vxpose.xlu1.b32.start.end [1/1] (short) (narrow) %v668_v62, 16 }
 0x274   :  { %v738_v24 = vpop.f32.mrf.mxu1 }
 0x275   :  { %v670_v28 = vpop.f32.mrf.mxu3  ;;  %940 = vxpose.xlu2.b32.start.end [1/1] (short) (narrow) %v703_v34, 16 }
 0x27a   :  { %v705_v30 = vpop.f32.mrf.mxu0 }
 0x27b   :  { %v773_v2 = vpop.f32.mrf.mxu2 }
 0x27c   :  { %972 = vxpose.xlu0.b32.start.end [1/1] (short) (narrow) %v738_v24, 16  ;;  %v740_v58 = vpop.f32.mrf.mxu1 }
 0x27d   :  { %v808_v41 = vpop.f32.mrf.mxu3 }
 0x283   :  { %1004 = vxpose.xlu1.b32.start.end [1/1] (short) (narrow) %v773_v2, 16  ;;  %v775_v9 = vpop.f32.mrf.mxu2 }
 0x285   :  { %1036 = vxpose.xlu2.b32.start.end [1/1] (short) (narrow) %v808_v41, 16  ;;  %v810_v63 = vpop.f32.mrf.mxu3 }
 0x28b   :  { %5716 = vxpose.binary.xlu0.c.b16.start.end [1/2] (short) (narrow) %v6226_v50, %v6147_v36, 16 }
 0x292   :  { %5719 = vxpose.binary.xlu1.c.b16.start.end [1/2] (short) (narrow) %v6135_v17, %v6165_v61, 16 }
 0x294   :  { %5722 = vxpose.binary.xlu2.c.b16.start.end [1/2] (short) (narrow) %v6177_v12, %v6139_v25, 16 }
 0x2fe   :  { %v6279_v51 = vpop.trf.xlu2 }
 0x2ff   :  { %7618 = vst [vmem:[#allocation34_spill] sm:$0xff] %v6279_v51 }
 0x306   :  { %v861_v45 = vpop.trf.xlu2 }
 0x307   :  { %v6281_v11 = vpop.trf.xlu1 }
 0x308   :  { %7619 = vst [vmem:[#allocation35_spill] sm:$0xff] %v6281_v11  ;;  %v1195_v11 = vrot.slane %v861_v45, 4 }
 0x30e   :  { %v6285_v62 = vpop.trf.xlu2 }
 0x30f   :  { %7620 = vst [vmem:[#allocation36_spill] sm:$0xff] %v6285_v62  ;;  %v829_v34 = vpop.trf.xlu1 }
 0x310   :  { %v6287_v21 = vpop.trf.xlu0  ;;  %v1183_v24 = vrot.slane %v829_v34, 4 }
 0x311   :  { %7621 = vst [vmem:[#allocation37_spill] sm:$0xff] %v6287_v21 }
 0x316   :  { %v957_v28 = vpop.trf.xlu2 }
 0x317   :  { %v6289_v30 = vpop.trf.xlu1 }
 0x318   :  { %7622 = vst [vmem:[#allocation38_spill] sm:$0xff] %v6289_v30  ;;  %v893_v2 = vpop.trf.xlu0 }
 0x319   :  { %v1181_v58 = vrot.slane %v893_v2, 4  ;;  %v1184_v41 = vsel %vm354_vm0, %v893_v2, %v1183_v24 }
 0x31a   :  { %v1192_v63 = vperm.slane %v1184_v41, %v6172_v42 }
 0x31b   :  { %v1182_v9 = vsel %vm354_vm0, %v1181_v58, %v829_v34 }
 0x31c   :  { %v1188_v62 = vperm.slane %v1182_v9, %v6172_v42  ;;  %v1243_v30 = vrot.slane %v1192_v63, 4 }
 0x31e   :  { %v6294_v51 = vpop.trf.xlu2  ;;  %v1231_v2 = vrot.slane %v1188_v62, 4 }
 0x31f   :  { %7623 = vst [vmem:[#allocation39_spill] sm:$0xff] %v6294_v51  ;;  %v925_v39 = vpop.trf.xlu1 }
 0x320   :  { %v1193_v49 = vrot.slane %v925_v39, 4  ;;  %v1196_v21 = vsel %vm354_vm0, %v925_v39, %v1195_v11  ;;  %v6298_v38 = vpop.trf.xlu0 }
 0x321   :  { %7624 = vst [vmem:[#allocation40_spill] sm:$0xff] %v6298_v38  ;;  %v1204_v31 = vperm.slane %v1196_v21, %v6172_v42 }
 0x322   :  { %v1194_v24 = vsel %vm354_vm0, %v1193_v49, %v861_v45 }
 0x323   :  { %v1200_v34 = vperm.slane %v1194_v24, %v6172_v42  ;;  %v1241_v58 = vrot.slane %v1204_v31, 4  ;;  %v1244_v41 = vsel %vm354_vm0, %v1204_v31, %v1243_v30  ;;  %v1207_v30 = vrot.slane %v957_v28, 4 }
 0x325   :  { %v1229_v51 = vrot.slane %v1200_v34, 4  ;;  %v1232_v9 = vsel %vm354_vm0, %v1200_v34, %v1231_v2  ;;  %v1242_v19 = vsel %vm354_vm0, %v1241_v58, %v1192_v63 }
 0x326   :  { %v1053_v46 = vpop.trf.xlu2 }
 0x327   :  { %v6306_v39 = vpop.trf.xlu1  ;;  %v1217_v11 = vrot.slane %v1053_v46, 4  ;;  %v1230_v38 = vsel %vm354_vm0, %v1229_v51, %v1188_v62  ;;  %v1946_v51 = vld.sshfl [vmem:[#allocation1] sm:$0xff pattern:$0x73625140]  ;;  %v1663_v62 = vrot.slane %v6269_v59, 4 }
 0x328   :  { %7625 = vst [vmem:[#allocation41_spill] sm:$0xff] %v6306_v39  ;;  %v989_v21 = vpop.trf.xlu0 }
 0x329   :  { %v1219_v22 = vrot.slane %v989_v21, 4  ;;  %v1218_v49 = vsel %vm354_vm0, %v1217_v11, %v989_v21  ;;  %1986 = vst [vmem:[#allocation1] ss:$4 sm:$0xff] %v6212_v13 }
 0x32a   :  { %v1224_v31 = vperm.slane %v1218_v49, %v6172_v42  ;;  %v1236_v49 = vperm.slane %v1230_v38, %v6189_v60 }
 0x32b   :  { %v1220_v45 = vsel %vm354_vm0, %v1053_v46, %v1219_v22 }
 0x32c   :  { %v1228_v24 = vperm.slane %v1220_v45, %v6172_v42  ;;  %v1253_v39 = vrot.slane %v1224_v31, 4 }
 0x32e   :  { %v1265_v2 = vrot.slane %v1228_v24, 4 }
 0x32f   :  { %v1021_v34 = vpop.trf.xlu1 }
 0x330   :  { %v1205_v63 = vrot.slane %v1021_v34, 4  ;;  %v1208_v58 = vsel %vm354_vm0, %v1021_v34, %v1207_v30  ;;  %v1907_v30 = vrot.slane %v6161_v52, 1  ;;  %v1948_v34 = vrot.slane %v1946_v51, 1 }
 0x331   :  { %v1216_v10 = vperm.slane %v1208_v58, %v6172_v42  ;;  %v1825_v58 = vrot.slane %v6109_v1, 1  ;;  %v1279_v1 = vrot.slane %v1236_v49, 4 }
 0x332   :  { %v1206_v11 = vsel %vm354_vm0, %v1205_v63, %v957_v28  ;;  %v1866_v63 = vrot.slane %v6155_v44, 1  ;;  %5728 = vxpose.binary.xlu1.c.b16.start.end [1/2] (short) (narrow) %v1948_v34, %v1907_v30, 16 }
 0x333   :  { %v1212_v22 = vperm.slane %v1206_v11, %v6172_v42  ;;  %v1266_v46 = vsel %vm354_vm0, %v1265_v2, %v1216_v10  ;;  %v1267_v21 = vrot.slane %v1216_v10, 4  ;;  %v1651_v2 = vrot.slane %v6277_v16, 4 }
 0x334   :  { %v1272_v45 = vperm.slane %v1266_v46, %v6189_v60  ;;  %v1248_v10 = vperm.slane %v1242_v19, %v6189_v60  ;;  %5731 = vxpose.binary.xlu2.c.b16.start.end [1/2] (short) (narrow) %v1866_v63, %v1825_v58, 16  ;;  %v1664_v19 = vsel %vm354_vm0, %v1663_v62, %v6267_v57  ;;  %v1987_v46 = vld.sshfl [vmem:[#allocation1] sm:$0xff pattern:$0x73625140] }
 0x335   :  { %v1254_v59 = vsel %vm354_vm0, %v1253_v39, %v1212_v22  ;;  %v1255_v33 = vrot.slane %v1212_v22, 4  ;;  %v1268_v28 = vsel %vm354_vm0, %v1228_v24, %v1267_v21  ;;  %v5723_v13 = vpop.trf.xlu2  ;;  %v1240_v39 = vperm.slane %v1232_v9, %v6189_v60  ;;  %2027 = vst [vmem:[#allocation1] ss:$4 sm:$0xff] %v6217_v18 }
 0x336   :  { %v1260_v38 = vperm.slane %v1254_v59, %v6189_v60  ;;  %v1285_v51 = vrot.slane %v1272_v45, 4  ;;  %v1701_v24 = vrot.slane %v6275_v55, 4  ;;  %v1252_v22 = vperm.slane %v1244_v41, %v6189_v60 }
 0x337   :  { %v1256_v52 = vsel %vm354_vm0, %v1224_v31, %v1255_v33  ;;  %v5717_v11 = vpop.trf.xlu0  ;;  %v1276_v44 = vperm.slane %v1268_v28, %v6189_v60  ;;  %v1652_v31 = vsel %vm354_vm0, %v1651_v2, %v6261_v0  ;;  %v1287_v9 = vrot.slane %v1248_v10, 4 }
 0x338   :  { %v1657_v16 = vrot.slane %v5717_v11, 4  ;;  %v1277_v21 = vrot.slane %v1260_v38, 4  ;;  %v6338_v33 = vsel %vm354_vm0, %v1260_v38, %v1279_v1  ;;  %v1264_v41 = vperm.slane %v1256_v52, %v6189_v60 }
 0x339   :  { %v1283_v30 = vrot.slane %v1240_v39, 4  ;;  %v6348_v57 = vsel %vm354_vm0, %v1285_v51, %v1248_v10  ;;  %v1668_v62 = vperm.slane %v1664_v19, %v6172_v42  ;;  %v1291_v34 = vrot.slane %v1252_v22, 4 }
 0x33a   :  { %v6344_v55 = vsel %vm354_vm0, %v1277_v21, %v1236_v49  ;;  %v6352_v58 = vsel %vm354_vm0, %v1272_v45, %v1287_v9  ;;  %v1289_v59 = vrot.slane %v1276_v44, 4  ;;  %v1702_v18 = vsel %vm354_vm0, %v1701_v24, %v6273_v40 }
 0x33b   :  { %v1658_v0 = vsel %vm354_vm0, %v1657_v16, %v5723_v13  ;;  %v1281_v49 = vrot.slane %v1264_v41, 4  ;;  %v6358_v28 = vsel %vm354_vm0, %v1264_v41, %v1283_v30  ;;  %v6364_v10 = vsel %vm354_vm0, %v1276_v44, %v1291_v34 }
 0x33c   :  { %v6361_v2 = vsel %vm354_vm0, %v1289_v59, %v1252_v22  ;;  %v1689_v45 = vrot.slane %v6283_v54, 4  ;;  %v1656_v13 = vperm.slane %v1652_v31, %v6172_v42  ;;  %v1706_v11 = vperm.slane %v1702_v18, %v6172_v42  ;;  %v2028_v19 = vld.sshfl [vmem:[#allocation1] sm:$0xff pattern:$0x73625140] }
 0x33d   :  { %v5724_v51 = vpop.trf.xlu2  ;;  %v6368_v40 = vsel %vm354_vm0, %v1281_v49, %v1240_v39  ;;  %v1662_v1 = vperm.slane %v1658_v0, %v6172_v42  ;;  %v1675_v22 = vrot.slane %v1668_v62, 4  ;;  %v1989_v21 = vrot.slane %v1987_v46, 1  ;;  %2068 = vst [vmem:[#allocation1] ss:$4 sm:$0xff] %v6118_v6 }
 0x33e   :  { %v5720_v63 = vpop.trf.xlu1  ;;  %v2030_v9 = vrot.slane %v2028_v19, 1  ;;  %v1690_v39 = vsel %vm354_vm0, %v1689_v45, %v6263_v29  ;;  %v1669_v41 = vrot.slane %v1656_v13, 4  ;;  %v1713_v30 = vrot.slane %v1706_v11, 4 }
 0x33f   :  { %v1645_v38 = vrot.slane %v5720_v63, 4  ;;  %v5718_v52 = vpop.trf.xlu0  ;;  %v1676_v62 = vsel %vm354_vm0, %v1675_v22, %v1662_v1 }
 0x340   :  { %v1695_v24 = vrot.slane %v5718_v52, 4  ;;  %v1680_v46 = vperm.slane %v1676_v62, %v6189_v60 }
 0x341   :  { %v1646_v44 = vsel %vm354_vm0, %v1645_v38, %v6265_v53  ;;  %v1694_v53 = vperm.slane %v1690_v39, %v6172_v42 }
 0x342   :  { %v1650_v54 = vperm.slane %v1646_v44, %v6172_v42  ;;  %v1696_v16 = vsel %vm354_vm0, %v1695_v24, %v5724_v51  ;;  %5737 = vxpose.binary.xlu1.c.b16.start.end [1/2] (short) (narrow) %v2030_v9, %v1989_v21, 16  ;;  %v1681_v52 = vrot.slane %v1680_v46, 4 }
 0x343   :  { %v1700_v31 = vperm.slane %v1696_v16, %v6172_v42  ;;  %v1707_v45 = vrot.slane %v1694_v53, 4 }
 0x344   :  { %v1670_v18 = vsel %vm354_vm0, %v1669_v41, %v1650_v54  ;;  %v2069_v63 = vld.sshfl [vmem:[#allocation1] sm:$0xff pattern:$0x73625140] }
 0x345   :  { %v1714_v34 = vsel %vm354_vm0, %v1713_v30, %v1700_v31  ;;  %v1674_v49 = vperm.slane %v1670_v18, %v6189_v60  ;;  %2109 = vst [vmem:[#allocation1] ss:$4 sm:$0xff] %v6123_v7  ;;  %v2071_v16 = vrot.slane %v2069_v63, 1 }
 0x346   :  { %v5721_v59 = vpop.trf.xlu1  ;;  %v1718_v0 = vperm.slane %v1714_v34, %v6189_v60 }
 0x347   :  { %v1683_v6 = vrot.slane %v5721_v59, 4  ;;  %v1682_v11 = vsel %vm354_vm0, %v1681_v52, %v1674_v49 }
 0x348   :  { %v1719_v13 = vrot.slane %v1718_v0, 4  ;;  %v1725_v22 = vshrl.u32 %v1682_v11, 16 }
 0x349   :  { %v1684_v29 = vsel %vm354_vm0, %v1683_v6, %v6271_v35 }
 0x34a   :  { %v1688_v38 = vperm.slane %v1684_v29, %v6172_v42 }
 0x34c   :  { %v1708_v51 = vsel %vm354_vm0, %v1707_v45, %v1688_v38  ;;  %v2110_v54 = vld.sshfl [vmem:[#allocation1] sm:$0xff pattern:$0x73625140] }
 0x34d   :  { %v1712_v1 = vperm.slane %v1708_v51, %v6189_v60  ;;  %v2112_v21 = vrot.slane %v2110_v54, 1 }
 0x34f   :  { %v1720_v24 = vsel %vm354_vm0, %v1719_v13, %v1712_v1 }
 0x350   :  { %v1726_v35 = vshrl.u32 %v1720_v24, 16  ;;  %v1723_v44 = vpack.i.b16 %v1720_v24, %v1682_v11 }
 0x352   :  { %v1727_v19 = vpack.i.b16 %v1726_v35, %v1725_v22 }
 0x354   :  { %5725 = vxpose.binary.xlu0.c.b16.start.end [1/2] (short) (narrow) %v1727_v19, %v1723_v44, 16 }
 0x364   :  { %5734 = vxpose.binary.xlu0.c.b16.start.end [1/2] (short) (narrow) %v2112_v21, %v2071_v16, 16 }
 0x3d5   :  { %v5732_v59 = vpop.trf.xlu2 }
 0x3de   :  { %v5729_v41 = vpop.trf.xlu1 }
 0x3e6   :  { %v5730_v13 = vpop.trf.xlu1 }
 0x400   :  { %v5726_v7 = vpop.trf.xlu0 }
 0x401   :  { %v1764_v9 = vperm.slane %v5726_v7, %v6172_v42 }
 0x403   :  { %v1765_v39 = vrot.slane %v1764_v9, 4  ;;  %v1770_v31 = vperm.slane %v1764_v9, %v6189_v60 }
 0x405   :  { %v1766_v30 = vsel %vm354_vm0, 0, %v1765_v39  ;;  %v1775_v53 = vrot.slane %v1770_v31, 4  ;;  %v1800_v49 = vshrl.u32 %v1770_v31, 16 }
 0x406   :  { %v1774_v62 = vperm.slane %v1766_v30, %v6189_v60  ;;  %v5733_v30 = vpop.trf.xlu2 }
 0x407   :  { %v1776_v0 = vsel %vm354_vm0, 0, %v1775_v53 }
 0x408   :  { %v5727_v34 = vpop.trf.xlu0  ;;  %v1777_v29 = vrot.slane %v1774_v62, 4  ;;  %v1806_v11 = vshrl.u32 %v1776_v0, 16  ;;  %v1812_v1 = vshrl.u32 %v1774_v62, 16 }
 0x409   :  { %v1782_v18 = vperm.slane %v5727_v34, %v6172_v42 }
 0x40a   :  { %v1778_v44 = vsel %vm354_vm0, 0, %v1777_v29 }
 0x40b   :  { %v1783_v46 = vrot.slane %v1782_v18, 4  ;;  %v1788_v6 = vperm.slane %v1782_v18, %v6189_v60  ;;  %v3145_v18 = vsel %vm546_vm2, %v6133_v15, 0 }
 0x40d   :  { %v1784_v63 = vsel %vm354_vm0, 0, %v1783_v46  ;;  %v1793_v45 = vrot.slane %v1788_v6, 4  ;;  %v1801_v38 = vshrl.u32 %v1788_v6, 16  ;;  %v1799_v52 = vpack.i.b16 %v1788_v6, %v1770_v31 }
 0x40e   :  { %v1792_v51 = vperm.slane %v1784_v63, %v6189_v60  ;;  %v1818_v46 = vshrl.u32 %v1778_v44, 16 }
 0x40f   :  { %v1847_v24 = vsel %vm550_vm1, %v1799_v52, 0  ;;  %v1802_v22 = vpack.i.b16 %v1801_v38, %v1800_v49  ;;  %v1794_v35 = vsel %vm354_vm0, 0, %v1793_v45  ;;  %v3183_v45 = vsel %vm546_vm2, %v6131_v14, 0  ;;  %v5738_v52 = vpop.trf.xlu1 }
 0x410   :  { %1856 = vmatpush.bf16.msra.mxu0 %v1847_v24  ;;  %v1805_v19 = vpack.i.b16 %v1794_v35, %v1776_v0  ;;  %v1811_v54 = vpack.i.b16 %v1792_v51, %v1774_v62  ;;  %v1807_v16 = vshrl.u32 %v1794_v35, 16  ;;  %v1813_v21 = vshrl.u32 %v1792_v51, 16 }
 0x411   :  { %v1888_v7 = vsel %vm550_vm1, %v1802_v22, 0  ;;  %v1795_v9 = vrot.slane %v1792_v51, 4  ;;  %v5735_v51 = vpop.trf.xlu0  ;;  %v3240_v14 = vsel %vm546_vm2, %v6135_v17, 0  ;;  %v3297_v17 = vsel %vm546_vm2, %v6139_v25, 0  ;;  %v7627_v25 = vld [vmem:[#allocation8_spill] sm:$0xff] }
 0x412   :  { %1897 = vmatpush.bf16.msra.mxu1 %v1888_v7  ;;  %v1929_v39 = vsel %vm550_vm1, %v1805_v19, 0  ;;  %v2011_v31 = vsel %vm550_vm1, %v1811_v54, 0  ;;  %v1808_v53 = vpack.i.b16 %v1807_v16, %v1806_v11  ;;  %v1814_v34 = vpack.i.b16 %v1813_v21, %v1812_v1 }
 0x413   :  { %5602 = vmatmul.msk.bf16.vlgmr.msra.gmra.mxu0 %vm546_vm2, %v5732_v59  ;;  %1938 = vmatpush.bf16.msra.mxu2 %v1929_v39  ;;  %v1796_v62 = vsel %vm354_vm0, 0, %v1795_v9  ;;  %v3164_v59 = vsel %vm546_vm2, %v6157_v48, 0  ;;  %v3202_v48 = vsel %vm546_vm2, %v6163_v56, 0  ;;  %v3259_v56 = vsel %vm546_vm2, %v6167_v37, 0 }
 0x414   :  { %2020 = vmatpush.bf16.msrb.mxu0 %v2011_v31  ;;  %v1970_v6 = vsel %vm550_vm1, %v1808_v53, 0  ;;  %v2052_v0 = vsel %vm550_vm1, %v1814_v34, 0  ;;  %v1817_v29 = vpack.i.b16 %v1796_v62, %v1778_v44  ;;  %v1819_v49 = vshrl.u32 %v1796_v62, 16 }
 0x415   :  { %5603 = vmatmul.msk.bf16.vlgmr.msra.gmra.mxu1 %vm546_vm2, %v5733_v30  ;;  %1979 = vmatpush.bf16.msra.mxu3 %v1970_v6  ;;  %v3278_v1 = vsel %vm546_vm2, %v6137_v20, 0  ;;  %v3316_v37 = vsel %vm546_vm2, %v6177_v12, 0  ;;  %v3335_v20 = vsel %vm546_vm2, %v6141_v26, 0  ;;  %v3373_v12 = vsel %vm546_vm2, %v6147_v36, 0  ;;  %v7628_v26 = vld [vmem:[#allocation14_spill] sm:$0xff]  ;;  %v7632_v36 = vld [vmem:[#allocation21_spill] sm:$0xff] }
 0x416   :  { %2061 = vmatpush.bf16.msrb.mxu1 %v2052_v0  ;;  %v2093_v15 = vsel %vm550_vm1, %v1817_v29, 0  ;;  %v1820_v63 = vpack.i.b16 %v1819_v49, %v1818_v46  ;;  %5604 = vmatmul.msk.bf16.vlgmr.msra.gmra.mxu2 %vm546_vm2, %v5729_v41  ;;  %v3221_v41 = vsel %vm546_vm2, %v6165_v61, 0  ;;  %v7633_v61 = vld [vmem:[#allocation25_spill] sm:$0xff] }
 0x417   :  { %2102 = vmatpush.bf16.msrb.mxu2 %v2093_v15  ;;  %v5739_v11 = vpop.trf.xlu1 }
 0x418   :  { %3154 = vmatpush.bf16.xpose.msra.mxu0 %v3145_v18  ;;  %v2134_v38 = vsel %vm550_vm1, %v1820_v63, 0  ;;  %5605 = vmatmul.msk.bf16.vlgmr.msra.gmra.mxu3 %vm546_vm2, %v5730_v13 }
 0x419   :  { %2143 = vmatpush.bf16.msrb.mxu3 %v2134_v38  ;;  %v5736_v13 = vpop.trf.xlu0 }
 0x41a   :  { %3173 = vmatpush.bf16.xpose.msra.mxu1 %v3164_v59 }
 0x41b   :  { %3192 = vmatpush.bf16.xpose.msra.mxu2 %v3183_v45 }
 0x41d   :  { %3211 = vmatpush.bf16.xpose.msra.mxu3 %v3202_v48 }
 0x423   :  { %5606 = vmatmul.msk.bf16.vlgmr.msrb.gmra.mxu0 %vm546_vm2, %v5738_v52 }
 0x424   :  { %3230 = vmatpush.bf16.xpose.msrb.mxu0 %v3221_v41 }
 0x425   :  { %5607 = vmatmul.msk.bf16.vlgmr.msrb.gmra.mxu1 %vm546_vm2, %v5739_v11  ;;  %v6504_v11 = vstv %s3445_s1 }
 0x426   :  { %3249 = vmatpush.bf16.xpose.msrb.mxu1 %v3240_v14  ;;  %5608 = vmatmul.msk.bf16.vlgmr.msrb.gmra.mxu2 %vm546_vm2, %v5735_v51 }
 0x427   :  { %3268 = vmatpush.bf16.xpose.msrb.mxu2 %v3259_v56  ;;  %v6509_v56 = vstv %s5626_s25 }
 0x428   :  { %5609 = vmatmul.msk.bf16.vlgmr.msrb.gmra.mxu3 %vm546_vm2, %v5736_v13  ;;  %v6507_v13 = vstv %s3463_s26 }
 0x429   :  { %3287 = vmatpush.bf16.xpose.msrb.mxu3 %v3278_v1 }
 0x433   :  { %5610 = vmatmul.msk.bf16.vlgmr.msra.gmra.mxu0 %vm546_vm2, %v5944_v5  ;;  %v3354_v5 = vsel %vm546_vm2, %v6143_v32, 0  ;;  %v7629_v32 = vld [vmem:[#allocation24_spill] sm:$0xff] }
 0x434   :  { %3306 = vmatpush.bf16.xpose.msra.mxu0 %v3297_v17 }
 0x435   :  { %5611 = vmatmul.msk.bf16.vlgmr.msra.gmra.mxu1 %vm546_vm2, %v6045_v43  ;;  %v3411_v43 = vsel %vm546_vm2, %v6194_v27, 0  ;;  %v7634_v27 = vld [vmem:[#allocation22_spill] sm:$0xff] }
 0x436   :  { %3325 = vmatpush.bf16.xpose.msra.mxu1 %v3316_v37  ;;  %5612 = vmatmul.msk.bf16.vlgmr.msra.gmra.mxu2 %vm546_vm2, %v5952_v8  ;;  %v3392_v8 = vsel %vm546_vm2, %v6226_v50, 0  ;;  %v7635_v50 = vld [vmem:[#allocation16_spill] sm:$0xff] }
 0x437   :  { %3344 = vmatpush.bf16.xpose.msra.mxu2 %v3335_v20  ;;  %v3491_v20 = vmul.f32 %v6509_v56, %v6344_v55 }
 0x438   :  { %5613 = vmatmul.msk.bf16.vlgmr.msra.gmra.mxu3 %vm546_vm2, %v6057_v47  ;;  %v7626_v47 = vld [vmem:[#allocation33_spill] sm:$0xff] }
 0x439   :  { %3363 = vmatpush.bf16.xpose.msra.mxu3 %v3354_v5 }
 0x443   :  { %5614 = vmatmul.msk.bf16.vlgmr.msrb.gmra.mxu0 %vm546_vm2, %v5940_v3  ;;  %v3430_v3 = vsel %vm546_vm2, %v7626_v47, 0  ;;  %v3492_v47 = vmul.f32 %v6509_v56, %v6338_v33  ;;  %v3494_v33 = vmul.f32 %v6509_v56, %v6358_v28  ;;  %v3496_v28 = vmul.f32 %v6509_v56, %v6352_v58 }
 0x444   :  { %3382 = vmatpush.bf16.xpose.msrb.mxu0 %v3373_v12  ;;  %v3498_v58 = vmul.f32 %v6509_v56, %v6364_v10 }
 0x445   :  { %5615 = vmatmul.msk.bf16.vlgmr.msrb.gmra.mxu1 %vm546_vm2, %v5942_v4  ;;  %v7630_v4 = vld [vmem:[#allocation12_spill] sm:$0xff] }
 0x446   :  { %3401 = vmatpush.bf16.xpose.msrb.mxu1 %v3392_v8  ;;  %5616 = vmatmul.msk.bf16.vlgmr.msrb.gmra.mxu2 %vm546_vm2, %v5989_v23  ;;  %v7631_v23 = vld [vmem:[#allocation18_spill] sm:$0xff] }
 0x447   :  { %3420 = vmatpush.bf16.xpose.msrb.mxu2 %v3411_v43 }
 0x448   :  { %5617 = vmatmul.msk.bf16.vlgmr.msrb.gmra.mxu3 %vm546_vm2, %v7627_v25 }
 0x449   :  { %3439 = vmatpush.bf16.xpose.msrb.mxu3 %v3430_v3 }
 0x453   :  { %5618 = vmatmul.msk.bf16.vlgmr.msra.gmra.mxu0 %vm546_vm2, %v7628_v26 }
 0x455   :  { %5619 = vmatmul.msk.bf16.vlgmr.msra.gmra.mxu1 %vm546_vm2, %v7629_v32 }
 0x456   :  { %5620 = vmatmul.msk.bf16.vlgmr.msra.gmra.mxu2 %vm546_vm2, %v7630_v4 }
 0x458   :  { %5621 = vmatmul.msk.bf16.vlgmr.msra.gmra.mxu3 %vm546_vm2, %v7631_v23 }
 0x463   :  { %5622 = vmatmul.msk.bf16.vlgmr.msrb.gmra.mxu0 %vm546_vm2, %v7632_v36  ;;  %v3493_v36 = vmul.f32 %v6509_v56, %v6368_v40  ;;  %v3495_v40 = vmul.f32 %v6509_v56, %v6348_v57 }
 0x465   :  { %5623 = vmatmul.msk.bf16.vlgmr.msrb.gmra.mxu1 %vm546_vm2, %v7633_v61 }
 0x466   :  { %5624 = vmatmul.msk.bf16.vlgmr.msrb.gmra.mxu2 %vm546_vm2, %v7634_v27 }
 0x468   :  { %5625 = vmatmul.msk.bf16.vlgmr.msrb.gmra.mxu3 %vm546_vm2, %v7635_v50 }
 0x490   :  { %v1858_v24 = vpop.f32.mrf.mxu0 }
 0x491   :  { %2149 = vxpose.xlu2.b32.start.end [1/1] (short) (narrow) %v1858_v24, 16 }
 0x492   :  { %v1899_v22 = vpop.f32.mrf.mxu1 }
 0x493   :  { %2181 = vxpose.xlu0.b32.start.end [1/1] (short) (narrow) %v1899_v22, 16 }
 0x498   :  { %v1860_v35 = vpop.f32.mrf.mxu0 }
 0x499   :  { %v1940_v44 = vpop.f32.mrf.mxu2 }
 0x49a   :  { %v1901_v19 = vpop.f32.mrf.mxu1  ;;  %2213 = vxpose.xlu1.b32.start.end [1/1] (short) (narrow) %v1940_v44, 16 }
 0x49b   :  { %v1981_v54 = vpop.f32.mrf.mxu3 }
 0x4a0   :  { %v2022_v16 = vpop.f32.mrf.mxu0 }
 0x4a1   :  { %2245 = vxpose.xlu2.b32.start.end [1/1] (short) (narrow) %v1981_v54, 16  ;;  %v1942_v21 = vpop.f32.mrf.mxu2 }
 0x4a2   :  { %v2063_v7 = vpop.f32.mrf.mxu1 }
 0x4a3   :  { %2277 = vxpose.xlu0.b32.start.end [1/1] (short) (narrow) %v2022_v16, 16  ;;  %v1983_v9 = vpop.f32.mrf.mxu3 }
 0x4a8   :  { %v2024_v39 = vpop.f32.mrf.mxu0 }
 0x4a9   :  { %v2104_v31 = vpop.f32.mrf.mxu2 }
 0x4aa   :  { %v2065_v30 = vpop.f32.mrf.mxu1  ;;  %2309 = vxpose.xlu1.b32.start.end [1/1] (short) (narrow) %v2063_v7, 16 }
 0x4ab   :  { %v2145_v53 = vpop.f32.mrf.mxu3 }
 0x4b0   :  { %v6488_v34 = vpop.f32.mrf.mxu0 }
 0x4b1   :  { %2341 = vxpose.xlu2.b32.start.end [1/1] (short) (narrow) %v2104_v31, 16  ;;  %v2106_v18 = vpop.f32.mrf.mxu2 }
 0x4b2   :  { %v6490_v62 = vpop.f32.mrf.mxu1 }
 0x4b3   :  { %2373 = vxpose.xlu0.b32.start.end [1/1] (short) (narrow) %v2145_v53, 16  ;;  %v2147_v46 = vpop.f32.mrf.mxu3 }
 0x4b8   :  { %v3158_v6 = vpop.f32.mrf.mxu0 }
 0x4b9   :  { %v6492_v0 = vpop.f32.mrf.mxu2  ;;  %v3497_v6 = vmul.f32 %v6509_v56, %v6361_v2 }
 0x4ba   :  { %v3177_v29 = vpop.f32.mrf.mxu1 }
 0x4bb   :  { %v6494_v49 = vpop.f32.mrf.mxu3 }
 0x4c0   :  { %v6496_v59 = vpop.f32.mrf.mxu0 }
 0x4c1   :  { %v3196_v15 = vpop.f32.mrf.mxu2 }
 0x4c2   :  { %v6498_v63 = vpop.f32.mrf.mxu1 }
 0x4c3   :  { %v3215_v45 = vpop.f32.mrf.mxu3 }
 0x4c8   :  { %v3234_v38 = vpop.f32.mrf.mxu0 }
 0x4c9   :  { %v6500_v52 = vpop.f32.mrf.mxu2 }
 0x4ca   :  { %v3253_v48 = vpop.f32.mrf.mxu1 }
 0x4cb   :  { %v6502_v51 = vpop.f32.mrf.mxu3 }
 0x4d0   :  { %v3308_v41 = vpop.f32.mrf.mxu0 }
 0x4d1   :  { %v3455_v14 = vmul.f32 %v6504_v11, %v3308_v41  ;;  %v3272_v1 = vpop.f32.mrf.mxu2 }
 0x4d2   :  { %v3327_v17 = vpop.f32.mrf.mxu1 }
 0x4d3   :  { %v3473_v37 = vadd.f32 %v6507_v13, %v3455_v14  ;;  %v3456_v5 = vmul.f32 %v6504_v11, %v3327_v17  ;;  %v3291_v12 = vpop.f32.mrf.mxu3 }
 0x4d5   :  { %v6515_v8 = vadd.f32 %v3491_v20, %v3473_v37  ;;  %v3474_v43 = vadd.f32 %v6507_v13, %v3456_v5 }
 0x4d7   :  { %v6520_v3 = vadd.f32 %v3492_v47, %v3474_v43 }
 0x4d8   :  { %v3310_v25 = vpop.f32.mrf.mxu0 }
 0x4d9   :  { %v3346_v26 = vpop.f32.mrf.mxu2 }
 0x4da   :  { %v3329_v32 = vpop.f32.mrf.mxu1  ;;  %v3457_v4 = vmul.f32 %v6504_v11, %v3346_v26 }
 0x4db   :  { %v3365_v23 = vpop.f32.mrf.mxu3 }
 0x4dc   :  { %v3475_v55 = vadd.f32 %v6507_v13, %v3457_v4  ;;  %v3458_v61 = vmul.f32 %v6504_v11, %v3365_v23 }
 0x4de   :  { %v6527_v27 = vadd.f32 %v3493_v36, %v3475_v55  ;;  %v3476_v50 = vadd.f32 %v6507_v13, %v3458_v61 }
 0x4e0   :  { %v3384_v24 = vpop.f32.mrf.mxu0  ;;  %v6532_v22 = vadd.f32 %v3494_v33, %v3476_v50 }
 0x4e1   :  { %v3459_v35 = vmul.f32 %v6504_v11, %v3384_v24  ;;  %v3348_v44 = vpop.f32.mrf.mxu2 }
 0x4e2   :  { %v3403_v19 = vpop.f32.mrf.mxu1 }
 0x4e3   :  { %v3477_v54 = vadd.f32 %v6507_v13, %v3459_v35  ;;  %v3460_v16 = vmul.f32 %v6504_v11, %v3403_v19  ;;  %v3367_v21 = vpop.f32.mrf.mxu3 }
 0x4e5   :  { %v6539_v7 = vadd.f32 %v3495_v40, %v3477_v54  ;;  %v3478_v9 = vadd.f32 %v6507_v13, %v3460_v16 }
 0x4e7   :  { %v6544_v39 = vadd.f32 %v3496_v28, %v3478_v9 }
 0x4e8   :  { %v3386_v31 = vpop.f32.mrf.mxu0 }
 0x4e9   :  { %v3422_v30 = vpop.f32.mrf.mxu2 }
 0x4ea   :  { %v3405_v53 = vpop.f32.mrf.mxu1  ;;  %v3461_v18 = vmul.f32 %v6504_v11, %v3422_v30 }
 0x4eb   :  { %v3441_v46 = vpop.f32.mrf.mxu3 }
 0x4ec   :  { %v3479_v57 = vadd.f32 %v6507_v13, %v3461_v18  ;;  %v3462_v29 = vmul.f32 %v6504_v11, %v3441_v46 }
 0x4ee   :  { %v6551_v15 = vadd.f32 %v3497_v6, %v3479_v57  ;;  %v3480_v45 = vadd.f32 %v6507_v13, %v3462_v29 }
 0x4f0   :  { %v6556_v38 = vadd.f32 %v3498_v58, %v3480_v45 }
 0x4f1   :  { %v3424_v48 = vpop.f32.mrf.mxu2 }
 0x4f3   :  { %v3443_v41 = vpop.f32.mrf.mxu3 }
 0x52a   :  { %v2165_v14 = vpop.trf.xlu2 }
 0x52b   :  { %v2407_v25 = vrot.slane %v2165_v14, 4 }
 0x532   :  { %v6558_v1 = vpop.trf.xlu2 }
 0x537   :  { %v2197_v17 = vpop.trf.xlu0 }
 0x538   :  { %v2419_v10 = vrot.slane %v2197_v17, 4 }
 0x53a   :  { %v2261_v37 = vpop.trf.xlu2 }
 0x53b   :  { %v2417_v4 = vrot.slane %v2261_v37, 4  ;;  %v2420_v61 = vsel %vm354_vm0, %v2261_v37, %v2419_v10 }
 0x53c   :  { %v2428_v19 = vperm.slane %v2420_v61, %v6172_v42 }
 0x53d   :  { %v2418_v35 = vsel %vm354_vm0, %v2417_v4, %v2197_v17 }
 0x53e   :  { %v2229_v20 = vpop.trf.xlu1  ;;  %v2424_v21 = vperm.slane %v2418_v35, %v6172_v42  ;;  %v2465_v31 = vrot.slane %v2428_v19, 4 }
 0x53f   :  { %v6560_v2 = vpop.trf.xlu0  ;;  %v2405_v12 = vrot.slane %v2229_v20, 4  ;;  %v2408_v32 = vsel %vm354_vm0, %v2229_v20, %v2407_v25 }
 0x540   :  { %v2416_v55 = vperm.slane %v2408_v32, %v6172_v42  ;;  %v2531_v46 = vrot.slane %v6560_v2, 4 }
 0x541   :  { %v2406_v26 = vsel %vm354_vm0, %v2405_v12, %v2165_v14  ;;  %v2519_v14 = vrot.slane %v6558_v1, 4  ;;  %v2453_v12 = vrot.slane %v2424_v21, 4 }
 0x542   :  { %v6562_v5 = vpop.trf.xlu2  ;;  %v2412_v23 = vperm.slane %v2406_v26, %v6172_v42  ;;  %v2467_v40 = vrot.slane %v2416_v55, 4  ;;  %v2466_v57 = vsel %vm354_vm0, %v2465_v31, %v2416_v55 }
 0x543   :  { %v6593_v10 = vperm.slane %v2466_v57, %v6189_v60 }
 0x544   :  { %v2455_v54 = vrot.slane %v2412_v23, 4  ;;  %v2468_v53 = vsel %vm354_vm0, %v2428_v19, %v2467_v40  ;;  %v2454_v57 = vsel %vm354_vm0, %v2453_v12, %v2412_v23 }
 0x545   :  { %v2476_v48 = vperm.slane %v2468_v53, %v6189_v60 }
 0x546   :  { %v6564_v43 = vpop.trf.xlu1  ;;  %v2456_v18 = vsel %vm354_vm0, %v2424_v21, %v2455_v54 }
 0x547   :  { %v2293_v47 = vpop.trf.xlu0  ;;  %v2464_v41 = vperm.slane %v2456_v18, %v6189_v60  ;;  %v2520_v26 = vsel %vm354_vm0, %v6564_v43, %v2519_v14  ;;  %v2515_v35 = vrot.slane %v2476_v48, 4  ;;  %v2517_v53 = vrot.slane %v6564_v43, 4 }
 0x548   :  { %v2431_v50 = vrot.slane %v2293_v47, 4  ;;  %v2528_v18 = vperm.slane %v2520_v26, %v6172_v42 }
 0x54a   :  { %v2357_v36 = vpop.trf.xlu2 }
 0x54b   :  { %v2429_v44 = vrot.slane %v2357_v36, 4  ;;  %v2432_v16 = vsel %vm354_vm0, %v2357_v36, %v2431_v50 }
 0x54c   :  { %v2440_v30 = vperm.slane %v2432_v16, %v6172_v42 }
 0x54d   :  { %v2430_v9 = vsel %vm354_vm0, %v2429_v44, %v2293_v47  ;;  %v2532_v47 = vsel %vm354_vm0, %v6562_v5, %v2531_v46  ;;  %v2507_v44 = vrot.slane %v2464_v41, 4 }
 0x54e   :  { %v2325_v24 = vpop.trf.xlu1  ;;  %v2436_v6 = vperm.slane %v2430_v9, %v6172_v42  ;;  %v2491_v17 = vrot.slane %v2440_v30, 4  ;;  %v2540_v31 = vperm.slane %v2532_v47, %v6172_v42 }
 0x54f   :  { %v6571_v33 = vpop.trf.xlu0  ;;  %v2443_v28 = vrot.slane %v2325_v24, 4 }
 0x550   :  { %v2479_v32 = vrot.slane %v2436_v6, 4  ;;  %v2543_v19 = vrot.slane %v6571_v33, 4  ;;  %v2577_v26 = vrot.slane %v2540_v31, 4 }
 0x552   :  { %v2358_v4 = vpop.trf.xlu2 }
 0x553   :  { %v2541_v16 = vrot.slane %v2358_v4, 4  ;;  %v2544_v23 = vsel %vm354_vm0, %v2358_v4, %v2543_v19 }
 0x554   :  { %v2552_v4 = vperm.slane %v2544_v23, %v6172_v42 }
 0x555   :  { %v2542_v47 = vsel %vm354_vm0, %v2541_v16, %v6571_v33 }
 0x556   :  { %v2326_v20 = vpop.trf.xlu1  ;;  %v2548_v33 = vperm.slane %v2542_v47, %v6172_v42 }
 0x557   :  { %v2389_v29 = vpop.trf.xlu0  ;;  %v2555_v61 = vrot.slane %v2326_v20, 4 }
 0x558   :  { %v2441_v45 = vrot.slane %v2389_v29, 4  ;;  %v2444_v58 = vsel %vm354_vm0, %v2389_v29, %v2443_v28  ;;  %v2591_v16 = vrot.slane %v2548_v33, 4 }
 0x559   :  { %v2452_v37 = vperm.slane %v2444_v58, %v6172_v42 }
 0x55a   :  { %v2442_v25 = vsel %vm354_vm0, %v2441_v45, %v2325_v24 }
 0x55b   :  { %v2448_v55 = vperm.slane %v2442_v25, %v6172_v42  ;;  %v2492_v36 = vsel %vm354_vm0, %v2452_v37, %v2491_v17  ;;  %v2489_v54 = vrot.slane %v2452_v37, 4  ;;  %v2460_v25 = vperm.slane %v2454_v57, %v6189_v60 }
 0x55c   :  { %v2500_v50 = vperm.slane %v2492_v36, %v6189_v60 }
 0x55d   :  { %v2477_v24 = vrot.slane %v2448_v55, 4  ;;  %v2480_v40 = vsel %vm354_vm0, %v2448_v55, %v2479_v32  ;;  %v2490_v37 = vsel %vm354_vm0, %v2489_v54, %v2440_v30  ;;  %v2518_v32 = vsel %vm354_vm0, %v2517_v53, %v6558_v1 }
 0x55e   :  { %v2516_v21 = vsel %vm354_vm0, %v2500_v50, %v2515_v35  ;;  %v2513_v9 = vrot.slane %v2500_v50, 4  ;;  %v2488_v28 = vperm.slane %v2480_v40, %v6189_v60  ;;  %v2496_v36 = vperm.slane %v2490_v37, %v6189_v60 }
 0x55f   :  { %2853 = vxpose.xlu0.b32.start.end [1/1] (short) (narrow) %v2516_v21, 8  ;;  %v2390_v46 = vpop.trf.xlu0  ;;  %v2478_v43 = vsel %vm354_vm0, %v2477_v24, %v2436_v6  ;;  %v2578_v6 = vsel %vm354_vm0, %v2577_v26, %v2528_v18  ;;  %v2511_v35 = vrot.slane %v6593_v10, 4  ;;  %v2524_v1 = vperm.slane %v2518_v32, %v6172_v42 }
 0x560   :  { %v2553_v29 = vrot.slane %v2390_v46, 4  ;;  %v2556_v45 = vsel %vm354_vm0, %v2390_v46, %v2555_v61  ;;  %v2514_v58 = vsel %vm354_vm0, %v2513_v9, %v2476_v48  ;;  %v2508_v14 = vsel %vm354_vm0, %v2488_v28, %v2507_v44 }
 0x561   :  { %v2564_v17 = vperm.slane %v2556_v45, %v6172_v42  ;;  %2821 = vxpose.xlu2.b32.start.end [1/1] (short) (narrow) %v2514_v58, 8  ;;  %2725 = vxpose.xlu1.b32.start.end [1/1] (short) (narrow) %v2508_v14, 8  ;;  %v2505_v12 = vrot.slane %v2488_v28, 4  ;;  %v2484_v30 = vperm.slane %v2478_v43, %v6189_v60  ;;  %v2529_v61 = vrot.slane %v6562_v5, 4 }
 0x562   :  { %v2554_v55 = vsel %vm354_vm0, %v2553_v29, %v2326_v20  ;;  %v2503_v44 = vrot.slane %v2460_v25, 4  ;;  %v2512_v24 = vsel %vm354_vm0, %v2496_v36, %v2511_v35  ;;  %v2584_v40 = vperm.slane %v2578_v6, %v6189_v60 }
 0x563   :  { %v2601_v48 = vrot.slane %v2564_v17, 4  ;;  %v2506_v50 = vsel %vm354_vm0, %v2505_v12, %v2464_v41  ;;  %v2560_v20 = vperm.slane %v2554_v55, %v6172_v42  ;;  %v2530_v5 = vsel %vm354_vm0, %v2529_v61, %v6560_v2 }
 0x564   :  { %v2504_v54 = vsel %vm354_vm0, %v2484_v30, %v2503_v44  ;;  %v2567_v21 = vrot.slane %v2524_v1, 4  ;;  %v2579_v9 = vrot.slane %v2528_v18, 4  ;;  %v2623_v53 = vrot.slane %v2584_v40, 4 }
 0x565   :  { %v2602_v19 = vsel %vm354_vm0, %v2601_v48, %v2552_v4  ;;  %v2592_v28 = vsel %vm354_vm0, %v2560_v20, %v2591_v16  ;;  %v2509_v46 = vrot.slane %v2496_v36, 4  ;;  %v2501_v57 = vrot.slane %v2484_v30, 4 }
 0x566   :  { %v2608_v41 = vperm.slane %v2602_v19, %v6189_v60  ;;  %v2536_v29 = vperm.slane %v2530_v5, %v6172_v42  ;;  %v2600_v58 = vperm.slane %v2592_v28, %v6189_v60  ;;  %v2603_v14 = vrot.slane %v2552_v4, 4  ;;  %v7637_v5 = vld [vmem:[#allocation39_spill] sm:$0xff] }
 0x567   :  { %2693 = vxpose.xlu0.b32.start.end [1/1] (short) (narrow) %v2506_v50, 8  ;;  %v2580_v2 = vsel %vm354_vm0, %v2540_v31, %v2579_v9  ;;  %v2510_v18 = vsel %vm354_vm0, %v2509_v46, %v6593_v10  ;;  %v2502_v43 = vsel %vm354_vm0, %v2501_v57, %v2460_v25  ;;  %v2589_v55 = vrot.slane %v2560_v20, 4  ;;  %v7638_v9 = vld [vmem:[#allocation34_spill] sm:$0xff]  ;;  %v7640_v57 = vld [vmem:[#allocation40_spill] sm:$0xff] }
 0x568   :  { %v2624_v45 = vsel %vm354_vm0, %v2608_v41, %v2623_v53  ;;  %v2568_v37 = vsel %vm354_vm0, %v2536_v29, %v2567_v21  ;;  %v2604_v47 = vsel %vm354_vm0, %v2564_v17, %v2603_v14  ;;  %v2617_v12 = vrot.slane %v2600_v58, 4  ;;  %v7639_v53 = vld [vmem:[#allocation37_spill] sm:$0xff] }
 0x569   :  { %2789 = vxpose.xlu1.b32.start.end [1/1] (short) (narrow) %v2512_v24, 8  ;;  %2661 = vxpose.xlu2.b32.start.end [1/1] (short) (narrow) %v2504_v54, 8  ;;  %v2576_v23 = vperm.slane %v2568_v37, %v6189_v60  ;;  %v2588_v26 = vperm.slane %v2580_v2, %v6189_v60  ;;  %v2612_v48 = vperm.slane %v2604_v47, %v6189_v60  ;;  %v2565_v32 = vrot.slane %v2536_v29, 4 }
 0x56a   :  { %v2590_v6 = vsel %vm354_vm0, %v2589_v55, %v2548_v33  ;;  %v7636_v33 = vld [vmem:[#allocation38_spill] sm:$0xff]  ;;  %v1105_v21 = vrot.slane %v7637_v5, 4  ;;  %v1068_v46 = vrot.slane %v7639_v53, 4  ;;  %v1107_v2 = vrot.slane %v7640_v57, 4 }
 0x56b   :  { %v2618_v31 = vsel %vm354_vm0, %v2617_v12, %v2576_v23  ;;  %v2627_v36 = vrot.slane %v2588_v26, 4  ;;  %v2619_v30 = vrot.slane %v2576_v23, 4  ;;  %v2566_v10 = vsel %vm354_vm0, %v2565_v32, %v2524_v1 }
 0x56c   :  { %v2572_v4 = vperm.slane %v2566_v10, %v6189_v60  ;;  %v2625_v61 = vrot.slane %v2612_v48, 4  ;;  %v2596_v50 = vperm.slane %v2590_v6, %v6189_v60  ;;  %v2621_v1 = vrot.slane %v2608_v41, 4  ;;  %v7641_v41 = vld [vmem:[#allocation41_spill] sm:$0xff] }
 0x56d   :  { %v2628_v25 = vsel %vm354_vm0, %v2612_v48, %v2627_v36  ;;  %v2620_v17 = vsel %vm354_vm0, %v2600_v58, %v2619_v30  ;;  %v1081_v16 = vrot.slane %v7636_v33, 4  ;;  %v1106_v29 = vsel %vm354_vm0, %v1105_v21, %v7640_v57  ;;  %v7642_v58 = vld [vmem:[#allocation35_spill] sm:$0xff] }
 0x56e   :  { %v2615_v35 = vrot.slane %v2572_v4, 4  ;;  %v2626_v44 = vsel %vm354_vm0, %v2625_v61, %v2588_v26  ;;  %v2613_v19 = vrot.slane %v2596_v50, 4  ;;  %v2622_v24 = vsel %vm354_vm0, %v2621_v1, %v2584_v40 }
 0x56f   :  { %3045 = vxpose.xlu0.b32.start.end [1/1] (short) (narrow) %v2624_v45, 8  ;;  %v1082_v28 = vsel %vm354_vm0, %v1081_v16, %v7638_v9  ;;  %v1093_v45 = vrot.slane %v7641_v41, 4  ;;  %v1070_v14 = vsel %vm354_vm0, %v1068_v46, %v7642_v58  ;;  %v1112_v37 = vperm.slane %v1106_v29, %v6172_v42 }
 0x570   :  { %v2616_v20 = vsel %vm354_vm0, %v2596_v50, %v2615_v35  ;;  %v2614_v54 = vsel %vm354_vm0, %v2613_v19, %v2572_v4  ;;  %v1088_v40 = vperm.slane %v1082_v28, %v6172_v42  ;;  %v1076_v23 = vperm.slane %v1070_v14, %v6172_v42 }
 0x571   :  { %2757 = vxpose.xlu2.b32.start.end [1/1] (short) (narrow) %v2510_v18, 8  ;;  %2629 = vxpose.xlu1.b32.start.end [1/1] (short) (narrow) %v2502_v43, 8  ;;  %v7643_v18 = vld [vmem:[#allocation36_spill] sm:$0xff]  ;;  %v1141_v12 = vrot.slane %v1112_v37, 4  ;;  %v1071_v48 = vrot.slane %v7642_v58, 4  ;;  %v1108_v32 = vsel %vm354_vm0, %v7637_v5, %v1107_v2  ;;  %v1083_v6 = vrot.slane %v7638_v9, 4 }
 0x572   :  { %v1094_v43 = vsel %vm354_vm0, %v1093_v45, %v7643_v18  ;;  %v1117_v47 = vrot.slane %v1088_v40, 4  ;;  %v1095_v55 = vrot.slane %v7643_v18, 4  ;;  %v1119_v36 = vrot.slane %v1076_v23, 4 }
 0x573   :  { %v1100_v26 = vperm.slane %v1094_v43, %v6172_v42  ;;  %v1116_v30 = vperm.slane %v1108_v32, %v6172_v42  ;;  %v1072_v4 = vsel %vm354_vm0, %v7639_v53, %v1071_v48  ;;  %v1084_v35 = vsel %vm354_vm0, %v7636_v33, %v1083_v6 }
 0x574   :  { %v1096_v10 = vsel %vm354_vm0, %v7641_v41, %v1095_v55  ;;  %v1120_v50 = vsel %vm354_vm0, %v1088_v40, %v1119_v36  ;;  %v1080_v1 = vperm.slane %v1072_v4, %v6172_v42  ;;  %v1092_v21 = vperm.slane %v1084_v35, %v6172_v42 }
 0x575   :  { %v1153_v19 = vrot.slane %v1116_v30, 4  ;;  %v1128_v5 = vperm.slane %v1120_v50, %v6189_v60  ;;  %v3450_v29 = vmul.f32 %v6504_v11, %v6494_v49  ;;  %v3449_v49 = vmul.f32 %v6504_v11, %v6492_v0 }
 0x576   :  { %v1131_v46 = vrot.slane %v1080_v1, 4  ;;  %v1129_v45 = vrot.slane %v1092_v21, 4  ;;  %v6735_v36 = vstv %s5628_s28  ;;  %v3451_v0 = vmul.f32 %v6504_v11, %v6496_v59 }
 0x577   :  { %2949 = vxpose.xlu0.b32.start.end [1/1] (short) (narrow) %v2618_v31, 8  ;;  %v1118_v31 = vsel %vm354_vm0, %v1117_v47, %v1076_v23  ;;  %v1171_v41 = vrot.slane %v1128_v5, 4  ;;  %v3468_v47 = vadd.f32 %v6507_v13, %v3450_v29  ;;  %v3467_v4 = vadd.f32 %v6507_v13, %v3449_v49 }
 0x578   :  { %v6692_v61 = vperm.slane %v1118_v31, %v6189_v60  ;;  %v1132_v40 = vsel %vm354_vm0, %v1092_v21, %v1131_v46  ;;  %v1130_v23 = vsel %vm354_vm0, %v1129_v45, %v1080_v1  ;;  %v6733_v31 = vstv %s5627_s27 }
 0x579   :  { %3109 = vxpose.xlu2.b32.start.end [1/1] (short) (narrow) %v2628_v25, 8  ;;  %2981 = vxpose.xlu1.b32.start.end [1/1] (short) (narrow) %v2620_v17, 8  ;;  %v1142_v25 = vsel %vm354_vm0, %v1141_v12, %v1100_v26  ;;  %v1143_v17 = vrot.slane %v1100_v26, 4  ;;  %v1140_v12 = vperm.slane %v1132_v40, %v6189_v60  ;;  %v1136_v50 = vperm.slane %v1130_v23, %v6189_v60 }
 0x57a   :  { %v1167_v16 = vrot.slane %v6692_v61, 4  ;;  %v3454_v35 = vmul.f32 %v6504_v11, %v6502_v51 }
 0x57b   :  { %v1175_v23 = vrot.slane %v1136_v50, 4 }
 0x57c   :  { %v3472_v46 = vadd.f32 %v6507_v13, %v3454_v35 }
 0x581   :  { %3077 = vxpose.xlu1.b32.start.end [1/1] (short) (narrow) %v2626_v44, 8  ;;  %2917 = vxpose.xlu2.b32.start.end [1/1] (short) (narrow) %v2616_v20, 8  ;;  %v1104_v44 = vperm.slane %v1096_v10, %v6172_v42  ;;  %v6699_v20 = vperm.slane %v1142_v25, %v6189_v60 }
 0x583   :  { %v1155_v33 = vrot.slane %v1104_v44, 4  ;;  %v1168_v9 = vsel %vm354_vm0, %v6699_v20, %v1167_v16  ;;  %v6748_v16 = vstv %s5629_s29  ;;  %v1165_v51 = vrot.slane %v6699_v20, 4 }
 0x584   :  { %v3484_v58 = vmul.f32 %v6509_v56, %v1168_v9  ;;  %v3453_v20 = vmul.f32 %v6504_v11, %v6500_v52  ;;  %v3452_v52 = vmul.f32 %v6504_v11, %v6498_v63 }
 0x585   :  { %v1156_v14 = vsel %vm354_vm0, %v1116_v30, %v1155_v33 }
 0x586   :  { %v1164_v26 = vperm.slane %v1156_v14, %v6189_v60  ;;  %v3470_v35 = vadd.f32 %v6507_v13, %v3452_v52 }
 0x588   :  { %v1177_v45 = vrot.slane %v1164_v26, 4 }
 0x589   :  { %3013 = vxpose.xlu2.b32.start.end [1/1] (short) (narrow) %v2622_v24, 8  ;;  %2885 = vxpose.xlu1.b32.start.end [1/1] (short) (narrow) %v2614_v54, 8  ;;  %v3448_v24 = vmul.f32 %v6504_v11, %v6490_v62  ;;  %v1144_v54 = vsel %vm354_vm0, %v1112_v37, %v1143_v17  ;;  %v1154_v62 = vsel %vm354_vm0, %v1153_v19, %v1104_v44  ;;  %v1179_v44 = vrot.slane %v1140_v12, 4 }
 0x58a   :  { %v1152_v28 = vperm.slane %v1144_v54, %v6189_v60  ;;  %v6721_v37 = vperm.slane %v1154_v62, %v6189_v60  ;;  %v3447_v62 = vmul.f32 %v6504_v11, %v6488_v34 }
 0x58b   :  { %v3466_v57 = vadd.f32 %v6507_v13, %v3448_v24  ;;  %v1180_v21 = vsel %vm354_vm0, %v1164_v26, %v1179_v44 }
 0x58c   :  { %v1169_v2 = vrot.slane %v1152_v28, 4  ;;  %v1172_v18 = vsel %vm354_vm0, %v1152_v28, %v1171_v41  ;;  %v1173_v55 = vrot.slane %v6721_v37, 4  ;;  %v3490_v40 = vmul.f32 %v6509_v56, %v1180_v21 }
 0x58d   :  { %v3500_v43 = vadd.f32 %v3484_v58, %v3466_v57  ;;  %v3486_v48 = vmul.f32 %v6509_v56, %v1172_v18  ;;  %v1166_v18 = vsel %vm354_vm0, %v1165_v51, %v6692_v61  ;;  %v3465_v49 = vadd.f32 %v6507_v13, %v3447_v62 }
 0x58e   :  { %v1170_v32 = vsel %vm354_vm0, %v1169_v2, %v1128_v5  ;;  %v1174_v54 = vsel %vm354_vm0, %v1173_v55, %v1136_v50  ;;  %v3469_v5 = vadd.f32 %v6507_v13, %v3451_v0  ;;  %v3506_v34 = vadd.f32 %v3490_v40, %v3472_v46 }
 0x58f   :  { %v3502_v10 = vadd.f32 %v3486_v48, %v3468_v47  ;;  %v3518_v25 = vadd.f32 %v6733_v31, %v3500_v43  ;;  %v3485_v24 = vmul.f32 %v6509_v56, %v1170_v32  ;;  %v3487_v57 = vmul.f32 %v6509_v56, %v1174_v54 }
 0x590   :  { %v1178_v55 = vsel %vm354_vm0, %v1177_v45, %v1140_v12  ;;  %v3471_v0 = vadd.f32 %v6507_v13, %v3453_v20 }
 0x591   :  { %v3520_v33 = vadd.f32 %v6733_v31, %v3502_v10  ;;  %v3501_v28 = vadd.f32 %v3485_v24, %v3467_v4  ;;  %v3503_v14 = vadd.f32 %v3487_v57, %v3469_v5  ;;  %v3483_v10 = vmul.f32 %v6509_v56, %v1166_v18 }
 0x592   :  { %v3524_v4 = vadd.f32 %v6733_v31, %v3506_v34  ;;  %v3489_v11 = vmul.f32 %v6509_v56, %v1178_v55 }
 0x593   :  { %v3519_v43 = vadd.f32 %v6733_v31, %v3501_v28  ;;  %v3499_v63 = vadd.f32 %v3483_v10, %v3465_v49  ;;  %v3532_v49 = vadd.f32 %v6733_v31, %v6556_v38 }
 0x595   :  { %v3517_v5 = vadd.f32 %v6733_v31, %v3499_v63 }
 0x5fa   :  { %v6711_v53 = vpop.trf.xlu2 }
 0x602   :  { %v2677_v30 = vpop.trf.xlu2 }
 0x603   :  { %v3536_v17 = vmul.f32 %v6735_v36, %v2677_v30  ;;  %v2869_v6 = vpop.trf.xlu0 }
 0x604   :  { %v3542_v61 = vmul.f32 %v6735_v36, %v2869_v6 }
 0x605   :  { %v3552_v1 = vadd.f32 %v3536_v17, %v3518_v25  ;;  %v2741_v19 = vpop.trf.xlu1  ;;  %v3521_v25 = vadd.f32 %v6733_v31, %v3503_v14  ;;  %v1176_v17 = vsel %vm354_vm0, %v6721_v37, %v1175_v23 }
 0x606   :  { %v3538_v59 = vmul.f32 %v6735_v36, %v2741_v19  ;;  %v3558_v44 = vadd.f32 %v3542_v61, %v3524_v4  ;;  %v3505_v19 = vadd.f32 %v3489_v11, %v3471_v0  ;;  %v3488_v54 = vmul.f32 %v6509_v56, %v1176_v17 }
 0x607   :  { %v6754_v9 = vadd.f32 %v6748_v16, %v3552_v1  ;;  %v3529_v61 = vadd.f32 %v6733_v31, %v6539_v7  ;;  %v3531_v4 = vadd.f32 %v6733_v31, %v6551_v15  ;;  %v3525_v15 = vadd.f32 %v6733_v31, %v6515_v8 }
 0x608   :  { %v3554_v29 = vadd.f32 %v3538_v59, %v3520_v33  ;;  %v3541_v59 = vmul.f32 %v6735_v36, %v6711_v53  ;;  %v3504_v13 = vadd.f32 %v3488_v54, %v3470_v35  ;;  %v6804_v46 = vadd.f32 %v6748_v16, %v3558_v44 }
 0x609   :  { %v3589_v41 = vsel %vm3585_vm3, %v6754_v9, -inf  ;;  %v3523_v62 = vadd.f32 %v6733_v31, %v3505_v19  ;;  %v3530_v53 = vadd.f32 %v6733_v31, %v6544_v39 }
 0x60a   :  { %v2773_v58 = vpop.trf.xlu2  ;;  %3590 = vmax.xlane.f32.xlu1 %v3589_v41  ;;  %v6773_v32 = vadd.f32 %v6748_v16, %v3554_v29  ;;  %v3522_v45 = vadd.f32 %v6733_v31, %v3504_v13  ;;  %v3607_v14 = vsel %vm3585_vm3, %v6804_v46, -inf }
 0x60b   :  { %v2709_v2 = vpop.trf.xlu0  ;;  %v3539_v26 = vmul.f32 %v6735_v36, %v2773_v58  ;;  %v3557_v29 = vadd.f32 %v3541_v59, %v3523_v62 }
 0x60c   :  { %v3537_v47 = vmul.f32 %v6735_v36, %v2709_v2  ;;  %v3595_v6 = vsel %vm3585_vm3, %v6773_v32, -inf }
 0x60d   :  { %v2805_v48 = vpop.trf.xlu1  ;;  %v3555_v12 = vadd.f32 %v3539_v26, %v3521_v25  ;;  %v6821_v34 = vadd.f32 %v6748_v16, %v3557_v29 }
 0x60e   :  { %v3553_v30 = vadd.f32 %v3537_v47, %v3519_v43  ;;  %v3540_v56 = vmul.f32 %v6735_v36, %v2805_v48 }
 0x60f   :  { %v6799_v33 = vadd.f32 %v6748_v16, %v3555_v12  ;;  %v3604_v26 = vsel %vm3585_vm3, %v6821_v34, -inf }
 0x610   :  { %v6786_v50 = vadd.f32 %v6748_v16, %v3553_v30  ;;  %v3556_v2 = vadd.f32 %v3540_v56, %v3522_v45  ;;  %v3527_v56 = vadd.f32 %v6733_v31, %v6527_v27  ;;  %v7645_v45 = vld [vmem:[#allocation29_spill] sm:$0xff]  ;;  %v7646_v27 = vld [vmem:[#allocation30_spill] sm:$0xff] }
 0x611   :  { %v3598_v41 = vsel %vm3585_vm3, %v6799_v33, -inf }
 0x612   :  { %v3125_v1 = vpop.trf.xlu2  ;;  %3596 = vmax.xlane.f32.xlu1 %v3595_v6  ;;  %v3592_v37 = vsel %vm3585_vm3, %v6786_v50, -inf  ;;  %v6830_v23 = vadd.f32 %v6748_v16, %v3556_v2 }
 0x613   :  { %3593 = vmax.xlane.f32.xlu2 %v3592_v37  ;;  %v3061_v24 = vpop.trf.xlu0  ;;  %v3550_v43 = vmul.f32 %v6735_v36, %v3125_v1  ;;  %v3528_v37 = vadd.f32 %v6733_v31, %v6532_v22 }
 0x614   :  { %v3548_v51 = vmul.f32 %v6735_v36, %v3061_v24  ;;  %v3601_v38 = vsel %vm3585_vm3, %v6830_v23, -inf }
 0x615   :  { %v2645_v21 = vpop.trf.xlu1  ;;  %v3566_v48 = vadd.f32 %v3550_v43, %v3532_v49 }
 0x616   :  { %v3535_v28 = vmul.f32 %v6735_v36, %v2645_v21  ;;  %v3564_v40 = vadd.f32 %v3548_v51, %v3530_v53 }
 0x617   :  { %v6843_v17 = vadd.f32 %v6748_v16, %v3566_v48 }
 0x618   :  { %v3551_v57 = vadd.f32 %v3535_v28, %v3517_v5  ;;  %v6825_v47 = vadd.f32 %v6748_v16, %v3564_v40  ;;  %v3526_v5 = vadd.f32 %v6733_v31, %v6520_v3  ;;  %v7647_v31 = vld [vmem:[#allocation9_spill] sm:$0xff]  ;;  %v7649_v40 = vld [vmem:[#allocation28_spill] sm:$0xff] }
 0x619   :  { %v3631_v12 = vsel %vm3585_vm3, %v6843_v17, -inf }
 0x61a   :  { %v2933_v58 = vpop.trf.xlu2  ;;  %3599 = vmax.xlane.f32.xlu1 %v3598_v41  ;;  %v6816_v20 = vadd.f32 %v6748_v16, %v3551_v57  ;;  %v3625_v55 = vsel %vm3585_vm3, %v6825_v47, -inf }
 0x61b   :  { %3608 = vmax.xlane.f32.xlu2 %v3607_v14  ;;  %v3544_v19 = vmul.f32 %v6735_v36, %v2933_v58  ;;  %v2965_v51 = vpop.trf.xlu0  ;;  %v7650_v58 = vld [vmem:[#allocation11_spill] sm:$0xff] }
 0x61c   :  { %v3586_v39 = vsel %vm3585_vm3, %v6816_v20, -inf  ;;  %v3545_v28 = vmul.f32 %v6735_v36, %v2965_v51 }
 0x61d   :  { %v2997_v18 = vpop.trf.xlu1  ;;  %3587 = vmax.xlane.f32.xlu0 %v3586_v39  ;;  %v3560_v8 = vadd.f32 %v3544_v19, %v3526_v5 }
 0x61e   :  { %v3546_v6 = vmul.f32 %v6735_v36, %v2997_v18  ;;  %v3561_v53 = vadd.f32 %v3545_v28, %v3527_v56 }
 0x61f   :  { %v6878_v62 = vadd.f32 %v6748_v16, %v3560_v8 }
 0x620   :  { %v3562_v54 = vadd.f32 %v3546_v6, %v3528_v37  ;;  %v6887_v29 = vadd.f32 %v6748_v16, %v3561_v53 }
 0x621   :  { %v3613_v57 = vsel %vm3585_vm3, %v6878_v62, -inf }
 0x622   :  { %v3029_v52 = vpop.trf.xlu2  ;;  %3605 = vmax.xlane.f32.xlu1 %v3604_v26  ;;  %v6874_v22 = vadd.f32 %v6748_v16, %v3562_v54  ;;  %v3616_v41 = vsel %vm3585_vm3, %v6887_v29, -inf }
 0x623   :  { %v3547_v30 = vmul.f32 %v6735_v36, %v3029_v52  ;;  %3626 = vmax.xlane.f32.xlu2 %v3625_v55 }
 0x624   :  { %v3619_v3 = vsel %vm3585_vm3, %v6874_v22, -inf }
 0x625   :  { %v3563_v10 = vadd.f32 %v3547_v30, %v3529_v61  ;;  %v3093_v0 = vpop.trf.xlu1  ;;  %3602 = vmax.xlane.f32.xlu0 %v3601_v38 }
 0x626   :  { %v3549_v25 = vmul.f32 %v6735_v36, %v3093_v0 }
 0x627   :  { %v6848_v63 = vadd.f32 %v6748_v16, %v3563_v10 }
 0x628   :  { %v3565_v7 = vadd.f32 %v3549_v25, %v3531_v4 }
 0x629   :  { %v3622_v11 = vsel %vm3585_vm3, %v6848_v63, -inf }
 0x62a   :  { %3623 = vmax.xlane.f32.xlu1 %v3622_v11  ;;  %v6856_v44 = vadd.f32 %v6748_v16, %v3565_v7 }
 0x62b   :  { %3632 = vmax.xlane.f32.xlu2 %v3631_v12 }
 0x62c   :  { %v3628_v59 = vsel %vm3585_vm3, %v6856_v44, -inf }
 0x62d   :  { %v2901_v35 = vpop.trf.xlu1 }
 0x62e   :  { %v3543_v1 = vmul.f32 %v6735_v36, %v2901_v35  ;;  %v7644_v36 = vld [vmem:[#allocation27_spill] sm:$0xff] }
 0x630   :  { %v3559_v24 = vadd.f32 %v3543_v1, %v3525_v15 }
 0x632   :  { %3629 = vmax.xlane.f32.xlu1 %v3628_v59  ;;  %v6869_v21 = vadd.f32 %v6748_v16, %v3559_v24  ;;  %v7648_v16 = vld [vmem:[#allocation26_spill] sm:$0xff] }
 0x634   :  { %v3610_v13 = vsel %vm3585_vm3, %v6869_v21, -inf }
 0x635   :  { %3611 = vmax.xlane.f32.xlu0 %v3610_v13 }
 0x63a   :  { %3620 = vmax.xlane.f32.xlu1 %v3619_v3 }
 0x63d   :  { %3614 = vmax.xlane.f32.xlu0 %v3613_v57 }
 0x643   :  { %3842 = vrot.lane.b32.xlu2 %v7644_v36, %s5889_s30 }
 0x645   :  { %3617 = vmax.xlane.f32.xlu0 %v3616_v41 }
 0x64b   :  { %3905 = vrot.lane.b32.xlu2 %v7645_v45, %s5889_s30 }
 0x653   :  { %3968 = vrot.lane.b32.xlu2 %v7646_v27, %s5889_s30 }
 0x659   :  { %3778 = vrot.lane.b32.xlu0 %v7647_v31, %s5889_s30 }
 0x661   :  { %3800 = vrot.lane.b32.xlu0 %v7648_v16, %s5889_s30 }
 0x669   :  { %3863 = vrot.lane.b32.xlu0 %v7649_v40, %s5889_s30 }
 0x671   :  { %3926 = vrot.lane.b32.xlu0 %v7650_v58, %s5889_s30 }
 0x67d   :  { %v3591_v14 = vpop.xlane.xlu1 %3590 }
 0x67e   :  { %v3635_v61 = vsub.f32 %v6754_v9, %v3591_v14 }
 0x680   :  { %v3652_v10 = vmul.f32 1.442695, %v3635_v61 }
 0x685   :  { %v3597_v2 = vpop.xlane.xlu1 %3596 }
 0x686   :  { %v3637_v39 = vsub.f32 %v6773_v32, %v3597_v2  ;;  %v3594_v18 = vpop.xlane.xlu2 %3593 }
 0x687   :  { %v3636_v35 = vsub.f32 %v6786_v50, %v3594_v18 }
 0x688   :  { %v3656_v43 = vmul.f32 1.442695, %v3637_v39 }
 0x689   :  { %v3654_v24 = vmul.f32 1.442695, %v3636_v35 }
 0x68a   :  { %5792 = vpow2.f32 %v3656_v43 }
 0x68d   :  { %v3600_v49 = vpop.xlane.xlu1 %3599 }
 0x68e   :  { %v3609_v26 = vpop.xlane.xlu2 %3608  ;;  %v3638_v9 = vsub.f32 %v6799_v33, %v3600_v49 }
 0x68f   :  { %v3641_v48 = vsub.f32 %v6804_v46, %v3609_v26 }
 0x690   :  { %v6907_v52 = vpop.eup %5792  ;;  %v3588_v55 = vpop.xlane.xlu0 %3587  ;;  %v3658_v1 = vmul.f32 1.442695, %v3638_v9 }
 0x691   :  { %v3664_v30 = vmul.f32 1.442695, %v3641_v48  ;;  %v3691_v38 = vsel %vm3585_vm3, %v6907_v52, 0.0  ;;  %v3634_v4 = vsub.f32 %v6816_v20, %v3588_v55 }
 0x692   :  { %3692 = vadd.xlane.f32.xlu2 %v3691_v38 }
 0x693   :  { %5794 = vpow2.f32 %v3664_v30 }
 0x694   :  { %5796 = vpow2.f32 %v3652_v10 }
 0x695   :  { %v3606_v32 = vpop.xlane.xlu1 %3605 }
 0x696   :  { %v3640_v0 = vsub.f32 %v6821_v34, %v3606_v32  ;;  %v3627_v25 = vpop.xlane.xlu2 %3626  ;;  %v3650_v34 = vmul.f32 1.442695, %v3634_v4 }
 0x697   :  { %v3647_v33 = vsub.f32 %v6825_v47, %v3627_v25 }
 0x698   :  { %v3662_v7 = vmul.f32 1.442695, %v3640_v0  ;;  %v3603_v46 = vpop.xlane.xlu0 %3602 }
 0x699   :  { %v6914_v11 = vpop.eup %5794  ;;  %v3639_v12 = vsub.f32 %v6830_v23, %v3603_v46  ;;  %v3676_v8 = vmul.f32 1.442695, %v3647_v33 }
 0x69a   :  { %5798 = vpow2.f32 %v3662_v7  ;;  %v3703_v6 = vsel %vm3585_vm3, %v6914_v11, 0.0  ;;  %v6921_v19 = vpop.eup %5796 }
 0x69b   :  { %v3660_v15 = vmul.f32 1.442695, %v3639_v12  ;;  %3704 = vadd.xlane.f32.xlu0 %v3703_v6  ;;  %v3685_v50 = vsel %vm3585_vm3, %v6921_v19, 0.0 }
 0x69d   :  { %5800 = vpow2.f32 %v3660_v15  ;;  %v3624_v20 = vpop.xlane.xlu1 %3623 }
 0x69e   :  { %v3633_v37 = vpop.xlane.xlu2 %3632  ;;  %5802 = vpow2.f32 %v3650_v34  ;;  %v3646_v27 = vsub.f32 %v6848_v63, %v3624_v20 }
 0x69f   :  { %5804 = vpow2.f32 %v3658_v1  ;;  %v3649_v5 = vsub.f32 %v6843_v17, %v3633_v37 }
 0x6a0   :  { %v6923_v54 = vpop.eup %5798  ;;  %5806 = vpow2.f32 %v3654_v24  ;;  %v3674_v14 = vmul.f32 1.442695, %v3646_v27 }
 0x6a1   :  { %v3700_v23 = vsel %vm3585_vm3, %v6923_v54, 0.0  ;;  %v3680_v53 = vmul.f32 1.442695, %v3649_v5  ;;  %5808 = vpow2.f32 %v3676_v8 }
 0x6a2   :  { %3701 = vadd.xlane.f32.xlu2 %v3700_v23 }
 0x6a3   :  { %v6930_v59 = vpop.eup %5800  ;;  %3686 = vadd.xlane.f32.xlu0 %v3685_v50 }
 0x6a4   :  { %v3697_v13 = vsel %vm3585_vm3, %v6930_v59, 0.0  ;;  %v6935_v51 = vpop.eup %5802 }
 0x6a5   :  { %v3630_v47 = vpop.xlane.xlu1 %3629  ;;  %3698 = vadd.xlane.f32.xlu1 %v3697_v13  ;;  %v6938_v56 = vpop.eup %5804  ;;  %v3682_v45 = vsel %vm3585_vm3, %v6935_v51, 0.0 }
 0x6a6   :  { %v3648_v28 = vsub.f32 %v6856_v44, %v3630_v47  ;;  %v3843_v3 = vpop.permute.xlu2 %3842  ;;  %v6941_v41 = vpop.eup %5806  ;;  %v3694_v44 = vsel %vm3585_vm3, %v6938_v56, 0.0 }
 0x6a7   :  { %v3848_v57 = vsel %vm3783_vm4, %v3843_v3, 0  ;;  %v3688_v31 = vsel %vm3585_vm3, %v6941_v41, 0.0  ;;  %v6950_v40 = vpop.eup %5808 }
 0x6a8   :  { %v3678_v17 = vmul.f32 1.442695, %v3648_v28  ;;  %v3612_v36 = vpop.xlane.xlu0 %3611  ;;  %3857 = vmatpush.bf16.msra.mxu3 %v3848_v57  ;;  %v3721_v49 = vsel %vm3585_vm3, %v6950_v40, 0.0 }
 0x6aa   :  { %5810 = vpow2.f32 %v3678_v17  ;;  %3683 = vadd.xlane.f32.xlu2 %v3682_v45 }
 0x6ab   :  { %5812 = vpow2.f32 %v3680_v53  ;;  %3695 = vadd.xlane.f32.xlu0 %v3694_v44 }
 0x6ad   :  { %v3621_v16 = vpop.xlane.xlu1 %3620  ;;  %3689 = vadd.xlane.f32.xlu1 %v3688_v31 }
 0x6ae   :  { %v3645_v58 = vsub.f32 %v6874_v22, %v3621_v16  ;;  %v3642_v22 = vsub.f32 %v6869_v21, %v3612_v36  ;;  %v6990_v24 = vpop.permute.xlu2 %3905 }
 0x6b0   :  { %v6953_v2 = vpop.eup %5810  ;;  %v3672_v39 = vmul.f32 1.442695, %v3645_v58  ;;  %v3615_v18 = vpop.xlane.xlu0 %3614  ;;  %v3666_v61 = vmul.f32 1.442695, %v3642_v22 }
 0x6b1   :  { %v6955_v43 = vpop.eup %5812  ;;  %v3643_v63 = vsub.f32 %v6878_v62, %v3615_v18  ;;  %v3724_v26 = vsel %vm3585_vm3, %v6953_v2, 0.0 }
 0x6b2   :  { %5814 = vpow2.f32 %v3672_v39  ;;  %3722 = vadd.xlane.f32.xlu2 %v3721_v49  ;;  %v3727_v55 = vsel %vm3585_vm3, %v6955_v43, 0.0 }
 0x6b3   :  { %5816 = vpow2.f32 %v3674_v14  ;;  %3725 = vadd.xlane.f32.xlu0 %v3724_v26  ;;  %v3668_v48 = vmul.f32 1.442695, %v3643_v63 }
 0x6b5   :  { %3728 = vadd.xlane.f32.xlu1 %v3727_v55  ;;  %5818 = vpow2.f32 %v3668_v48 }
 0x6b6   :  { %5820 = vpow2.f32 %v3666_v61  ;;  %v6992_v33 = vpop.permute.xlu2 %3968 }
 0x6b8   :  { %v6965_v30 = vpop.eup %5814  ;;  %v3618_v62 = vpop.xlane.xlu0 %3617 }
 0x6b9   :  { %v6967_v38 = vpop.eup %5816  ;;  %v3644_v10 = vsub.f32 %v6887_v29, %v3618_v62  ;;  %v3715_v32 = vsel %vm3585_vm3, %v6965_v30, 0.0 }
 0x6ba   :  { %3716 = vadd.xlane.f32.xlu2 %v3715_v32  ;;  %v3718_v0 = vsel %vm3585_vm3, %v6967_v38, 0.0 }
 0x6bb   :  { %v3670_v21 = vmul.f32 1.442695, %v3644_v10  ;;  %v6974_v25 = vpop.eup %5818 }
 0x6bc   :  { %v6976_v4 = vpop.eup %5820  ;;  %v3709_v7 = vsel %vm3585_vm3, %v6974_v25, 0.0 }
 0x6bd   :  { %5822 = vpow2.f32 %v3670_v21  ;;  %3719 = vadd.xlane.f32.xlu1 %v3718_v0  ;;  %v3706_v46 = vsel %vm3585_vm3, %v6976_v4, 0.0 }
 0x6c2   :  { %3710 = vadd.xlane.f32.xlu2 %v3709_v7 }
 0x6c3   :  { %v6980_v29 = vpop.eup %5822 }
 0x6c4   :  { %v3712_v9 = vsel %vm3585_vm3, %v6980_v29, 0.0 }
 0x6c5   :  { %3707 = vadd.xlane.f32.xlu1 %v3706_v46  ;;  %3713 = vadd.xlane.f32.xlu0 %v3712_v9 }
 0x6cb   :  { %v3779_v12 = vpop.permute.xlu0 %3778 }
 0x6cc   :  { %v3785_v6 = vsel %vm3783_vm4, %v3779_v12, 0 }
 0x6cd   :  { %3794 = vmatpush.bf16.msra.mxu0 %v3785_v6 }
 0x6d3   :  { %v3801_v35 = vpop.permute.xlu0 %3800 }
 0x6d4   :  { %v3806_v15 = vsel %vm3783_vm4, %v3801_v35, 0 }
 0x6d5   :  { %3815 = vmatpush.bf16.msra.mxu1 %v3806_v15 }
 0x6db   :  { %v3864_v34 = vpop.permute.xlu0 %3863 }
 0x6dc   :  { %v3869_v1 = vsel %vm3783_vm4, %v3864_v34, 0 }
 0x6dd   :  { %3878 = vmatpush.bf16.msrb.mxu0 %v3869_v1 }
 0x6e3   :  { %v3927_v20 = vpop.permute.xlu0 %3926 }
 0x6e4   :  { %v3932_v37 = vsel %vm3783_vm4, %v3927_v20, 0 }
 0x6e5   :  { %3941 = vmatpush.bf16.msrb.mxu3 %v3932_v37 }
 0x705   :  { %v3693_v23 = vpop.xlane.xlu2 %3692 }
 0x706   :  { %5824 = vrcp.f32 %v3693_v23 }
 0x70c   :  { %v5825_v50 = vpop.eup %5824 }
 0x70d   :  { %v3749_v5 = vmul.f32 %v5825_v50, %v6907_v52 }
 0x70e   :  { %v3705_v8 = vpop.xlane.xlu0 %3704 }
 0x70f   :  { %v3765_v13 = vpack.c.bf16 %v3749_v5, %v3749_v5  ;;  %5826 = vrcp.f32 %v3705_v8 }
 0x711   :  { %5633 = vmatmul.msk.bf16.vlgmr.msra.gmra.mxu3 %vm3585_vm3, %v3765_v13 }
 0x715   :  { %v3702_v47 = vpop.xlane.xlu2 %3701  ;;  %v5827_v3 = vpop.eup %5826 }
 0x716   :  { %5828 = vrcp.f32 %v3702_v47  ;;  %v3687_v28 = vpop.xlane.xlu0 %3686  ;;  %v3753_v57 = vmul.f32 %v5827_v3, %v6914_v11 }
 0x717   :  { %5830 = vrcp.f32 %v3687_v28 }
 0x718   :  { %v3699_v53 = vpop.xlane.xlu1 %3698  ;;  %v3769_v31 = vpack.c.bf16 %v3753_v57, %v3753_v57  ;;  %v7653_v57 = vld [vmem:[#allocation10_spill] sm:$0xff] }
 0x719   :  { %5832 = vrcp.f32 %v3699_v53  ;;  %v7652_v53 = vld [vmem:[#allocation19_spill] sm:$0xff] }
 0x71c   :  { %v5829_v17 = vpop.eup %5828 }
 0x71d   :  { %v5831_v36 = vpop.eup %5830  ;;  %v3752_v45 = vmul.f32 %v5829_v17, %v6923_v54  ;;  %v3684_v44 = vpop.xlane.xlu2 %3683 }
 0x71e   :  { %v3747_v52 = vmul.f32 %v5831_v36, %v6921_v19  ;;  %5834 = vrcp.f32 %v3684_v44  ;;  %v3696_v27 = vpop.xlane.xlu0 %3695  ;;  %v7654_v44 = vld [vmem:[#allocation23_spill] sm:$0xff] }
 0x71f   :  { %v6999_v16 = vpack.c.bf16 %v3752_v45, %v3752_v45  ;;  %5836 = vrcp.f32 %v3696_v27  ;;  %v5833_v39 = vpop.eup %5832 }
 0x720   :  { %v3763_v58 = vpack.c.bf16 %v3747_v52, %v3747_v52  ;;  %v3690_v14 = vpop.xlane.xlu1 %3689  ;;  %v3751_v19 = vmul.f32 %v5833_v39, %v6930_v59  ;;  %v7655_v52 = vld [vmem:[#allocation13_spill] sm:$0xff]  ;;  %v7657_v39 = vld [vmem:[#allocation20_spill] sm:$0xff] }
 0x721   :  { %5740 = vxpose.binary.xlu2.c.b16.start.end [1/2] (short) (narrow) %v3769_v31, %v6999_v16, 16  ;;  %5838 = vrcp.f32 %v3690_v14 }
 0x722   :  { %5637 = vmatmul.msk.bf16.vlgmr.msrb.gmra.mxu3 %vm3585_vm3, %v3769_v31  ;;  %5631 = vmatmul.msk.bf16.vlgmr.msra.gmra.mxu1 %vm3585_vm3, %v3763_v58  ;;  %v7007_v62 = vpack.c.bf16 %v3751_v19, %v3751_v19  ;;  %v7659_v19 = vld [vmem:[#allocation32_spill] sm:$0xff] }
 0x724   :  { %v5835_v11 = vpop.eup %5834 }
 0x725   :  { %v5837_v54 = vpop.eup %5836  ;;  %v3746_v18 = vmul.f32 %v5835_v11, %v6935_v51  ;;  %v3723_v63 = vpop.xlane.xlu2 %3722  ;;  %v7658_v11 = vld [vmem:[#allocation31_spill] sm:$0xff] }
 0x726   :  { %v3750_v49 = vmul.f32 %v5837_v54, %v6938_v56  ;;  %v3726_v22 = vpop.xlane.xlu0 %3725 }
 0x727   :  { %v3762_v26 = vpack.c.bf16 %v3746_v18, %v3746_v18  ;;  %v5839_v48 = vpop.eup %5838  ;;  %5840 = vrcp.f32 %v3726_v22 }
 0x728   :  { %v3766_v55 = vpack.c.bf16 %v3750_v49, %v3750_v49  ;;  %v3729_v61 = vpop.xlane.xlu1 %3728  ;;  %v3748_v10 = vmul.f32 %v5839_v48, %v6941_v41 }
 0x729   :  { %5630 = vmatmul.msk.bf16.vlgmr.msra.gmra.mxu0 %vm3585_vm3, %v3762_v26  ;;  %5842 = vrcp.f32 %v3729_v61 }
 0x72a   :  { %5749 = vxpose.binary.xlu1.c.b16.start.end [1/2] (short) (narrow) %v3763_v58, %v3762_v26, 16  ;;  %5844 = vrcp.f32 %v3723_v63  ;;  %v7012_v51 = vpack.c.bf16 %v3748_v10, %v3748_v10  ;;  %v7656_v58 = vld [vmem:[#allocation17_spill] sm:$0xff] }
 0x72b   :  { %5743 = vxpose.binary.xlu0.c.b16.start.end [1/2] (short) (narrow) %v7007_v62, %v3766_v55, 16 }
 0x72d   :  { %v3717_v59 = vpop.xlane.xlu2 %3716  ;;  %v5841_v56 = vpop.eup %5840 }
 0x72e   :  { %v3760_v7 = vmul.f32 %v5841_v56, %v6953_v2 }
 0x72f   :  { %v5843_v21 = vpop.eup %5842 }
 0x730   :  { %v3720_v32 = vpop.xlane.xlu1 %3719  ;;  %v5845_v0 = vpop.eup %5844  ;;  %v3761_v46 = vmul.f32 %v5843_v21, %v6955_v43  ;;  %v7019_v35 = vpack.c.bf16 %v3760_v7, %v3760_v7 }
 0x731   :  { %5846 = vrcp.f32 %v3720_v32  ;;  %5746 = vxpose.binary.xlu2.c.b16.start.end [1/2] (short) (narrow) %v3765_v13, %v7012_v51, 16  ;;  %v3759_v41 = vmul.f32 %v5845_v0, %v6950_v40 }
 0x732   :  { %v7021_v15 = vpack.c.bf16 %v3761_v46, %v3761_v46  ;;  %5848 = vrcp.f32 %v3717_v59 }
 0x733   :  { %v7028_v43 = vpack.c.bf16 %v3759_v41, %v3759_v41 }
 0x735   :  { %v3711_v34 = vpop.xlane.xlu2 %3710 }
 0x737   :  { %v5847_v9 = vpop.eup %5846 }
 0x738   :  { %v3758_v12 = vmul.f32 %v5847_v9, %v6967_v38  ;;  %v3714_v6 = vpop.xlane.xlu0 %3713  ;;  %v3708_v1 = vpop.xlane.xlu1 %3707 }
 0x739   :  { %5634 = vmatmul.msk.bf16.vlgmr.msrb.gmra.mxu0 %vm3585_vm3, %v3766_v55  ;;  %5850 = vrcp.f32 %v3714_v6  ;;  %v5849_v40 = vpop.eup %5848 }
 0x73a   :  { %5752 = vxpose.binary.xlu1.c.b16.start.end [1/2] (short) (narrow) %v7021_v15, %v7019_v35, 16  ;;  %v7026_v2 = vpack.c.bf16 %v3758_v12, %v3758_v12  ;;  %5852 = vrcp.f32 %v3711_v34  ;;  %v3757_v23 = vmul.f32 %v5849_v40, %v6965_v30 }
 0x73b   :  { %5854 = vrcp.f32 %v3708_v1 }
 0x73c   :  { %5755 = vxpose.binary.xlu0.c.b16.start.end [1/2] (short) (narrow) %v7028_v43, %v7026_v2, 16  ;;  %v7038_v47 = vpack.c.bf16 %v3757_v23, %v3757_v23 }
 0x73f   :  { %v5851_v38 = vpop.eup %5850 }
 0x740   :  { %v5853_v20 = vpop.eup %5852  ;;  %v3756_v50 = vmul.f32 %v5851_v38, %v6980_v29 }
 0x741   :  { %v5855_v37 = vpop.eup %5854  ;;  %v3755_v5 = vmul.f32 %v5853_v20, %v6974_v25  ;;  %v7651_v25 = vld [vmem:[#allocation15_spill] sm:$0xff] }
 0x742   :  { %v3754_v8 = vmul.f32 %v5855_v37, %v6976_v4  ;;  %v7036_v13 = vpack.c.bf16 %v3756_v50, %v3756_v50 }
 0x743   :  { %v7044_v3 = vpack.c.bf16 %v3755_v5, %v3755_v5 }
 0x744   :  { %v7042_v28 = vpack.c.bf16 %v3754_v8, %v3754_v8 }
 0x74a   :  { %5761 = vxpose.binary.xlu1.c.b16.start.end [1/2] (short) (narrow) %v7038_v47, %v7036_v13, 16 }
 0x74c   :  { %5758 = vxpose.binary.xlu0.c.b16.start.end [1/2] (short) (narrow) %v7044_v3, %v7042_v28, 16 }
 0x794   :  { %v7048_v30 = vpop.f32.mrf.mxu3 }
 0x79a   :  { %3989 = vrot.lane.b32.xlu2 %v7651_v25, %s5889_s30 }
 0x79c   :  { %v3861_v4 = vpop.f32.mrf.mxu3 }
 0x79f   :  { %v7052_v29 = vpop.f32.mrf.mxu1 }
 0x7a2   :  { %4094 = vrot.lane.b32.xlu2 %v7652_v53, %s5889_s30 }
 0x7a4   :  { %3821 = vrot.lane.b32.xlu1 %v7653_v57, %s5889_s30 }
 0x7a5   :  { %v7058_v17 = vpop.f32.mrf.mxu3 }
 0x7a6   :  { %v7060_v36 = vpop.f32.mrf.mxu0 }
 0x7a7   :  { %v3819_v45 = vpop.f32.mrf.mxu1 }
 0x7aa   :  { %4031 = vrot.lane.b32.xlu2 %v7654_v44, %s5889_s30 }
 0x7ac   :  { %3884 = vrot.lane.b32.xlu1 %v7655_v52, %s5889_s30 }
 0x7ad   :  { %v3945_v27 = vpop.f32.mrf.mxu3 }
 0x7ae   :  { %v3798_v31 = vpop.f32.mrf.mxu0 }
 0x7b4   :  { %3947 = vrot.lane.b32.xlu1 %v7656_v58, %s5889_s30 }
 0x7b6   :  { %v7068_v14 = vpop.f32.mrf.mxu0 }
 0x7ba   :  { %4010 = vrot.lane.b32.xlu0 %v7657_v39, %s5889_s30 }
 0x7bc   :  { %4073 = vrot.lane.b32.xlu1 %v7658_v11, %s5889_s30 }
 0x7be   :  { %v3882_v54 = vpop.f32.mrf.mxu0 }
 0x7c2   :  { %4052 = vrot.lane.b32.xlu0 %v7659_v19, %s5889_s30  ;;  %v5741_v18 = vpop.trf.xlu2 }
 0x7c3   :  { %v4377_v59 = vrot.slane %v5741_v18, 4 }
 0x7ca   :  { %v5742_v26 = vpop.trf.xlu2 }
 0x7cb   :  { %v4433_v21 = vrot.slane %v5742_v26, 4 }
 0x7d2   :  { %v5747_v55 = vpop.trf.xlu2 }
 0x7d3   :  { %v4378_v46 = vsel %vm354_vm0, %v4377_v59, %v5747_v55 }
 0x7d4   :  { %v4382_v6 = vperm.slane %v4378_v46, %v6172_v42 }
 0x7d6   :  { %v5750_v63 = vpop.trf.xlu1  ;;  %v4395_v50 = vrot.slane %v4382_v6, 4 }
 0x7d7   :  { %v5744_v49 = vpop.trf.xlu0 }
 0x7d8   :  { %v4371_v56 = vrot.slane %v5744_v49, 4 }
 0x7da   :  { %v5748_v0 = vpop.trf.xlu2  ;;  %v4372_v9 = vsel %vm354_vm0, %v4371_v56, %v5750_v63 }
 0x7db   :  { %v4434_v12 = vsel %vm354_vm0, %v4433_v21, %v5748_v0  ;;  %v4376_v34 = vperm.slane %v4372_v9, %v6172_v42 }
 0x7dc   :  { %v4438_v38 = vperm.slane %v4434_v12, %v6172_v42 }
 0x7dd   :  { %v4397_v4 = vrot.slane %v4376_v34, 4  ;;  %v4396_v52 = vsel %vm354_vm0, %v4395_v50, %v4376_v34 }
 0x7de   :  { %v5751_v22 = vpop.trf.xlu1  ;;  %v4451_v57 = vrot.slane %v4438_v38, 4  ;;  %v4402_v63 = vperm.slane %v4396_v52, %v6189_v60 }
 0x7df   :  { %v5745_v48 = vpop.trf.xlu0  ;;  %v4398_v58 = vsel %vm354_vm0, %v4382_v6, %v4397_v4 }
 0x7e0   :  { %v4427_v41 = vrot.slane %v5745_v48, 4 }
 0x7e2   :  { %v4428_v1 = vsel %vm354_vm0, %v4427_v41, %v5751_v22  ;;  %v4406_v22 = vperm.slane %v4398_v58, %v6189_v60 }
 0x7e3   :  { %v4432_v5 = vperm.slane %v4428_v1, %v6172_v42 }
 0x7e4   :  { %v4425_v41 = vrot.slane %v4406_v22, 4 }
 0x7e5   :  { %v4453_v27 = vrot.slane %v4432_v5, 4  ;;  %v4452_v11 = vsel %vm354_vm0, %v4451_v57, %v4432_v5 }
 0x7e6   :  { %v5753_v61 = vpop.trf.xlu1 }
 0x7e7   :  { %v4389_v40 = vrot.slane %v5753_v61, 4  ;;  %v4454_v48 = vsel %vm354_vm0, %v4438_v38, %v4453_v27 }
 0x7e8   :  { %v5756_v10 = vpop.trf.xlu0  ;;  %v4462_v46 = vperm.slane %v4454_v48, %v6189_v60 }
 0x7e9   :  { %v4383_v37 = vrot.slane %v5756_v10, 4  ;;  %v4458_v10 = vperm.slane %v4452_v11, %v6189_v60 }
 0x7eb   :  { %v4477_v6 = vrot.slane %v4458_v10, 4 }
 0x7ee   :  { %v5754_v32 = vpop.trf.xlu1 }
 0x7ef   :  { %v4445_v39 = vrot.slane %v5754_v32, 4 }
 0x7f0   :  { %v5757_v7 = vpop.trf.xlu0 }
 0x7f1   :  { %v4439_v49 = vrot.slane %v5757_v7, 4  ;;  %v4421_v7 = vrot.slane %v4402_v63, 4 }
 0x7f6   :  { %v5762_v20 = vpop.trf.xlu1 }
 0x7f7   :  { %v4390_v23 = vsel %vm354_vm0, %v4389_v40, %v5762_v20  ;;  %v4481_v20 = vrot.slane %v4462_v46, 4 }
 0x7f8   :  { %v4394_v8 = vperm.slane %v4390_v23, %v6172_v42  ;;  %v5759_v25 = vpop.trf.xlu0 }
 0x7f9   :  { %v4384_v53 = vsel %vm354_vm0, %v4383_v37, %v5759_v25 }
 0x7fa   :  { %v4407_v45 = vrot.slane %v4394_v8, 4  ;;  %v4388_v44 = vperm.slane %v4384_v53, %v6172_v42 }
 0x7fc   :  { %v4409_v31 = vrot.slane %v4388_v44, 4  ;;  %v4408_v54 = vsel %vm354_vm0, %v4407_v45, %v4388_v44 }
 0x7fd   :  { %v4414_v59 = vperm.slane %v4408_v54, %v6189_v60 }
 0x7fe   :  { %v4410_v19 = vsel %vm354_vm0, %v4394_v8, %v4409_v31  ;;  %v5763_v18 = vpop.trf.xlu1 }
 0x7ff   :  { %v4446_v26 = vsel %vm354_vm0, %v4445_v39, %v5763_v18  ;;  %v4418_v56 = vperm.slane %v4410_v19, %v6189_v60  ;;  %v4422_v34 = vsel %vm354_vm0, %v4414_v59, %v4421_v7 }
 0x800   :  { %v4450_v55 = vperm.slane %v4446_v26, %v6172_v42  ;;  %v5760_v61 = vpop.trf.xlu0  ;;  %v4495_v5 = vshrl.u32 %v4422_v34, 16  ;;  %v4419_v26 = vrot.slane %v4414_v59, 4 }
 0x801   :  { %v4440_v32 = vsel %vm354_vm0, %v4439_v49, %v5760_v61  ;;  %v4423_v1 = vrot.slane %v4418_v56, 4  ;;  %v4426_v50 = vsel %vm354_vm0, %v4418_v56, %v4425_v41  ;;  %v3990_v49 = vpop.permute.xlu2 %3989 }
 0x802   :  { %v4463_v21 = vrot.slane %v4450_v55, 4  ;;  %v4444_v0 = vperm.slane %v4440_v32, %v6172_v42  ;;  %v4511_v44 = vshrl.u32 %v4426_v50, 16  ;;  %v4420_v48 = vsel %vm354_vm0, %v4419_v26, %v4402_v63  ;;  %v73_v63 = vld [vmem:[%s7553_s2] sm:$0xf] }
 0x803   :  { %v4424_v53 = vsel %vm354_vm0, %v4423_v1, %v4406_v22  ;;  %v3911_v32 = vsel %vm3783_vm4, %v6990_v24, 0  ;;  %v3995_v41 = vsel %vm3783_vm4, %v3990_v49, 0 }
 0x804   :  { %v4464_v9 = vsel %vm354_vm0, %v4463_v21, %v4444_v0  ;;  %v4465_v12 = vrot.slane %v4444_v0, 4  ;;  %v4503_v39 = vshrl.u32 %v4424_v53, 16  ;;  %v4487_v21 = vshrl.u32 %v4420_v48, 16 }
 0x805   :  { %v4470_v40 = vperm.slane %v4464_v9, %v6189_v60  ;;  %v75_v9 = vld [vmem:[%s7553_s2 + $0x8] sm:$0xf] }
 0x806   :  { %v4466_v38 = vsel %vm354_vm0, %v4450_v55, %v4465_v12  ;;  %v3974_v12 = vsel %vm3783_vm4, %v6992_v33, 0  ;;  %v80_v33 = vld [vmem:[%s7553_s2 + $0x1c] sm:$0xf] }
 0x807   :  { %v4474_v37 = vperm.slane %v4466_v38, %v6189_v60  ;;  %v4478_v23 = vsel %vm354_vm0, %v4470_v40, %v4477_v6  ;;  %v4475_v18 = vrot.slane %v4470_v40, 4  ;;  %v79_v38 = vld [vmem:[%s7553_s2 + $0x18] sm:$0xf] }
 0x808   :  { %v4496_v8 = vshrl.u32 %v4478_v23, 16  ;;  %v4493_v57 = vpack.i.b16 %v4478_v23, %v4422_v34 }
 0x809   :  { %v4479_v25 = vrot.slane %v4474_v37, 4  ;;  %v4482_v4 = vsel %vm354_vm0, %v4474_v37, %v4481_v20  ;;  %v4476_v22 = vsel %vm354_vm0, %v4475_v18, %v4458_v10  ;;  %v4095_v0 = vpop.permute.xlu2 %4094  ;;  %v74_v10 = vld [vmem:[%s7553_s2 + $0x4] sm:$0xf] }
 0x80a   :  { %v4497_v45 = vpack.i.b16 %v4496_v8, %v4495_v5  ;;  %v4512_v52 = vshrl.u32 %v4482_v4, 16  ;;  %v4509_v31 = vpack.i.b16 %v4482_v4, %v4426_v50  ;;  %v4488_v61 = vshrl.u32 %v4476_v22, 16  ;;  %v77_v50 = vld [vmem:[%s7553_s2 + $0x10] sm:$0xf]  ;;  %v78_v5 = vld [vmem:[%s7553_s2 + $0x14] sm:$0xf] }
 0x80b   :  { %v4480_v27 = vsel %vm354_vm0, %v4479_v25, %v4462_v46  ;;  %v4485_v7 = vpack.i.b16 %v4476_v22, %v4420_v48  ;;  %v4100_v20 = vsel %vm3783_vm4, %v4095_v0, 0 }
 0x80c   :  { %5767 = vxpose.binary.xlu2.c.b16.start.end [1/2] (short) (narrow) %v4497_v45, %v4493_v57, 16  ;;  %v4513_v58 = vpack.i.b16 %v4512_v52, %v4511_v44  ;;  %v4504_v11 = vshrl.u32 %v4480_v27, 16  ;;  %v4501_v54 = vpack.i.b16 %v4480_v27, %v4424_v53  ;;  %v4489_v46 = vpack.i.b16 %v4488_v61, %v4487_v21 }
 0x80e   :  { %5764 = vxpose.binary.xlu1.c.b16.start.end [1/2] (short) (narrow) %v4513_v58, %v4509_v31, 16  ;;  %v4505_v19 = vpack.i.b16 %v4504_v11, %v4503_v39 }
 0x810   :  { %5770 = vxpose.binary.xlu0.c.b16.start.end [1/2] (short) (narrow) %v4505_v19, %v4501_v54, 16 }
 0x811   :  { %v4032_v6 = vpop.permute.xlu2 %4031 }
 0x812   :  { %v4037_v1 = vsel %vm3783_vm4, %v4032_v6, 0 }
 0x816   :  { %v3822_v55 = vpop.permute.xlu1 %3821 }
 0x817   :  { %v3827_v56 = vsel %vm3783_vm4, %v3822_v55, 0 }
 0x818   :  { %3836 = vmatpush.bf16.msra.mxu2 %v3827_v56 }
 0x81b   :  { %5632 = vmatmul.msk.bf16.vlgmr.msra.gmra.mxu2 %vm3585_vm3, %v7012_v51  ;;  %v76_v51 = vld [vmem:[%s7553_s2 + $0xc] sm:$0xf] }
 0x81c   :  { %3920 = vmatpush.bf16.msrb.mxu2 %v3911_v32 }
 0x81d   :  { %5773 = vxpose.binary.xlu2.c.b16.start.end [1/2] (short) (narrow) %v4489_v46, %v4485_v7, 16 }
 0x81e   :  { %v3885_v24 = vpop.permute.xlu1 %3884  ;;  %5779 = vxpose.binary.xlu1.c.b16.start.end [1/2] (short) (narrow) %v74_v10, %v73_v63, 16 }
 0x81f   :  { %v3890_v59 = vsel %vm3783_vm4, %v3885_v24, 0 }
 0x820   :  { %4004 = vmatpush.bf16.msra.mxu2 %v3995_v41  ;;  %3899 = vmatpush.bf16.msrb.mxu1 %v3890_v59 }
 0x821   :  { %5776 = vxpose.binary.xlu0.c.b16.start.end [1/2] (short) (narrow) %v76_v51, %v75_v9, 16 }
 0x823   :  { %5635 = vmatmul.msk.bf16.vlgmr.msrb.gmra.mxu1 %vm3585_vm3, %v7007_v62 }
 0x824   :  { %3983 = vmatpush.bf16.msra.mxu1 %v3974_v12 }
 0x826   :  { %v3948_v34 = vpop.permute.xlu1 %3947 }
 0x827   :  { %v3953_v40 = vsel %vm3783_vm4, %v3948_v34, 0 }
 0x828   :  { %3962 = vmatpush.bf16.msra.mxu0 %v3953_v40 }
 0x82b   :  { %5636 = vmatmul.msk.bf16.vlgmr.msrb.gmra.mxu2 %vm3585_vm3, %v6999_v16  ;;  %5638 = vmatmul.msk.bf16.vlgmr.msra.gmra.mxu0 %vm3585_vm3, %v7042_v28 }
 0x82c   :  { %4046 = vmatpush.bf16.msrb.mxu0 %v4037_v1  ;;  %v4011_v62 = vpop.permute.xlu0 %4010 }
 0x82d   :  { %5782 = vxpose.binary.xlu2.c.b16.start.end [1/2] (short) (narrow) %v80_v33, %v79_v38, 16  ;;  %v4016_v37 = vsel %vm3783_vm4, %v4011_v62, 0 }
 0x82e   :  { %4025 = vmatpush.bf16.msra.mxu3 %v4016_v37  ;;  %v4074_v23 = vpop.permute.xlu1 %4073 }
 0x82f   :  { %v4079_v16 = vsel %vm3783_vm4, %v4074_v23, 0 }
 0x830   :  { %4088 = vmatpush.bf16.msrb.mxu2 %v4079_v16 }
 0x831   :  { %5641 = vmatmul.msk.bf16.vlgmr.msra.gmra.mxu3 %vm3585_vm3, %v7038_v47 }
 0x832   :  { %4109 = vmatpush.bf16.msrb.mxu3 %v4100_v20 }
 0x833   :  { %5785 = vxpose.binary.xlu0.c.b16.start.end [1/2] (short) (narrow) %v78_v5, %v77_v50, 16 }
 0x834   :  { %5639 = vmatmul.msk.bf16.vlgmr.msra.gmra.mxu1 %vm3585_vm3, %v7044_v3  ;;  %v4053_v28 = vpop.permute.xlu0 %4052 }
 0x835   :  { %v4058_v8 = vsel %vm3783_vm4, %v4053_v28, 0 }
 0x836   :  { %4067 = vmatpush.bf16.msrb.mxu1 %v4058_v8 }
 0x83b   :  { %5640 = vmatmul.msk.bf16.vlgmr.msra.gmra.mxu2 %vm3585_vm3, %v7036_v13  ;;  %5642 = vmatmul.msk.bf16.vlgmr.msrb.gmra.mxu0 %vm3585_vm3, %v7026_v2 }
 0x841   :  { %5645 = vmatmul.msk.bf16.vlgmr.msrb.gmra.mxu3 %vm3585_vm3, %v7021_v15 }
 0x844   :  { %5643 = vmatmul.msk.bf16.vlgmr.msrb.gmra.mxu1 %vm3585_vm3, %v7028_v43 }
 0x84b   :  { %5644 = vmatmul.msk.bf16.vlgmr.msrb.gmra.mxu2 %vm3585_vm3, %v7019_v35 }
 0x89e   :  { %v7175_v47 = vpop.f32.mrf.mxu2 }
 0x8a0   :  { %v7177_v3 = vpop.f32.mrf.mxu1 }
 0x8a6   :  { %v3840_v25 = vpop.f32.mrf.mxu2 }
 0x8a8   :  { %v3903_v4 = vpop.f32.mrf.mxu1  ;;  %v7179_v53 = vpop.f32.mrf.mxu0 }
 0x8ad   :  { %v5768_v13 = vpop.trf.xlu2 }
 0x8ae   :  { %v7181_v57 = vpop.f32.mrf.mxu2 }
 0x8b0   :  { %v3966_v2 = vpop.f32.mrf.mxu0 }
 0x8b1   :  { %v7183_v45 = vpop.f32.mrf.mxu1 }
 0x8b4   :  { %v7185_v15 = vpop.f32.mrf.mxu3 }
 0x8b5   :  { %v5769_v43 = vpop.trf.xlu2 }
 0x8b6   :  { %v3924_v44 = vpop.f32.mrf.mxu2 }
 0x8b8   :  { %v7187_v35 = vpop.f32.mrf.mxu0 }
 0x8b9   :  { %v3987_v52 = vpop.f32.mrf.mxu1 }
 0x8ba   :  { %v5765_v27 = vpop.trf.xlu1 }
 0x8bb   :  { %v4649_v31 = vrot.slane %v5765_v27, 4 }
 0x8bc   :  { %v4029_v58 = vpop.f32.mrf.mxu3  ;;  %v5771_v39 = vpop.trf.xlu0 }
 0x8bd   :  { %v4650_v11 = vsel %vm354_vm0, %v4649_v31, %v5768_v13  ;;  %v4643_v54 = vrot.slane %v5771_v39, 4 }
 0x8be   :  { %v5774_v19 = vpop.trf.xlu2  ;;  %v4654_v18 = vperm.slane %v4650_v11, %v6172_v42  ;;  %v7191_v49 = vpop.f32.mrf.mxu2 }
 0x8bf   :  { %v4644_v26 = vsel %vm354_vm0, %v4643_v54, %v5774_v19 }
 0x8c0   :  { %v4655_v22 = vrot.slane %v4654_v18, 4  ;;  %v4648_v48 = vperm.slane %v4644_v26, %v6172_v42  ;;  %v4050_v55 = vpop.f32.mrf.mxu0 }
 0x8c1   :  { %v7195_v61 = vpop.f32.mrf.mxu1 }
 0x8c2   :  { %v4657_v56 = vrot.slane %v4648_v48, 4  ;;  %v5766_v32 = vpop.trf.xlu1  ;;  %v4656_v21 = vsel %vm354_vm0, %v4655_v22, %v4648_v48 }
 0x8c3   :  { %v4677_v0 = vrot.slane %v5766_v32, 4  ;;  %v4662_v59 = vperm.slane %v4656_v21, %v6189_v60 }
 0x8c4   :  { %v7198_v7 = vpop.f32.mrf.mxu3  ;;  %v5772_v46 = vpop.trf.xlu0  ;;  %v4658_v41 = vsel %vm354_vm0, %v4654_v18, %v4657_v56 }
 0x8c5   :  { %v4678_v63 = vsel %vm354_vm0, %v4677_v0, %v5769_v43  ;;  %v4671_v10 = vrot.slane %v5772_v46, 4  ;;  %v4666_v40 = vperm.slane %v4658_v41, %v6189_v60  ;;  %v4667_v20 = vrot.slane %v4662_v59, 4 }
 0x8c6   :  { %v5775_v24 = vpop.trf.xlu2  ;;  %v4682_v9 = vperm.slane %v4678_v63, %v6172_v42  ;;  %v4008_v51 = vpop.f32.mrf.mxu2  ;;  %v4702_v5 = vshrl.u32 %v4662_v59, 16 }
 0x8c7   :  { %v4672_v12 = vsel %vm354_vm0, %v4671_v10, %v5775_v24  ;;  %v4669_v16 = vrot.slane %v4666_v40, 4  ;;  %v4668_v2 = vsel %vm354_vm0, 0, %v4667_v20  ;;  %v4714_v31 = vshrl.u32 %v4666_v40, 16 }
 0x8c8   :  { %v4683_v6 = vrot.slane %v4682_v9, 4  ;;  %v4676_v34 = vperm.slane %v4672_v12, %v6172_v42  ;;  %v4708_v48 = vshrl.u32 %v4668_v2, 16 }
 0x8c9   :  { %v4071_v1 = vpop.f32.mrf.mxu1  ;;  %v4670_v11 = vsel %vm354_vm0, 0, %v4669_v16 }
 0x8ca   :  { %v4684_v38 = vsel %vm354_vm0, %v4683_v6, %v4676_v34  ;;  %v4685_v33 = vrot.slane %v4676_v34, 4  ;;  %v5780_v62 = vpop.trf.xlu1  ;;  %v4720_v0 = vshrl.u32 %v4670_v11, 16 }
 0x8cb   :  { %v4690_v37 = vperm.slane %v4684_v38, %v6189_v60 }
 0x8cc   :  { %v4686_v23 = vsel %vm354_vm0, %v4682_v9, %v4685_v33  ;;  %v4113_v50 = vpop.f32.mrf.mxu3 }
 0x8cd   :  { %v4701_v28 = vpack.i.b16 %v4690_v37, %v4662_v59  ;;  %v4703_v8 = vshrl.u32 %v4690_v37, 16  ;;  %v4694_v25 = vperm.slane %v4686_v23, %v6189_v60  ;;  %v4695_v4 = vrot.slane %v4690_v37, 4  ;;  %v5777_v43 = vpop.trf.xlu0 }
 0x8ce   :  { %v7211_v13 = vpop.f32.mrf.mxu2  ;;  %v5783_v1 = vpop.trf.xlu2 }
 0x8cf   :  { %v4743_v44 = vsel %vm3783_vm4, %v4701_v28, 0  ;;  %v4704_v52 = vpack.i.b16 %v4703_v8, %v4702_v5  ;;  %v4713_v27 = vpack.i.b16 %v4694_v25, %v4666_v40  ;;  %v4696_v58 = vsel %vm354_vm0, 0, %v4695_v4 }
 0x8d0   :  { %4752 = vmatpush.bf16.msra.mxu0 %v4743_v44  ;;  %v4715_v39 = vshrl.u32 %v4694_v25, 16  ;;  %v4697_v54 = vrot.slane %v4694_v25, 4  ;;  %v4707_v26 = vpack.i.b16 %v4696_v58, %v4668_v2  ;;  %v4709_v55 = vshrl.u32 %v4696_v58, 16 }
 0x8d1   :  { %v4778_v19 = vsel %vm3783_vm4, %v4704_v52, 0  ;;  %v4883_v18 = vsel %vm3783_vm4, %v4713_v27, 0 }
 0x8d2   :  { %4787 = vmatpush.bf16.msra.mxu1 %v4778_v19  ;;  %v4716_v22 = vpack.i.b16 %v4715_v39, %v4714_v31  ;;  %v4698_v56 = vsel %vm354_vm0, 0, %v4697_v54  ;;  %v4813_v32 = vsel %vm3783_vm4, %v4707_v26, 0  ;;  %v5781_v41 = vpop.trf.xlu1  ;;  %v4710_v10 = vpack.i.b16 %v4709_v55, %v4708_v48  ;;  %v7238_v39 = vld [vmem:[%s7556_s5] ss:$0 sm:$0xff]  ;;  %v7247_v26 = vld [vmem:[%s7556_s5 + $0x1] ss:$0 sm:$0xff] }
 0x8d3   :  { %5646 = vmatmul.msk.bf16.vlgmr.msra.gmra.mxu0 %vm3585_vm3, %v5780_v62  ;;  %v4719_v21 = vpack.i.b16 %v4698_v56, %v4670_v11  ;;  %v4721_v46 = vshrl.u32 %v4698_v56, 16  ;;  %4822 = vmatpush.bf16.msra.mxu2 %v4813_v32  ;;  %v5495_v55 = vmul.f32 %v7238_v39, %v7058_v17  ;;  %v5493_v17 = vmul.f32 %v7238_v39, %v7177_v3 }
 0x8d4   :  { %4892 = vmatpush.bf16.msrb.mxu0 %v4883_v18  ;;  %v4918_v63 = vsel %vm3783_vm4, %v4716_v22, 0  ;;  %v4848_v51 = vsel %vm3783_vm4, %v4710_v10, 0  ;;  %v5491_v18 = vmul.f32 %v7238_v39, %v7048_v30  ;;  %v5489_v22 = vmul.f32 %v7238_v39, %v7052_v29 }
 0x8d5   :  { %v4953_v24 = vsel %vm3783_vm4, %v4719_v21, 0  ;;  %v4722_v59 = vpack.i.b16 %v4721_v46, %v4720_v0  ;;  %5647 = vmatmul.msk.bf16.vlgmr.msra.gmra.mxu1 %vm3585_vm3, %v5781_v41  ;;  %v5778_v12 = vpop.trf.xlu0  ;;  %4857 = vmatpush.bf16.msra.mxu3 %v4848_v51  ;;  %v5488_v30 = vmul.f32 %v7238_v39, %v7060_v36  ;;  %v5492_v46 = vmul.f32 %v7238_v39, %v7068_v14 }
 0x8d6   :  { %4927 = vmatpush.bf16.msrb.mxu1 %v4918_v63  ;;  %v4092_v9 = vpop.f32.mrf.mxu2  ;;  %5648 = vmatmul.msk.bf16.vlgmr.msra.gmra.mxu2 %vm3585_vm3, %v5777_v43  ;;  %v5784_v38 = vpop.trf.xlu2  ;;  %v7254_v32 = vadd.f32 %v7247_v26, %v5491_v18  ;;  %v7257_v21 = vadd.f32 %v7247_v26, %v5489_v22  ;;  %v5490_v29 = vmul.f32 %v7238_v39, %v7175_v47 }
 0x8d7   :  { %4962 = vmatpush.bf16.msrb.mxu2 %v4953_v24  ;;  %v4988_v6 = vsel %vm3783_vm4, %v4722_v59, 0  ;;  %v5496_v24 = vmul.f32 %v7238_v39, %v7179_v53  ;;  %v7275_v14 = vadd.f32 %v7247_v26, %v5495_v55  ;;  %v5494_v47 = vmul.f32 %v7238_v39, %v7181_v57 }
 0x8d8   :  { %5649 = vmatmul.msk.bf16.vlgmr.msra.gmra.mxu3 %vm3585_vm3, %v5778_v12  ;;  %v5497_v3 = vmul.f32 %v7238_v39, %v7183_v45  ;;  %v5499_v51 = vmul.f32 %v7238_v39, %v7185_v15  ;;  %v5500_v53 = vmul.f32 %v7238_v39, %v7187_v35  ;;  %v7292_v57 = vadd.f32 %v7247_v26, %v5492_v46 }
 0x8d9   :  { %4997 = vmatpush.bf16.msrb.mxu3 %v4988_v6  ;;  %v7300_v35 = vadd.f32 %v7247_v26, %v5493_v17 }
 0x8df   :  { %v5786_v34 = vpop.trf.xlu0 }
 0x8e3   :  { %5650 = vmatmul.msk.bf16.vlgmr.msrb.gmra.mxu0 %vm3585_vm3, %v5786_v34 }
 0x8e6   :  { %5652 = vmatmul.msk.bf16.vlgmr.msrb.gmra.mxu2 %vm3585_vm3, %v5783_v1 }
 0x8e7   :  { %v5787_v40 = vpop.trf.xlu0 }
 0x8e8   :  { %5651 = vmatmul.msk.bf16.vlgmr.msrb.gmra.mxu1 %vm3585_vm3, %v5787_v40  ;;  %5653 = vmatmul.msk.bf16.vlgmr.msrb.gmra.mxu3 %vm3585_vm3, %v5784_v38  ;;  %v7289_v40 = vadd.f32 %v7247_v26, %v5488_v30  ;;  %v7297_v38 = vadd.f32 %v7247_v26, %v5490_v29 }
 0x950   :  { %v4754_v33 = vpop.f32.mrf.mxu0 }
 0x951   :  { %5003 = vxpose.xlu1.b32.start.end [1/1] (short) (narrow) %v4754_v33, 16  ;;  %v7303_v33 = vadd.f32 %v7247_v26, %v5496_v24 }
 0x952   :  { %v4789_v62 = vpop.f32.mrf.mxu1 }
 0x953   :  { %5035 = vxpose.xlu2.b32.start.end [1/1] (short) (narrow) %v4789_v62, 16 }
 0x958   :  { %v4756_v20 = vpop.f32.mrf.mxu0 }
 0x959   :  { %v4824_v37 = vpop.f32.mrf.mxu2  ;;  %v7306_v20 = vadd.f32 %v7247_v26, %v5494_v47 }
 0x95a   :  { %5067 = vxpose.xlu0.b32.start.end [1/1] (short) (narrow) %v4824_v37, 16  ;;  %v4791_v23 = vpop.f32.mrf.mxu1  ;;  %v7309_v37 = vadd.f32 %v7247_v26, %v5497_v3 }
 0x95b   :  { %v4859_v50 = vpop.f32.mrf.mxu3  ;;  %v5498_v23 = vmul.f32 %v7238_v39, %v7191_v49  ;;  %v5501_v49 = vmul.f32 %v7238_v39, %v7195_v61 }
 0x95d   :  { %v7326_v18 = vadd.f32 %v7247_v26, %v5498_v23 }
 0x960   :  { %v4894_v5 = vpop.f32.mrf.mxu0 }
 0x961   :  { %5099 = vxpose.xlu1.b32.start.end [1/1] (short) (narrow) %v4859_v50, 16  ;;  %v4826_v16 = vpop.f32.mrf.mxu2 }
 0x962   :  { %v7317_v16 = vadd.f32 %v7247_v26, %v5500_v53 }
 0x963   :  { %5131 = vxpose.xlu2.b32.start.end [1/1] (short) (narrow) %v4894_v5, 16  ;;  %v4861_v8 = vpop.f32.mrf.mxu3  ;;  %v7314_v5 = vadd.f32 %v7247_v26, %v5499_v51  ;;  %v7354_v51 = vmul.f32 %v7238_v39, %v7198_v7 }
 0x965   :  { %v4929_v28 = vpop.f32.mrf.mxu1 }
 0x968   :  { %v4896_v25 = vpop.f32.mrf.mxu0 }
 0x969   :  { %v4964_v4 = vpop.f32.mrf.mxu2 }
 0x96a   :  { %5163 = vxpose.xlu0.b32.start.end [1/1] (short) (narrow) %v4929_v28, 16 }
 0x96b   :  { %v4999_v43 = vpop.f32.mrf.mxu3 }
 0x96d   :  { %v4931_v2 = vpop.f32.mrf.mxu1 }
 0x971   :  { %5195 = vxpose.xlu1.b32.start.end [1/1] (short) (narrow) %v4964_v4, 16  ;;  %v4966_v44 = vpop.f32.mrf.mxu2 }
 0x973   :  { %5227 = vxpose.xlu2.b32.start.end [1/1] (short) (narrow) %v4999_v43, 16  ;;  %v5001_v52 = vpop.f32.mrf.mxu3 }
 0x9ec   :  { %v5051_v27 = vpop.trf.xlu2 }
 0x9ed   :  { %v5273_v0 = vrot.slane %v5051_v27, 4 }
 0x9f4   :  { %v7233_v58 = vpop.trf.xlu2 }
 0x9f5   :  { %v5019_v31 = vpop.trf.xlu1  ;;  %v5385_v25 = vrot.slane %v7233_v58, 4 }
 0x9f6   :  { %v5261_v56 = vrot.slane %v5019_v31, 4 }
 0x9fc   :  { %v7240_v54 = vpop.trf.xlu2 }
 0x9fd   :  { %v5020_v11 = vpop.trf.xlu1 }
 0x9fe   :  { %v5083_v19 = vpop.trf.xlu0  ;;  %v5373_v50 = vrot.slane %v5020_v11, 4 }
 0x9ff   :  { %v5259_v48 = vrot.slane %v5083_v19, 4  ;;  %v5262_v41 = vsel %vm354_vm0, %v5083_v19, %v5261_v56 }
 0xa00   :  { %v5270_v6 = vperm.slane %v5262_v41, %v6172_v42 }
 0xa01   :  { %v5260_v36 = vsel %vm354_vm0, %v5259_v48, %v5019_v31 }
 0xa02   :  { %v5266_v45 = vperm.slane %v5260_v36, %v6172_v42  ;;  %v5321_v28 = vrot.slane %v5270_v6, 4 }
 0xa04   :  { %v7268_v10 = vpop.trf.xlu2  ;;  %v5309_v4 = vrot.slane %v5266_v45, 4 }
 0xa05   :  { %v5115_v63 = vpop.trf.xlu1 }
 0xa06   :  { %v5271_v59 = vrot.slane %v5115_v63, 4  ;;  %v5274_v9 = vsel %vm354_vm0, %v5115_v63, %v5273_v0  ;;  %v5084_v12 = vpop.trf.xlu0  ;;  %v7341_v63 = vadd.f32 %v7247_v26, %v5501_v49 }
 0xa07   :  { %v5282_v1 = vperm.slane %v5274_v9, %v6172_v42  ;;  %v5371_v62 = vrot.slane %v5084_v12, 4  ;;  %v5374_v43 = vsel %vm354_vm0, %v5084_v12, %v5373_v50  ;;  %v5285_v12 = vrot.slane %v7240_v54, 4 }
 0xa08   :  { %v5272_v34 = vsel %vm354_vm0, %v5271_v59, %v5051_v27  ;;  %v5382_v0 = vperm.slane %v5374_v43, %v6172_v42 }
 0xa09   :  { %v5278_v15 = vperm.slane %v5272_v34, %v6172_v42  ;;  %v5319_v8 = vrot.slane %v5282_v1, 4  ;;  %v5322_v27 = vsel %vm354_vm0, %v5282_v1, %v5321_v28  ;;  %v5372_v31 = vsel %vm354_vm0, %v5371_v62, %v5020_v11 }
 0xa0a   :  { %v7336_v29 = vperm.slane %v5322_v27, %v6189_v60  ;;  %v5378_v17 = vperm.slane %v5372_v31, %v6172_v42 }
 0xa0b   :  { %v5307_v2 = vrot.slane %v5278_v15, 4  ;;  %v5310_v22 = vsel %vm354_vm0, %v5278_v15, %v5309_v4  ;;  %v5320_v30 = vsel %vm354_vm0, %v5319_v8, %v5270_v6  ;;  %v5397_v6 = vrot.slane %v7268_v10, 4 }
 0xa0c   :  { %v5243_v52 = vpop.trf.xlu2  ;;  %v7344_v24 = vperm.slane %v5310_v22, %v6189_v60  ;;  %v5326_v59 = vperm.slane %v5320_v30, %v6189_v60  ;;  %v5369_v34 = vrot.slane %v7336_v29, 4  ;;  %v5421_v1 = vrot.slane %v5378_v17, 4 }
 0xa0d   :  { %v5116_v44 = vpop.trf.xlu1  ;;  %v5295_v56 = vrot.slane %v5243_v52, 4  ;;  %v5308_v11 = vsel %vm354_vm0, %v5307_v2, %v5266_v45  ;;  %v5433_v45 = vrot.slane %v5382_v0, 4 }
 0xa0e   :  { %v5383_v19 = vrot.slane %v5116_v44, 4  ;;  %v5386_v48 = vsel %vm354_vm0, %v5116_v44, %v5385_v25  ;;  %v5179_v55 = vpop.trf.xlu0  ;;  %v5314_v53 = vperm.slane %v5308_v11, %v6189_v60  ;;  %v5361_v23 = vrot.slane %v7344_v24, 4 }
 0xa0f   :  { %v5297_v46 = vrot.slane %v5179_v55, 4  ;;  %v5296_v41 = vsel %vm354_vm0, %v5295_v56, %v5179_v55  ;;  %v5394_v36 = vperm.slane %v5386_v48, %v6172_v42  ;;  %v5365_v25 = vrot.slane %v5326_v59, 4 }
 0xa10   :  { %v5384_v61 = vsel %vm354_vm0, %v5383_v19, %v7233_v58  ;;  %v5302_v47 = vperm.slane %v5296_v41, %v6172_v42  ;;  %v7371_v19 = vld [vmem:[%s7556_s5 + $0x2] ss:$0 sm:$0xff] }
 0xa11   :  { %v5298_v58 = vsel %vm354_vm0, %v5243_v52, %v5297_v46  ;;  %v5390_v9 = vperm.slane %v5384_v61, %v6172_v42  ;;  %v5431_v50 = vrot.slane %v5394_v36, 4  ;;  %v5357_v52 = vrot.slane %v5314_v53, 4 }
 0xa12   :  { %v5306_v3 = vperm.slane %v5298_v58, %v6172_v42  ;;  %v5331_v2 = vrot.slane %v5302_v47, 4  ;;  %v7364_v49 = vsel %vm354_vm0, %v5394_v36, %v5433_v45 }
 0xa13   :  { %v5419_v4 = vrot.slane %v5390_v9, 4  ;;  %v5422_v30 = vsel %vm354_vm0, %v5390_v9, %v5421_v1  ;;  %v5432_v61 = vsel %vm354_vm0, %v5431_v50, %v5382_v0 }
 0xa14   :  { %v5343_v15 = vrot.slane %v5306_v3, 4  ;;  %v5244_v7 = vpop.trf.xlu2 }
 0xa15   :  { %v5211_v62 = vpop.trf.xlu1  ;;  %v5407_v56 = vrot.slane %v5244_v7, 4  ;;  %v5420_v11 = vsel %vm354_vm0, %v5419_v4, %v5378_v17 }
 0xa16   :  { %v5283_v28 = vrot.slane %v5211_v62, 4  ;;  %v5286_v8 = vsel %vm354_vm0, %v5211_v62, %v5285_v12  ;;  %v5180_v44 = vpop.trf.xlu0 }
 0xa17   :  { %v5294_v43 = vperm.slane %v5286_v8, %v6172_v42  ;;  %v5409_v31 = vrot.slane %v5180_v44, 4  ;;  %v5408_v62 = vsel %vm354_vm0, %v5407_v56, %v5180_v44 }
 0xa18   :  { %v5284_v27 = vsel %vm354_vm0, %v5283_v28, %v7240_v54 }
 0xa19   :  { %v5290_v22 = vperm.slane %v5284_v27, %v6172_v42  ;;  %v5344_v48 = vsel %vm354_vm0, %v5343_v15, %v5294_v43  ;;  %v5345_v55 = vrot.slane %v5294_v43, 4  ;;  %v5410_v54 = vsel %vm354_vm0, %v5244_v7, %v5409_v31 }
 0xa1a   :  { %v5350_v46 = vperm.slane %v5344_v48, %v6189_v60  ;;  %v7389_v17 = vperm.slane %v5410_v54, %v6172_v42 }
 0xa1b   :  { %v5332_v41 = vsel %vm354_vm0, %v5331_v2, %v5290_v22  ;;  %v5333_v36 = vrot.slane %v5290_v22, 4  ;;  %v5346_v58 = vsel %vm354_vm0, %v5306_v3, %v5345_v55  ;;  %v7408_v22 = vld [vmem:[%s7556_s5 + $0x3] ss:$0 sm:$0xff] }
 0xa1c   :  { %v5338_v12 = vperm.slane %v5332_v41, %v6189_v60  ;;  %v5354_v45 = vperm.slane %v5346_v58, %v6189_v60  ;;  %v5363_v15 = vrot.slane %v5350_v46, 4  ;;  %v5366_v9 = vsel %vm354_vm0, %v5350_v46, %v5365_v25 }
 0xa1d   :  { %v5334_v0 = vsel %vm354_vm0, %v5302_v47, %v5333_v36  ;;  %v5527_v1 = vmul.f32 %v7371_v19, %v5366_v9  ;;  %v5212_v54 = vpop.trf.xlu1  ;;  %v5438_v41 = vperm.slane %v5432_v61, %v6189_v60  ;;  %v5455_v58 = vrot.slane %v7389_v17, 4 }
 0xa1e   :  { %v5342_v50 = vperm.slane %v5334_v0, %v6189_v60  ;;  %v5355_v3 = vrot.slane %v5338_v12, 4  ;;  %v5358_v28 = vsel %vm354_vm0, %v5338_v12, %v5357_v52  ;;  %v5364_v8 = vsel %vm354_vm0, %v5363_v15, %v5326_v59 }
 0xa1f   :  { %v5367_v7 = vrot.slane %v5354_v45, 4  ;;  %v5370_v25 = vsel %vm354_vm0, %v5354_v45, %v5369_v34  ;;  %v5523_v4 = vmul.f32 %v7371_v19, %v5358_v28  ;;  %v5526_v47 = vmul.f32 %v7371_v19, %v5364_v8 }
 0xa20   :  { %v5356_v2 = vsel %vm354_vm0, %v5355_v3, %v5314_v53  ;;  %v5359_v43 = vrot.slane %v5342_v50, 4  ;;  %v5362_v44 = vsel %vm354_vm0, %v5342_v50, %v5361_v23  ;;  %v5529_v27 = vmul.f32 %v7371_v19, %v5370_v25 }
 0xa21   :  { %v5368_v31 = vsel %vm354_vm0, %v5367_v7, %v7336_v29  ;;  %v5522_v52 = vmul.f32 %v7371_v19, %v5356_v2  ;;  %v5525_v59 = vmul.f32 %v7371_v19, %v5362_v44  ;;  %v5539_v34 = vadd.f32 %v5523_v4, %v7257_v21 }
 0xa22   :  { %v5360_v53 = vsel %vm354_vm0, %v5359_v43, %v7344_v24  ;;  %v5528_v23 = vmul.f32 %v7371_v19, %v5368_v31  ;;  %v5542_v48 = vadd.f32 %v5526_v47, %v7292_v57  ;;  %v5414_v29 = vperm.slane %v5408_v62, %v6172_v42 }
 0xa23   :  { %v5524_v55 = vmul.f32 %v7371_v19, %v5360_v53  ;;  %v5538_v56 = vadd.f32 %v5522_v52, %v7289_v40  ;;  %v5541_v21 = vadd.f32 %v5525_v59, %v7254_v32  ;;  %v5543_v46 = vadd.f32 %v5527_v1, %v7300_v35 }
 0xa24   :  { %v5544_v36 = vadd.f32 %v5528_v23, %v7306_v20  ;;  %v5556_v24 = vadd.f32 %v7408_v22, %v5539_v34  ;;  %v5545_v12 = vadd.f32 %v5529_v27, %v7275_v14  ;;  %v5426_v32 = vperm.slane %v5420_v11, %v6189_v60 }
 0xa25   :  { %v5540_v57 = vadd.f32 %v5524_v55, %v7297_v38  ;;  %v5555_v45 = vadd.f32 %v7408_v22, %v5538_v56  ;;  %v5558_v40 = vadd.f32 %v7408_v22, %v5541_v21  ;;  %v5559_v35 = vadd.f32 %v7408_v22, %v5542_v48 }
 0xa26   :  { %5573 = vst.msk [vmem:[%s7557_s6 + $0x8] sm:$0xff] %vm5571_vm5, %v5556_v24  ;;  %v5395_v20 = vrot.slane %v5212_v54, 4  ;;  %v5398_v38 = vsel %vm354_vm0, %v5212_v54, %v5397_v6  ;;  %v5560_v61 = vadd.f32 %v7408_v22, %v5543_v46  ;;  %v5443_v11 = vrot.slane %v5414_v29, 4 }
 0xa27   :  { %v5557_v14 = vadd.f32 %v7408_v22, %v5540_v57  ;;  %5572 = vst.msk [vmem:[%s7557_s6] sm:$0xff] %vm5571_vm5, %v5555_v45  ;;  %v5406_v15 = vperm.slane %v5398_v38, %v6172_v42  ;;  %v5430_v9 = vperm.slane %v5422_v30, %v6189_v60  ;;  %v5442_v0 = vperm.slane %v7364_v49, %v6189_v60 }
 0xa28   :  { %v5561_v1 = vadd.f32 %v7408_v22, %v5544_v36  ;;  %5575 = vst.msk [vmem:[%s7557_s6 + $0x18] sm:$0xff] %vm5571_vm5, %v5558_v40  ;;  %v5396_v6 = vsel %vm354_vm0, %v5395_v20, %v7268_v10  ;;  %v5562_v62 = vadd.f32 %v7408_v22, %v5545_v12  ;;  %v5520_v3 = vadd.f32 %v7247_v26, %v7354_v51 }
 0xa29   :  { %5574 = vst.msk [vmem:[%s7557_s6 + $0x10] sm:$0xff] %vm5571_vm5, %v5557_v14  ;;  %v5402_v30 = vperm.slane %v5396_v6, %v6172_v42  ;;  %v5456_v49 = vsel %vm354_vm0, %v5455_v58, %v5406_v15  ;;  %v5457_v50 = vrot.slane %v5406_v15, 4  ;;  %v5502_v28 = vmul.f32 %v7238_v39, %v7211_v13 }
 0xa2a   :  { %v5477_v8 = vrot.slane %v5438_v41, 4  ;;  %5576 = vst.msk [vmem:[%s7557_s6 + $0x20] sm:$0xff] %vm5571_vm5, %v5559_v35  ;;  %v5462_v10 = vperm.slane %v5456_v49, %v6189_v60  ;;  %v5469_v7 = vrot.slane %v5426_v32, 4  ;;  %v5473_v2 = vrot.slane %v5430_v9, 4 }
 0xa2b   :  { %5577 = vst.msk [vmem:[%s7557_s6 + $0x28] sm:$0xff] %vm5571_vm5, %v5560_v61  ;;  %v5444_v42 = vsel %vm354_vm0, %v5443_v11, %v5402_v30  ;;  %v5445_v51 = vrot.slane %v5402_v30, 4  ;;  %v5458_v13 = vsel %vm354_vm0, %v7389_v17, %v5457_v50  ;;  %v5481_v43 = vrot.slane %v5442_v0, 4 }
 0xa2c   :  { %5578 = vst.msk [vmem:[%s7557_s6 + $0x30] sm:$0xff] %vm5571_vm5, %v5561_v1  ;;  %v5450_v39 = vperm.slane %v5444_v42, %v6189_v60  ;;  %v5466_v25 = vperm.slane %v5458_v13, %v6189_v60  ;;  %v5475_v4 = vrot.slane %v5462_v10, 4  ;;  %v5478_v47 = vsel %vm354_vm0, %v5462_v10, %v5477_v8 }
 0xa2d   :  { %5579 = vst.msk [vmem:[%s7557_s6 + $0x38] sm:$0xff] %vm5571_vm5, %v5562_v62  ;;  %v5446_v17 = vsel %vm354_vm0, %v5414_v29, %v5445_v51  ;;  %v5535_v44 = vmul.f32 %v7371_v19, %v5478_v47  ;;  %v5519_v36 = vadd.f32 %v7247_v26, %v5502_v28 }
 0xa2e   :  { %v5454_v27 = vperm.slane %v5446_v17, %v6189_v60  ;;  %v5467_v31 = vrot.slane %v5450_v39, 4  ;;  %v5470_v52 = vsel %vm354_vm0, %v5450_v39, %v5469_v7  ;;  %v5476_v59 = vsel %vm354_vm0, %v5475_v4, %v5438_v41 }
 0xa2f   :  { %v5479_v34 = vrot.slane %v5466_v25, 4  ;;  %v5482_v53 = vsel %vm354_vm0, %v5466_v25, %v5481_v43  ;;  %v5531_v23 = vmul.f32 %v7371_v19, %v5470_v52  ;;  %v5534_v48 = vmul.f32 %v7371_v19, %v5476_v59 }
 0xa30   :  { %v5468_v55 = vsel %vm354_vm0, %v5467_v31, %v5426_v32  ;;  %v5471_v56 = vrot.slane %v5454_v27, 4  ;;  %v5474_v29 = vsel %vm354_vm0, %v5454_v27, %v5473_v2  ;;  %v5537_v21 = vmul.f32 %v7371_v19, %v5482_v53 }
 0xa31   :  { %v5480_v60 = vsel %vm354_vm0, %v5479_v34, %v5442_v0  ;;  %v5530_v46 = vmul.f32 %v7371_v19, %v5468_v55  ;;  %v5533_v54 = vmul.f32 %v7371_v19, %v5474_v29  ;;  %v5547_v41 = vadd.f32 %v5531_v23, %v7309_v37 }
 0xa32   :  { %v5472_v24 = vsel %vm354_vm0, %v5471_v56, %v5430_v9  ;;  %v5536_v58 = vmul.f32 %v7371_v19, %v5480_v60  ;;  %v5550_v57 = vadd.f32 %v5534_v48, %v7317_v16  ;;  %v5551_v32 = vadd.f32 %v5535_v44, %v7341_v63 }
 0xa33   :  { %v5532_v12 = vmul.f32 %v7371_v19, %v5472_v24  ;;  %v5546_v45 = vadd.f32 %v5530_v46, %v7303_v33  ;;  %v5549_v40 = vadd.f32 %v5533_v54, %v7314_v5  ;;  %v5564_v20 = vadd.f32 %v7408_v22, %v5547_v41 }
 0xa34   :  { %v5552_v35 = vadd.f32 %v5536_v58, %v5519_v36  ;;  %v5553_v26 = vadd.f32 %v5537_v21, %v5520_v3  ;;  %v5567_v16 = vadd.f32 %v7408_v22, %v5550_v57  ;;  %v5568_v5 = vadd.f32 %v7408_v22, %v5551_v32 }
 0xa35   :  { %v5548_v37 = vadd.f32 %v5532_v12, %v7326_v18  ;;  %v5563_v38 = vadd.f32 %v7408_v22, %v5546_v45  ;;  %v5566_v14 = vadd.f32 %v7408_v22, %v5549_v40  ;;  %5581 = vst.msk [vmem:[%s7557_s6 + $0x48] sm:$0xff] %vm5571_vm5, %v5564_v20 }
 0xa36   :  { %v5569_v18 = vadd.f32 %v7408_v22, %v5552_v35  ;;  %v5570_v63 = vadd.f32 %v7408_v22, %v5553_v26  ;;  %5584 = vst.msk [vmem:[%s7557_s6 + $0x60] sm:$0xff] %vm5571_vm5, %v5567_v16 }
 0xa37   :  { %v5565_v33 = vadd.f32 %v7408_v22, %v5548_v37  ;;  %5580 = vst.msk [vmem:[%s7557_s6 + $0x40] sm:$0xff] %vm5571_vm5, %v5563_v38 }
 0xa38   :  { %5583 = vst.msk [vmem:[%s7557_s6 + $0x58] sm:$0xff] %vm5571_vm5, %v5566_v14 }
 0xa39   :  { %5582 = vst.msk [vmem:[%s7557_s6 + $0x50] sm:$0xff] %vm5571_vm5, %v5565_v33 }
 0xa3a   :  { %5585 = vst.msk [vmem:[%s7557_s6 + $0x68] sm:$0xff] %vm5571_vm5, %v5568_v5 }
 0xa3b   :  { %5586 = vst.msk [vmem:[%s7557_s6 + $0x70] sm:$0xff] %vm5571_vm5, %v5569_v18 }
 0xa3c   :  { %5587 = vst.msk [vmem:[%s7557_s6 + $0x78] sm:$0xff] %vm5571_vm5, %v5570_v63 }
 0xa3d   :  { %5592 = vsyncpa [#allocation3], 1 }
 0xa3e   :  { %5593 = vsyncpa [#allocation5], 1 }

</bundles_post_ra>
